<compile_context>
chip_gen: v7x
topology: tpu7x:2x2x1
jax: 0.10.0
libtpu: 0.0.40
codegen_flags: <defaults>
</compile_context>

<pallas_src>
import numpy as np
import jax
import jax.numpy as jnp
from jax.experimental import pallas as pl
from jax.experimental.pallas import tpu as pltpu

ARCSEC_TO_RAD = np.pi / (180.0 * 3600.0)
MIB = 1024 * 1024


def _round_up(x: int, m: int) -> int:
    return ((x + m - 1) // m) * m


def _cdiv(a: int, b: int) -> int:
    return -(-a // b)


def _tpu_caps():
    """(physical VMEM bytes per TensorCore, #TensorCores per chip)."""
    try:
        kind = jax.devices()[0].device_kind.lower()
    except Exception:
        kind = ""
    if "v7" in kind or "tpu7" in kind:
        return 64 * MIB, 2            # v7x: 64 MiB / TC, 2 TCs
    if "v6" in kind:
        return 128 * MIB, 1           # v6e
    if "lite" in kind or "v5e" in kind:
        return 128 * MIB, 1           # v5e
    if "v4" in kind or "v5" in kind:
        return 128 * MIB, 2           # v4 / v5p megacore
    return 64 * MIB, 2                # unknown: conservative VMEM, assume 2 cores


def _make_nudft_kernel(npix: int, npix_cols_pad: int, tile_r: int, tile_k: int,
                       scale: float, rebuild_per_chan: bool):
    """Tiled NUDFT kernel (separable column/row factorization)."""
    half_count = (npix + 1) // 2  # fftshift fold: coord(p) = p or p - npix

    # Static chunking of the eu basis build keeps elementwise temporaries small.
    if npix_cols_pad % 512 == 0:
        chunk = 512
    elif npix_cols_pad % 256 == 0:
        chunk = 256
    else:
        chunk = 128
    chunk = min(chunk, npix_cols_pad)
    n_chunks = npix_cols_pad // chunk

    def nudft_kernel(img_ref, wu_ref, wv_ref, out_re_ref, out_im_ref,
                     eu_cache, acc_re, acc_im):
        # img_ref : (1, tile_r, npix_cols_pad) bf16 -- unshifted, zero-padded image tile
        # wu_ref  : (1, 1, tile_k) f32   -- u spatial freq [rad/pixel]
        # wv_ref  : (1, 1, tile_k) f32   -- v spatial freq [rad/pixel]
        # out_*   : (1, 1, tile_k) f32
        # eu_cache: (npix_cols_pad, 2*tile_k) bf16 -- packed [cos | -sin] column basis
        # acc_*   : (8, tile_k) f32      -- sublane-deferred accumulators
        c = pl.program_id(1)
        r = pl.program_id(2)

        if rebuild_per_chan:
            rebuild = r == 0
        else:
            rebuild = jnp.logical_and(c == 0, r == 0)

        # ---- (re)build the packed column basis, cached in VMEM ----
        @pl.when(rebuild)
        def _build_eu():
            wu = wu_ref[0]                                        # (1, tile_k)
            for blk in range(n_chunks):                           # static loop
                base = blk * chunk
                p = base + jax.lax.broadcasted_iota(jnp.int32, (chunk, tile_k), 0)
                coord = jnp.where(p < half_count, p, p - npix).astype(jnp.float32)
                pu = coord * wu                                   # (chunk, tile_k)
                eu_cache[base:base + chunk, :tile_k] = jnp.cos(pu).astype(jnp.bfloat16)
                eu_cache[base:base + chunk, tile_k:] = (-jnp.sin(pu)).astype(jnp.bfloat16)

        # ---- zero the accumulators at the first row tile ----
        @pl.when(r == 0)
        def _zero_acc():
            acc_re[...] = jnp.zeros_like(acc_re)
            acc_im[...] = jnp.zeros_like(acc_im)

        # ---- stage 1: contract columns on the MXU (bf16 in, f32 accumulate) ----
        t = jnp.dot(img_ref[0], eu_cache[...],
                    preferred_element_type=jnp.float32)           # (tile_r, 2*tile_k)
        t_re = t[:, :tile_k]
        t_im = t[:, tile_k:]

        # ---- stage 2: row phasors built lazily for THIS row tile (EUP overlaps MXU) ----
        wv = wv_ref[0]                                            # (1, tile_k)
        row0 = r * tile_r
        p = row0 + jax.lax.broadcasted_iota(jnp.int32, (tile_r, tile_k), 0)
        coord = jnp.where(p < half_count, p, p - npix).astype(jnp.float32)
        pv = coord * wv                                           # (tile_r, tile_k)
        ev_re = jnp.cos(pv)
        ev_im = -jnp.sin(pv)

        partial_re = ev_re * t_re - ev_im * t_im                  # (tile_r, tile_k)
        partial_im = ev_re * t_im + ev_im * t_re
        # Deferred cross-sublane reduction: per-vreg VALU adds only.
        acc_re[...] += partial_re.reshape(tile_r // 8, 8, tile_k).sum(axis=0)
        acc_im[...] += partial_im.reshape(tile_r // 8, 8, tile_k).sum(axis=0)

        # ---- single 8->1 sublane reduce + lane-dense store at the last row tile ----
        @pl.when(r == pl.num_programs(2) - 1)
        def _finalize():
            s = jnp.float32(scale)
            out_re_ref[0] = jnp.sum(acc_re[...], axis=0, keepdims=True) * s
            out_im_ref[0] = jnp.sum(acc_im[...], axis=0, keepdims=True) * s

    return nudft_kernel


def nufft_forward(packed_cube, uu, vv, *, cell_size, sparse_matrices=False,
                  tile_k=None, tile_r=None):
    """JAX/Pallas equivalent of NuFFT.forward.

    packed_cube : (nchan, npix, npix) real array ("prepacked" image cube)
    uu, vv      : (nvis,) or (nchan, nvis) spatial frequencies [lambda]
    cell_size   : pixel size in arcsec (GridCoords.cell_size)
    Returns (nchan, nvis) complex64 Fourier samples.
    """
    # sparse_matrices only selects torchkbnufft's interpolation backend; both
    # backends approximate the same NUDFT computed exactly here.
    del sparse_matrices

    packed_cube = jnp.asarray(packed_cube)
    uu = jnp.asarray(uu)
    vv = jnp.asarray(vv)

    nchan, npix, npix2 = packed_cube.shape
    assert npix == npix2

    shared_uv = uu.ndim == 1  # 'coil' parallelization path (shared k-trajectory)
    if shared_uv:
        nvis = int(uu.shape[0])
        uu2 = uu.reshape(1, nvis)
        vv2 = vv.reshape(1, nvis)
        nch_uv = 1
    else:
        assert uu.shape[0] == nchan and vv.shape[0] == nchan
        nvis = int(uu.shape[1])
        uu2, vv2 = uu, vv
        nch_uv = nchan

    dl = cell_size * ARCSEC_TO_RAD  # radians per pixel
    # _lambda_to_radpix: lam * 2*pi * dl
    wu = (2.0 * np.pi * dl) * uu2.astype(jnp.float32)   # (nch_uv, nvis)
    wv = (2.0 * np.pi * dl) * vv2.astype(jnp.float32)

    # --- generation-aware VMEM budget ---
    vmem_phys, n_cores = _tpu_caps()
    if vmem_phys >= 128 * MIB:
        budget, limit_cap = 100 * MIB, 110 * MIB        # v5e / v6e / v5p / v4
    else:
        budget, limit_cap = 40 * MIB, 48 * MIB          # v7x / unknown

    # --- row tile & image padding: keep the MXU M dim tall, lane dim dense ---
    if tile_r is None:
        tile_r = 256 if npix >= 256 else _round_up(npix, 8)
    if tile_r % 8 != 0:
        raise ValueError(f"tile_r={tile_r} must be a multiple of 8")
    npix_rows_pad = _round_up(npix, tile_r)
    npix_cols_pad = _round_up(npix, 128)
    n_row = npix_rows_pad // tile_r

    nvis_pad0 = _round_up(max(nvis, 1), 128)

    def _vmem_need(tk):
        eu = npix_cols_pad * 2 * tk * 2                 # bf16 [cos|-sin] basis cache
        acc = 2 * 8 * tk * 4                            # f32 accumulators
        img_buf = 2 * tile_r * npix_cols_pad * 2        # double-buffered bf16 image tile
        small = 2 * 4 * tk * 4                          # wu/wv/out_re/out_im blocks
        temps = 8 * tile_r * tk * 4                     # matmul output + stage-2 temporaries
        return eu + acc + img_buf + small + temps

    # --- visibility tile: largest tile_k that fits the VMEM budget ---
    if tile_k is None:
        tk = min(nvis_pad0, 8192)
        while tk > 128 and _vmem_need(tk) > budget:
            tk -= 128
        n_kv = _cdiv(nvis_pad0, tk)
        # On multi-TensorCore parts, make sure the parallel kv axis can shard
        # when there is nothing else to shard over.
        if n_cores >= 2 and nchan == 1 and nvis_pad0 >= 256:
            n_kv = max(n_kv, 2)
        tile_k = _round_up(_cdiv(nvis_pad0, n_kv), 128)
    else:
        tile_k = max(128, (int(tile_k) // 128) * 128)
        n_kv = _cdiv(nvis_pad0, tile_k)
    nvis_pad = n_kv * tile_k

    # --- basis rebuild / dimension-semantics policy (keep these coupled!) ---
    if not shared_uv:
        rebuild_per_chan = True
        dim_sem = ("parallel", "parallel", "arbitrary")
        uv_map = lambda kv, c, r: (c, 0, kv)
    else:
        uv_map = lambda kv, c, r: (0, 0, kv)
        if n_cores >= 2 and nchan >= 2 and n_kv < 2:
            # Megacore with a single kv tile: spend redundant basis rebuilds to
            # shard the channel axis rather than idling a TensorCore.
            rebuild_per_chan = True
            dim_sem = ("parallel", "parallel", "arbitrary")
        else:
            # Cached basis is valid because the chan axis runs sequentially.
            rebuild_per_chan = False
            dim_sem = ("parallel", "arbitrary", "arbitrary")

    # --- pad visibilities (lane-dense) and the image (rows & lanes), cast bf16 ---
    pad = nvis_pad - nvis
    if pad:
        wu = jnp.pad(wu, ((0, 0), (0, pad)))
        wv = jnp.pad(wv, ((0, 0), (0, pad)))
    wu = wu.reshape(nch_uv, 1, nvis_pad)
    wv = wv.reshape(nch_uv, 1, nvis_pad)

    img = packed_cube.astype(jnp.bfloat16)
    pr, pc = npix_rows_pad - npix, npix_cols_pad - npix
    if pr or pc:
        img = jnp.pad(img, ((0, 0), (0, pr), (0, pc)))

    need = _vmem_need(tile_k)
    vmem_limit = int(min(limit_cap, max(32 * MIB, need + 8 * MIB)))

    kernel = _make_nudft_kernel(npix, npix_cols_pad, tile_r, tile_k,
                                float(cell_size) ** 2, rebuild_per_chan)

    out_re, out_im = pl.pallas_call(
        kernel,
        out_shape=(
            jax.ShapeDtypeStruct((nchan, 1, nvis_pad), jnp.float32),
            jax.ShapeDtypeStruct((nchan, 1, nvis_pad), jnp.float32),
        ),
        grid_spec=pltpu.PrefetchScalarGridSpec(
            num_scalar_prefetch=0,
            grid=(n_kv, nchan, n_row),
            in_specs=[
                pl.BlockSpec((1, tile_r, npix_cols_pad), lambda kv, c, r: (c, r, 0)),
                pl.BlockSpec((1, 1, tile_k), uv_map),
                pl.BlockSpec((1, 1, tile_k), uv_map),
            ],
            out_specs=[
                pl.BlockSpec((1, 1, tile_k), lambda kv, c, r: (c, 0, kv)),
                pl.BlockSpec((1, 1, tile_k), lambda kv, c, r: (c, 0, kv)),
            ],
            scratch_shapes=[
                pltpu.VMEM((npix_cols_pad, 2 * tile_k), jnp.bfloat16),  # eu [cos|-sin]
                pltpu.VMEM((8, tile_k), jnp.float32),                   # acc_re
                pltpu.VMEM((8, tile_k), jnp.float32),                   # acc_im
            ],
        ),
        compiler_params=pltpu.CompilerParams(
            dimension_semantics=dim_sem,
            vmem_limit_bytes=vmem_limit,
        ),
    )(img, wu, wv)

    vis = (out_re + 1j * out_im).reshape(nchan, nvis_pad)[:, :nvis]
    return vis.astype(jnp.complex64)


def _reference_nudft(packed_cube, uu, vv, *, cell_size):
    """Pure-JAX reference (direct NUDFT) for correctness check."""
    nchan, npix, _ = packed_cube.shape
    if uu.ndim == 1:
        uu = jnp.broadcast_to(uu, (nchan, uu.shape[0]))
        vv = jnp.broadcast_to(vv, (nchan, vv.shape[0]))
    dl = cell_size * ARCSEC_TO_RAD
    wu = 2.0 * np.pi * dl * uu  # (nchan, nvis)
    wv = 2.0 * np.pi * dl * vv
    shifted = jnp.fft.fftshift(packed_cube, axes=(1, 2)).astype(jnp.float32)
    idx = (jnp.arange(npix) - npix // 2).astype(jnp.float32)
    phase = (wv[:, :, None, None] * idx[None, None, :, None]
             + wu[:, :, None, None] * idx[None, None, None, :])
    basis = jnp.exp(-1j * phase.astype(jnp.complex64))
    vis = jnp.einsum("crl,ckrl->ck", shifted.astype(jnp.complex64), basis)
    return (cell_size ** 2) * vis


if __name__ == "__main__":
    # Small synthetic problem.
    nchan, npix = 4, 16
    cell_size = 0.005  # arcsec (GridCoords.cell_size); dl = cell_size * arcsec

    key = jax.random.PRNGKey(0)
    k1, k2, k3, k4, k5 = jax.random.split(key, 5)
    packed_cube = jax.random.normal(k1, (nchan, npix, npix), dtype=jnp.float32)

    max_u = 1.0 / (2.0 * cell_size * ARCSEC_TO_RAD)  # Nyquist in lambda

    # 2D (per-channel) u,v -> 'batch' parallelization path (nvis < 128: pad path)
    nvis_2d = 8
    uu2d = jax.random.uniform(k2, (nchan, nvis_2d), minval=-0.4 * max_u, maxval=0.4 * max_u)
    vv2d = jax.random.uniform(k3, (nchan, nvis_2d), minval=-0.4 * max_u, maxval=0.4 * max_u)

    # 1D (shared) u,v -> 'coil' path; nvis=200 exercises visibility padding.
    nvis_1d = 200
    uu1d = jax.random.uniform(k4, (nvis_1d,), minval=-0.4 * max_u, maxval=0.4 * max_u)
    vv1d = jax.random.uniform(k5, (nvis_1d,), minval=-0.4 * max_u, maxval=0.4 * max_u)

    # Default (auto-tiled) runs for both parallelization paths.
    out_2d = nufft_forward(packed_cube, uu2d, vv2d, cell_size=cell_size)
    out_1d = nufft_forward(packed_cube, uu1d, vv1d, cell_size=cell_size)
    # Override run: 2 kv tiles + 2 row tiles to exercise the cached-basis path,
    # the deferred-sublane accumulator, and the output-slice writeback.
    out_1d_t = nufft_forward(packed_cube, uu1d, vv1d, cell_size=cell_size,
                             tile_r=8, tile_k=128)
    jax.block_until_ready(out_2d)
    jax.block_until_ready(out_1d)
    jax.block_until_ready(out_1d_t)

    ref_2d = _reference_nudft(packed_cube, uu2d, vv2d, cell_size=cell_size)
    ref_1d = _reference_nudft(packed_cube, uu1d, vv1d, cell_size=cell_size)

    assert out_2d.shape == (nchan, nvis_2d)
    assert out_1d.shape == (nchan, nvis_1d)
    assert out_1d_t.shape == (nchan, nvis_1d)

    def rel_err(a, b):
        a = np.asarray(a)
        b = np.asarray(b)
        return float(np.max(np.abs(a - b)) / np.max(np.abs(b)))

    # bf16 MXU inputs (f32 accumulation) -> ~1e-3 relative error vs the
    # complex128 original; 3e-2 still catches any shift/sign/indexing error.
    assert rel_err(out_2d, ref_2d) < 3e-2, rel_err(out_2d, ref_2d)
    assert rel_err(out_1d, ref_1d) < 3e-2, rel_err(out_1d, ref_1d)
    assert rel_err(out_1d_t, ref_1d) < 3e-2, rel_err(out_1d_t, ref_1d)

    print("KERNEL_OK")
</pallas_src>

<mosaic_0001>
module attributes {stable_mosaic.version = 11 : i64} {
  func.func @nudft_kernel(%arg0: i32, %arg1: i32, %arg2: i32, %arg3: memref<1x16x128xbf16, #tpu.memory_space<vmem>>, %arg4: memref<1x1x128xf32, #tpu.memory_space<vmem>>, %arg5: memref<1x1x128xf32, #tpu.memory_space<vmem>>, %arg6: memref<1x1x128xf32, #tpu.memory_space<vmem>>, %arg7: memref<1x1x128xf32, #tpu.memory_space<vmem>>, %arg8: memref<128x256xbf16, #tpu.memory_space<vmem>>, %arg9: memref<8x128xf32, #tpu.memory_space<vmem>>, %arg10: memref<8x128xf32, #tpu.memory_space<vmem>>) attributes {dimension_semantics = [#tpu.dimension_semantics<parallel>, #tpu.dimension_semantics<parallel>, #tpu.dimension_semantics<arbitrary>], iteration_bounds = array<i64: 1, 4, 1>, scalar_prefetch = 0 : i64, scratch_operands = 3 : i64, tpu.core_type = #tpu.core_type<tc>, window_params = [{transform_indices = @transform_0, window_bounds = array<i64: 1, 16, 128>}, {transform_indices = @transform_1, window_bounds = array<i64: 1, 1, 128>}, {transform_indices = @transform_2, window_bounds = array<i64: 1, 1, 128>}, {transform_indices = @transform_3, window_bounds = array<i64: 1, 1, 128>}, {transform_indices = @transform_4, window_bounds = array<i64: 1, 1, 128>}]} {
    %c0_i32 = arith.constant 0 : i32
    %0 = arith.cmpi eq, %arg2, %c0_i32 : i32
    %1 = arith.extui %0 : i1 to i32
    %c0_i32_0 = arith.constant 0 : i32
    %2 = arith.cmpi ne, %1, %c0_i32_0 : i32
    scf.if %2 {
      %c0_24 = arith.constant 0 : index
      %c0_25 = arith.constant 0 : index
      %c0_26 = arith.constant 0 : index
      %49 = vector.load %arg4[%c0_24, %c0_25, %c0_26] : memref<1x1x128xf32, #tpu.memory_space<vmem>>, vector<1x1x128xf32>
      %50 = vector.shape_cast %49 : vector<1x1x128xf32> to vector<1x128xf32>
      %51 = tpu.iota {dimensions = array<i32: 0>} : vector<128x128xi32>
      %c0_i32_27 = arith.constant 0 : i32
      %52 = vector.broadcast %c0_i32_27 : i32 to vector<128x128xi32>
      %53 = arith.addi %52, %51 : vector<128x128xi32>
      %c8_i32_28 = arith.constant 8 : i32
      %54 = vector.broadcast %c8_i32_28 : i32 to vector<128x128xi32>
      %55 = arith.cmpi slt, %53, %54 : vector<128x128xi32>
      %c16_i32_29 = arith.constant 16 : i32
      %56 = vector.broadcast %c16_i32_29 : i32 to vector<128x128xi32>
      %57 = arith.subi %53, %56 : vector<128x128xi32>
      %58 = arith.select %55, %53, %57 : vector<128x128xi1>, vector<128x128xi32>
      %59 = arith.sitofp %58 : vector<128x128xi32> to vector<128x128xf32>
      %60 = vector.broadcast %50 : vector<1x128xf32> to vector<128x128xf32>
      %61 = arith.mulf %59, %60 : vector<128x128xf32>
      %62 = math.cos %61 : vector<128x128xf32>
      %63 = arith.truncf %62 : vector<128x128xf32> to vector<128x128xbf16>
      %c0_30 = arith.constant 0 : index
      %c0_31 = arith.constant 0 : index
      %64 = vector.load %arg8[%c0_30, %c0_31] : memref<128x256xbf16, #tpu.memory_space<vmem>>, vector<128x128xbf16>
      tpu.vector_store %arg8[%c0_30, %c0_31], %63 {strides = array<i32>} : memref<128x256xbf16, #tpu.memory_space<vmem>>, vector<128x128xbf16>,
      %65 = math.sin %61 : vector<128x128xf32>
      %cst_32 = arith.constant 0.000000e+00 : f32
      %66 = vector.broadcast %cst_32 : f32 to vector<128x128xf32>
      %67 = arith.subf %66, %65 : vector<128x128xf32>
      %68 = arith.truncf %67 : vector<128x128xf32> to vector<128x128xbf16>
      %c0_33 = arith.constant 0 : index
      %c128 = arith.constant 128 : index
      %69 = vector.load %arg8[%c0_33, %c128] : memref<128x256xbf16, #tpu.memory_space<vmem>>, vector<128x128xbf16>
      tpu.vector_store %arg8[%c0_33, %c128], %68 {strides = array<i32>} : memref<128x256xbf16, #tpu.memory_space<vmem>>, vector<128x128xbf16>,
    } else {
    }
    %c0_i32_1 = arith.constant 0 : i32
    %3 = arith.cmpi eq, %arg2, %c0_i32_1 : i32
    %4 = arith.extui %3 : i1 to i32
    %c0_i32_2 = arith.constant 0 : i32
    %5 = arith.cmpi ne, %4, %c0_i32_2 : i32
    scf.if %5 {
      %cst_24 = arith.constant 0.000000e+00 : f32
      %49 = vector.broadcast %cst_24 : f32 to vector<8x128xf32>
      %c0_25 = arith.constant 0 : index
      %c0_26 = arith.constant 0 : index
      %50 = vector.load %arg9[%c0_25, %c0_26] : memref<8x128xf32, #tpu.memory_space<vmem>>, vector<8x128xf32>
      tpu.vector_store %arg9[%c0_25, %c0_26], %49 {strides = array<i32>} : memref<8x128xf32, #tpu.memory_space<vmem>>, vector<8x128xf32>,
      %cst_27 = arith.constant 0.000000e+00 : f32
      %51 = vector.broadcast %cst_27 : f32 to vector<8x128xf32>
      %c0_28 = arith.constant 0 : index
      %c0_29 = arith.constant 0 : index
      %52 = vector.load %arg10[%c0_28, %c0_29] : memref<8x128xf32, #tpu.memory_space<vmem>>, vector<8x128xf32>
      tpu.vector_store %arg10[%c0_28, %c0_29], %51 {strides = array<i32>} : memref<8x128xf32, #tpu.memory_space<vmem>>, vector<8x128xf32>,
    } else {
    }
    %c0 = arith.constant 0 : index
    %c0_3 = arith.constant 0 : index
    %c0_4 = arith.constant 0 : index
    %6 = vector.load %arg3[%c0, %c0_3, %c0_4] : memref<1x16x128xbf16, #tpu.memory_space<vmem>>, vector<1x16x128xbf16>
    %7 = vector.shape_cast %6 : vector<1x16x128xbf16> to vector<16x128xbf16>
    %c0_5 = arith.constant 0 : index
    %c0_6 = arith.constant 0 : index
    %8 = vector.load %arg8[%c0_5, %c0_6] : memref<128x256xbf16, #tpu.memory_space<vmem>>, vector<128x256xbf16>
    %cst = arith.constant dense<0.000000e+00> : vector<16x256xf32>
    %9 = tpu.matmul %7, %8, %cst {dimension_numbers = #tpu.dot_dimension_numbers<[1], [0], [0], [1], [0, 0, 1, 1], [], []>} : vector<16x128xbf16>, vector<128x256xbf16>, vector<16x256xf32> -> vector<16x256xf32>
    %10 = vector.extract_strided_slice %9 {offsets = [0, 0], sizes = [16, 128], strides = [1, 1]} : vector<16x256xf32> to vector<16x128xf32>
    %11 = vector.extract_strided_slice %9 {offsets = [0, 128], sizes = [16, 128], strides = [1, 1]} : vector<16x256xf32> to vector<16x128xf32>
    %c0_7 = arith.constant 0 : index
    %c0_8 = arith.constant 0 : index
    %c0_9 = arith.constant 0 : index
    %12 = vector.load %arg5[%c0_7, %c0_8, %c0_9] : memref<1x1x128xf32, #tpu.memory_space<vmem>>, vector<1x1x128xf32>
    %13 = vector.shape_cast %12 : vector<1x1x128xf32> to vector<1x128xf32>
    %c16_i32 = arith.constant 16 : i32
    %14 = arith.muli %arg2, %c16_i32 : i32
    %15 = tpu.iota {dimensions = array<i32: 0>} : vector<16x128xi32>
    %16 = vector.broadcast %14 : i32 to vector<16x128xi32>
    %17 = arith.addi %16, %15 : vector<16x128xi32>
    %c8_i32 = arith.constant 8 : i32
    %18 = vector.broadcast %c8_i32 : i32 to vector<16x128xi32>
    %19 = arith.cmpi slt, %17, %18 : vector<16x128xi32>
    %c16_i32_10 = arith.constant 16 : i32
    %20 = vector.broadcast %c16_i32_10 : i32 to vector<16x128xi32>
    %21 = arith.subi %17, %20 : vector<16x128xi32>
    %22 = arith.select %19, %17, %21 : vector<16x128xi1>, vector<16x128xi32>
    %23 = arith.sitofp %22 : vector<16x128xi32> to vector<16x128xf32>
    %24 = vector.broadcast %13 : vector<1x128xf32> to vector<16x128xf32>
    %25 = arith.mulf %23, %24 : vector<16x128xf32>
    %26 = math.cos %25 : vector<16x128xf32>
    %27 = math.sin %25 : vector<16x128xf32>
    %cst_11 = arith.constant 0.000000e+00 : f32
    %28 = vector.broadcast %cst_11 : f32 to vector<16x128xf32>
    %29 = arith.subf %28, %27 : vector<16x128xf32>
    %30 = arith.mulf %26, %10 : vector<16x128xf32>
    %31 = arith.mulf %29, %11 : vector<16x128xf32>
    %32 = arith.subf %30, %31 : vector<16x128xf32>
    %33 = arith.mulf %26, %11 : vector<16x128xf32>
    %34 = arith.mulf %29, %10 : vector<16x128xf32>
    %35 = arith.addf %33, %34 : vector<16x128xf32>
    %c0_12 = arith.constant 0 : index
    %c0_13 = arith.constant 0 : index
    %36 = vector.load %arg9[%c0_12, %c0_13] : memref<8x128xf32, #tpu.memory_space<vmem>>, vector<8x128xf32>
    %37 = vector.shape_cast %32 : vector<16x128xf32> to vector<2x8x128xf32>
    %cst_14 = arith.constant dense<0.000000e+00> : vector<8x128xf32>
    %38 = vector.multi_reduction <add>, %37, %cst_14 [0] : vector<2x8x128xf32> to vector<8x128xf32>
    %39 = arith.addf %36, %38 : vector<8x128xf32>
    %c0_15 = arith.constant 0 : index
    %c0_16 = arith.constant 0 : index
    %40 = vector.load %arg9[%c0_15, %c0_16] : memref<8x128xf32, #tpu.memory_space<vmem>>, vector<8x128xf32>
    tpu.vector_store %arg9[%c0_15, %c0_16], %39 {strides = array<i32>} : memref<8x128xf32, #tpu.memory_space<vmem>>, vector<8x128xf32>,
    %c0_17 = arith.constant 0 : index
    %c0_18 = arith.constant 0 : index
    %41 = vector.load %arg10[%c0_17, %c0_18] : memref<8x128xf32, #tpu.memory_space<vmem>>, vector<8x128xf32>
    %42 = vector.shape_cast %35 : vector<16x128xf32> to vector<2x8x128xf32>
    %cst_19 = arith.constant dense<0.000000e+00> : vector<8x128xf32>
    %43 = vector.multi_reduction <add>, %42, %cst_19 [0] : vector<2x8x128xf32> to vector<8x128xf32>
    %44 = arith.addf %41, %43 : vector<8x128xf32>
    %c0_20 = arith.constant 0 : index
    %c0_21 = arith.constant 0 : index
    %45 = vector.load %arg10[%c0_20, %c0_21] : memref<8x128xf32, #tpu.memory_space<vmem>>, vector<8x128xf32>
    tpu.vector_store %arg10[%c0_20, %c0_21], %44 {strides = array<i32>} : memref<8x128xf32, #tpu.memory_space<vmem>>, vector<8x128xf32>,
    %c0_i32_22 = arith.constant 0 : i32
    %46 = arith.cmpi eq, %arg2, %c0_i32_22 : i32
    %47 = arith.extui %46 : i1 to i32
    %c0_i32_23 = arith.constant 0 : i32
    %48 = arith.cmpi ne, %47, %c0_i32_23 : i32
    scf.if %48 {
      %c0_24 = arith.constant 0 : index
      %c0_25 = arith.constant 0 : index
      %49 = vector.load %arg9[%c0_24, %c0_25] : memref<8x128xf32, #tpu.memory_space<vmem>>, vector<8x128xf32>
      %cst_26 = arith.constant dense<0.000000e+00> : vector<128xf32>
      %50 = vector.multi_reduction <add>, %49, %cst_26 [0] : vector<8x128xf32> to vector<128xf32>
      %51 = vector.shape_cast %50 : vector<128xf32> to vector<1x128xf32>
      %cst_27 = arith.constant 2.500000e-05 : f32
      %52 = vector.broadcast %cst_27 : f32 to vector<1x128xf32>
      %53 = arith.mulf %51, %52 : vector<1x128xf32>
      %c0_28 = arith.constant 0 : index
      %c0_29 = arith.constant 0 : index
      %c0_30 = arith.constant 0 : index
      %54 = vector.load %arg6[%c0_28, %c0_29, %c0_30] : memref<1x1x128xf32, #tpu.memory_space<vmem>>, vector<1x1x128xf32>
      %55 = vector.shape_cast %54 : vector<1x1x128xf32> to vector<1x128xf32>
      %56 = vector.shape_cast %53 : vector<1x128xf32> to vector<1x1x128xf32>
      tpu.vector_store %arg6[%c0_28, %c0_29, %c0_30], %56 {strides = array<i32>} : memref<1x1x128xf32, #tpu.memory_space<vmem>>, vector<1x1x128xf32>,
      %c0_31 = arith.constant 0 : index
      %c0_32 = arith.constant 0 : index
      %57 = vector.load %arg10[%c0_31, %c0_32] : memref<8x128xf32, #tpu.memory_space<vmem>>, vector<8x128xf32>
      %cst_33 = arith.constant dense<0.000000e+00> : vector<128xf32>
      %58 = vector.multi_reduction <add>, %57, %cst_33 [0] : vector<8x128xf32> to vector<128xf32>
      %59 = vector.shape_cast %58 : vector<128xf32> to vector<1x128xf32>
      %cst_34 = arith.constant 2.500000e-05 : f32
      %60 = vector.broadcast %cst_34 : f32 to vector<1x128xf32>
      %61 = arith.mulf %59, %60 : vector<1x128xf32>
      %c0_35 = arith.constant 0 : index
      %c0_36 = arith.constant 0 : index
      %c0_37 = arith.constant 0 : index
      %62 = vector.load %arg7[%c0_35, %c0_36, %c0_37] : memref<1x1x128xf32, #tpu.memory_space<vmem>>, vector<1x1x128xf32>
      %63 = vector.shape_cast %62 : vector<1x1x128xf32> to vector<1x128xf32>
      %64 = vector.shape_cast %61 : vector<1x128xf32> to vector<1x1x128xf32>
      tpu.vector_store %arg7[%c0_35, %c0_36, %c0_37], %64 {strides = array<i32>} : memref<1x1x128xf32, #tpu.memory_space<vmem>>, vector<1x1x128xf32>,
    } else {
    }
    return
  }
  func.func @transform_0(%arg0: i32, %arg1: i32, %arg2: i32) -> (i32, i32, i32) {
    %c0_i32 = arith.constant 0 : i32
    %c0_i32_0 = arith.constant 0 : i32
    return %arg1, %arg2, %c0_i32 : i32, i32, i32
  }
  func.func @transform_1(%arg0: i32, %arg1: i32, %arg2: i32) -> (i32, i32, i32) {
    %c0_i32 = arith.constant 0 : i32
    %c0_i32_0 = arith.constant 0 : i32
    return %arg1, %c0_i32, %arg0 : i32, i32, i32
  }
  func.func @transform_2(%arg0: i32, %arg1: i32, %arg2: i32) -> (i32, i32, i32) {
    %c0_i32 = arith.constant 0 : i32
    %c0_i32_0 = arith.constant 0 : i32
    return %arg1, %c0_i32, %arg0 : i32, i32, i32
  }
  func.func @transform_3(%arg0: i32, %arg1: i32, %arg2: i32) -> (i32, i32, i32) {
    %c0_i32 = arith.constant 0 : i32
    %c0_i32_0 = arith.constant 0 : i32
    return %arg1, %c0_i32, %arg0 : i32, i32, i32
  }
  func.func @transform_4(%arg0: i32, %arg1: i32, %arg2: i32) -> (i32, i32, i32) {
    %c0_i32 = arith.constant 0 : i32
    %c0_i32_0 = arith.constant 0 : i32
    return %arg1, %c0_i32, %arg0 : i32, i32, i32
  }
}

</mosaic_0001>

<bundles_post_ra>
// kernel: tpu_custom_call.1
= control target key start
LH: loop header
LB: loop body
LE: loop exit
PB: predicated region body
PF: predicated region fallthrough
CT: control target
= control target key end

     0   :  { %10 = vsyncpa [#allocation6], 0  ;;  %s7703_s0 = inlined_call_operand.hbm [shape: bf16[4,16,128], index: 0, kind: input, shape index: {}]   ;;  %s7704_s1 = inlined_call_operand.hbm [shape: f32[4,1,128], index: 1, kind: input, shape index: {}]   ;;  %s7705_s2 = inlined_call_operand.vmem [shape: f32[4,1,128], index: 2, kind: input, shape index: {}]   ;;  %s7706_s3 = inlined_call_operand.hbm [shape: f32[4,1,128], index: 3, kind: output, shape index: {0}]   ;;  %s7707_s4 = inlined_call_operand.hbm [shape: f32[4,1,128], index: 4, kind: output, shape index: {1}]  }
   0x1   :  { %12 = vsyncpa [#allocation6 + $0x1], 0 }
   0x2   :  { %13 = vsyncpa [#allocation9], 0 }
   0x3   :  { %15 = vsyncpa [#allocation9 + $0x1], 0 }
   0x4   :  { %16 = vsyncpa [#allocation7], 0 }
   0x5   :  { %18 = vsyncpa [#allocation7 + $0x1], 0 }
   0x6   :  { %19 = vsyncpa [#allocation12], 0 }
   0x7   :  { %21 = vsyncpa [#allocation12 + $0x1], 0  ;;  %s5123_s15 = smov 0   ;;  %s5125_s16 = smov 0  }
   0x8   :  { %s5127_s17 = smov 0   ;;  %s5129_s18 = smov 0  }
   0x9   :  { %s5131_s19 = smov 0   ;;  %s5133_s20 = smov 0  }
   0xa LB: > { %s4508_s21 = sadd.s32 4294967295, %s5083_s20   ;;  %s4509_s22 = sadd.s32 4294967294, %s5083_s20   ;;  %s5083_s20 = sphi %s5133_s20, %s27_s20   ;;  %s5079_s19 = sphi %s5131_s19, %s8040_s19   ;;  %s5075_s18 = sphi %s5129_s18, %s8039_s18   ;;  %s5071_s17 = sphi %s5127_s17, %s8038_s17   ;;  %s5067_s16 = sphi %s5125_s16, %s8037_s16   ;;  %s5063_s15 = sphi %s5123_s15, %s8036_s15  }
   0xb   : > { %s42_s23 = sadd.s32 1, %s5079_s19  ;;  %s55_s24 = sadd.s32 1, %s5071_s17 }
   0xc   : > { %p44_p0 = scmp.ge.s32.totalorder %s42_s23, 4  ;;  %p62_p1 = scmp.ne.s32.totalorder %s5071_s17, %s5067_s16 }
   0xd   : > { %p63_p2 = scmp.eq.s32.totalorder %s5083_s20, 0  ;;  %p68_p3 = scmp.ne.s32.totalorder %s5067_s16, %s5063_s15 }
   0xe   : > { %s8042_s23 = smov (%p44_p0, %s42_s23), 0  ;;  %p69_p5 = scmp.eq.s32.totalorder %s4508_s21, 0 }
   0xf   : > { %p5164_p4 = por %p63_p2, %p62_p1  ;;  %s50_s26 = ssub.s32 %s5079_s19, %s8042_s23 }
  0x10   : > { %p150_p6 = scmp.eq.s32.totalorder %s4508_s21, 3  ;;  %p53_p7 = scmp.eq.s32.totalorder %s50_s26, 0 }
  0x11   : > { %p5170_p8 = por %p69_p5, %p68_p3  ;;  %p156_p10 = scmp.eq.s32.totalorder %s4509_s22, 3 }
  0x12   : > { %p5174_p9 = por %p150_p6, %p62_p1  ;;  %p4777_p12 = scmp.lt.s32.totalorder %s5083_s20, 4 }
  0x13   : > { %s7826_s27 = scalar_select %p5170_p8, 1, 0 }
  0x14   : > { %s7827_s28 = scalar_select %p5174_p9, 1, 0 }
  0x15   : > { %s5179_s29 = scalar_select %p53_p7, %s5071_s17, %s55_s24  }
  0x16   : > { %p5181_p11 = por %p156_p10, %p68_p3  ;;  %s5187_s5 = sand.u32 1, %s5071_s17  }
  0x17   : > { %s4512_s6 = sshll.u32 %s5187_s5, 3  ;;  %s4686_s7 = sshll.u32 %s5079_s19, 7 }
  0x18   : > { %s7828_s30 = scalar_select %p5181_p11, 1, 0 }
  0x19   : > { %s5194_s10 = scalar_lea.hbm %s7703_s0, %s4686_s7  ;;  %s208_s11 = scalar_lea.vmem [#allocation5], %s4512_s6 }
  0x1a   : > { %s217_s12 = sshll.u32 %s208_s11, 4  ;;  %p5200_p13 = pnand %p4777_p12, %p5164_p4  ;;  %s5196_s12 = int_to_ptr.vmem [resolvable:$true] %s217_s12 }
  0x1b   : > { %s205_s14 = scalar_lea.sflag [#allocation6], %s5187_s5  ;;  %s4905_s21 = scalar_lea.hbm %s5194_s10, 128 }
  0x1c   : > { %p4906_p1 = scmp.ne.s32.totalorder %s5194_s10, %s4905_s21  ;;  %p4907_p2 = pneg %p5200_p13 }
  0x1d   : > { %s4910_s25 = scalar_lea.hbm %s7703_s0, 512  ;;  %p4911_p4 = scmp.lt.u32.totalorder %s5194_s10, %s7703_s0 }
  0x1e   : > { %p4908_p3 = pnand %p4907_p2, %p4906_p1  ;;  %p4912_p6 = scmp.lt.u32.totalorder %s4910_s25, %s4905_s21 }
  0x1f   : > { %p4914_p10 = scmp.lt.u32.totalorder %s4905_s21, %s5194_s10 }
  0x20   : > { %p4909_p5 = pneg %p4908_p3  ;;  %p4913_p7 = por %p4912_p6, %p4911_p4 }
  0x22   : > { %p4915_p12 = por %p4914_p10, %p4913_p7 }
  0x24   : > { %p4916_p0 = pnand %p4915_p12, %p4909_p5 }
  0x26   : > { %4919 = shalt.err (!%p4916_p0)
}
  0x27   : > { %s4920_s7 = scalar_lea.vmem %s5196_s12, 128  ;;  %s5085_s8 = smov [#allocation5]  }
  0x28   : > { %p4921_p1 = scmp.ne.s32.totalorder %s5196_s12, %s4920_s7  ;;  %s4925_s9 = sshll.u32 %s5085_s8, 4  ;;  %s4926_s9 = int_to_ptr.vmem [resolvable:$false] %s4925_s9 }
  0x29   : > { %s4927_s11 = scalar_lea.vmem %s4926_s9, 256  ;;  %p4928_p9 = scmp.lt.s32.totalorder %s5196_s12, %s4926_s9 }
  0x2a   : > { %p4923_p3 = pnand %p4921_p1, %p4907_p2  ;;  %p4929_p4 = scmp.lt.s32.totalorder %s4927_s11, %s4920_s7 }
  0x2c   : > { %p4924_p11 = pneg %p4923_p3  ;;  %p4930_p6 = por %p4929_p4, %p4928_p9 }
  0x2e   : > { %p4931_p7 = pnand %p4930_p6, %p4924_p11 }
  0x30   : > { %4934 = shalt.err (!%p4931_p7)
}
  0x31   : > { %s5086_s21 = smov 64   ;;  %s5087_s22 = smov 4  }
  0x32   : > { %4766 = dma.hbm_to_vmem [thread:$0]  (!%p5200_p13), %s5194_s10, 128, %s5196_s12, %s205_s14, %s5086_s21, %s5086_s21, %s5087_s22  }
  0x33   : > { %p252_p0 = scmp.lt.s32.totalorder %s5083_s20, 5  ;;  %s4515_s24 = sshll.u32 %s5079_s19, 4 }
  0x34   : > { %p7830_p9 = scmp.ge.s32.totalorder %s5083_s20, 1  ;;  %s5244_s7 = scalar_lea.hbm %s7704_s1, %s4515_s24 }
  0x35   : > { %s230_s8 = scalar_lea.vmem [#allocation8], %s5187_s5  ;;  %s228_s10 = scalar_lea.sflag [#allocation9], %s5187_s5 }
  0x36   : > { %p5237_p11 = pnand %p7830_p9, %p252_p0  ;;  %s238_s9 = sshll.u32 %s230_s8, 4  ;;  %s239_s9 = int_to_ptr.vmem [resolvable:$true] %s238_s9 }
  0x37   : > { %s4935_s12 = scalar_lea.hbm %s5244_s7, 16  ;;  %s4940_s21 = scalar_lea.hbm %s7704_s1, 64 }
  0x38   : > { %s7831_s25 = scalar_select %p5237_p11, 1, 0 }
  0x39   : > { %p4936_p5 = scmp.ne.s32.totalorder %s5244_s7, %s4935_s12  ;;  %p4941_p1 = scmp.lt.u32.totalorder %s5244_s7, %s7704_s1 }
  0x3a   : > { %p4942_p3 = scmp.lt.u32.totalorder %s4940_s21, %s4935_s12  ;;  %p4944_p6 = scmp.lt.u32.totalorder %s4935_s12, %s5244_s7 }
  0x3b   : > { %p4938_p10 = pnand %p4936_p5, %p4907_p2 }
  0x3c   : > { %p4943_p4 = por %p4942_p3, %p4941_p1 }
  0x3d   : > { %p4939_p12 = pneg %p4938_p10 }
  0x3e   : > { %p4945_p7 = por %p4944_p6, %p4943_p4 }
  0x40   : > { %p4946_p0 = pnand %p4945_p7, %p4939_p12 }
  0x42   : > { %4949 = shalt.err (!%p4946_p0)
}
  0x43   : > { %s4950_s5 = scalar_lea.vmem %s239_s9, 16  ;;  %s5088_s26 = smov [#allocation8]  }
  0x44   : > { %p4951_p9 = scmp.ne.s32.totalorder %s239_s9, %s4950_s5  ;;  %s4955_s6 = sshll.u32 %s5088_s26, 4  ;;  %s4956_s6 = int_to_ptr.vmem [resolvable:$false] %s4955_s6 }
  0x45   : > { %s4957_s8 = scalar_lea.vmem %s4956_s6, 32  ;;  %p4958_p8 = scmp.lt.s32.totalorder %s239_s9, %s4956_s6 }
  0x46   : > { %p4953_p5 = pnand %p4951_p9, %p4907_p2  ;;  %p4959_p11 = scmp.lt.s32.totalorder %s4957_s8, %s4950_s5 }
  0x48   : > { %p4954_p10 = pneg %p4953_p5  ;;  %p4960_p1 = por %p4959_p11, %p4958_p8 }
  0x4a   : > { %p4961_p3 = pnand %p4960_p1, %p4954_p10 }
  0x4c   : > { %4964 = shalt.err (!%p4961_p3)
}
  0x4d   : > { %4769 = dma.hbm_to_vmem [thread:$0]  (!%p5200_p13), %s5244_s7, 16, %s239_s9, %s228_s10  }
  0x4e   : > { %p7832_p12 = scmp.ne.s32.totalorder %s7831_s25, 0 }
  0x50   : > { %256 = sbr.rel (%p7832_p12) target bundleno = 824 (0x338), region = 32 }
  0x57   : > { %s5270_s12 = sand.u32 1, %s5067_s16   ;;  %p7833_p8 = scmp.ne.s32.totalorder %s7826_s27, 0 }
  0x58   : > { %s4517_s14 = sshll.u32 %s5270_s12, 3  ;;  %s259_s11 = scalar_lea.sflag [#allocation6], %s5270_s12 }
  0x59   : > { %s5274_s21 = scalar_lea.vmem [#allocation5], %s4517_s14 }
  0x5a   : > { %5046 = dma.done.wait (%p7833_p8), %s259_s11, 128  }
  0x5b   : > { %5048 = vsyncadd (%p7833_p8), %s259_s11, 4294967168  ;;  %s268_s13 = scalar_lea.sflag [#allocation9], %s5270_s12  ;;  %s270_s25 = scalar_lea.vmem [#allocation8], %s5270_s12 }
  0x5c   : > { %5050 = dma.done.wait (%p7833_p8), %s268_s13, 16  }
  0x5d   : > { %5052 = vsyncadd (%p7833_p8), %s268_s13, 4294967280  ;;  %v321_v0 = vlaneseq  ;;  %v5292_v5 = vld [vmem:[%s270_s25] ss:$0 sm:$0xff]  ;;  %v7728_v25 = vmov 683565275   ;;  %p309_p13 = scmp.lt.s32.totalorder %s5075_s18, 3 }
  0x5e   : > { %v7726_v27 = vmov 2475754826   ;;  %v7718_v29 = vmov 2131351028   ;;  %v7720_v33 = vmov 2102212464  }
  0x5f   : > { %v5286_v1 = vshrl.u32 %v321_v0, 7  ;;  %v7722_v35 = vmov 920167782   ;;  %v7716_v42 = vmov 1326507024   ;;  %s310_s27 = scalar_select %p309_p13, %s5075_s18, 3 }
  0x60   : > { %s4682_s22 = sshll.u32 %s5075_s18, 4  ;;  %s301_s24 = scalar_lea.vmem [#allocation10], %s5270_s12 }
  0x61   : > { %7834 = vst [vmem:[#allocation17_spill] sm:$0xff] %v5286_v1  ;;  %v323_v2 = vadd.s32 8, %v5286_v1  ;;  %v7711_v4 = vcvt.s32.f32 %v5286_v1  ;;  %v325_v15 = vadd.s32 24, %v5286_v1  ;;  %v326_v18 = vadd.s32 32, %v5286_v1  ;;  %s314_s10 = scalar_lea.vmem %s7705_s2, %s310_s27  ;;  %s4351_s5 = sshll.u32 %s301_s24, 4  ;;  %s7628_s5 = int_to_ptr.vmem [resolvable:$true] %s4351_s5 }
  0x62   : > { %s307_s26 = scalar_lea.vmem [#allocation11], %s5270_s12  ;;  %s7626_s11 = scalar_lea.hbm %s7706_s3, %s4682_s22 }
  0x63   : > { %v5289_v3 = vadd.s32 4294967280, %v323_v2  ;;  %v5298_v7 = vmul.f32 %v5292_v5, %v7711_v4  ;;  %v4520_v21 = vadd.s32 4294967280, %v325_v15  ;;  %v4521_v31 = vadd.s32 4294967280, %v326_v18  ;;  %s4365_s6 = sshll.u32 %s307_s26, 4  ;;  %s7633_s18 = scalar_lea.hbm %s7707_s4, %s4682_s22  ;;  %s7635_s6 = int_to_ptr.vmem [resolvable:$true] %s4365_s6 }
  0x64   : > { %s4334_s25 = scalar_lea.sflag [#allocation7], %s5270_s12  ;;  %s4965_s27 = scalar_lea.vmem %s7628_s5, 16 }
  0x65   : > { %7835 = vst [vmem:[#allocation18_spill] sm:$0xff] %v5289_v3  ;;  %v7710_v6 = vcvt.s32.f32 %v5289_v3  ;;  %7836 = vst [vmem:[#allocation19_spill] sm:$0xff] %v5298_v7  ;;  %v426_v9 = vand.u32 2139095040, %v5298_v7  ;;  %v7715_v19 = vand.u32 2147483647, %v5298_v7  ;;  %v388_v37 = vcvt.s32.f32 %v4520_v21  ;;  %p4966_p2 = scmp.ne.s32.totalorder %s7628_s5, %s4965_s27  ;;  %p8034_p11 = scmp.ne.s32.totalorder %s7827_s28, 0 }
  0x66   : > { %v389_v56 = vcvt.s32.f32 %v4521_v31  ;;  %v7851_v3 = vand.u32 2147483647, %v5298_v7  ;;  %s5096_s7 = smov [#allocation10]  }
  0x67   : > { %v5303_v8 = vmul.f32 %v5292_v5, %v7710_v6  ;;  %v427_v11 = vshrl.u32 %v426_v9, 23  ;;  %v430_v32 = vand.u32 8388607, %v7715_v19  ;;  %v5329_v51 = vmul.f32 %v5292_v5, %v388_v37  ;;  %p4967_p4 = pnand %p4966_p2, %p8034_p11  ;;  %s4969_s9 = sshll.u32 %s5096_s7, 4  ;;  %s4970_s9 = int_to_ptr.vmem [resolvable:$false] %s4969_s9 }
  0x68   : > { %v5350_v2 = vmul.f32 %v5292_v5, %v389_v56  ;;  %p4972_p7 = scmp.lt.s32.totalorder %s7628_s5, %s4970_s9 }
  0x69   : > { %7837 = vst [vmem:[#allocation20_spill] sm:$0xff] %v5303_v8  ;;  %v529_v10 = vand.u32 2139095040, %v5303_v8  ;;  %v4534_v13 = vadd.s32 4294967169, %v427_v11  ;;  %v431_v48 = vor.u32 8388608, %v430_v32  ;;  %7838 = vst [vmem:[#allocation21_spill] sm:$0xff] %v5329_v51  ;;  %v735_v0 = vand.u32 2139095040, %v5329_v51  ;;  %p4968_p6 = pneg %p4967_p4 }
  0x6a   : > { %7839 = vst [vmem:[#allocation22_spill] sm:$0xff] %v5350_v2 }
  0x6b   : > { %v530_v12 = vshrl.u32 %v529_v10, 23  ;;  %v433_v16 = vadd.s32 1, %v4534_v13  ;;  %v471_v60 = vshll.u32 %v431_v48, 8  ;;  %v7714_v13 = vand.u32 2147483647, %v5303_v8 }
  0x6d   : > { %v4538_v14 = vadd.s32 4294967169, %v530_v12  ;;  %vm434_vm0 = vcmp.gt.s32.totalorder %v433_v16, 0 }
  0x6e   : > { %v435_v20 = vsel %vm434_vm0, %v433_v16, 0 }
  0x6f   : > { %v536_v17 = vadd.s32 1, %v4538_v14  ;;  %v437_v22 = vand.u32 31, %v435_v20  ;;  %v5310_v23 = vshrl.u32 %v435_v20, 5 }
  0x71   : > { %vm537_vm1 = vcmp.gt.s32.totalorder %v536_v17, 0  ;;  %v438_v24 = vsub.s32 32, %v437_v22  ;;  %v440_v26 = vshll.u32 %v7728_v25, %v437_v22  ;;  %v443_v28 = vshll.u32 %v7726_v27, %v437_v22 }
  0x72   : > { %v446_v30 = vshll.u32 %v7718_v29, %v437_v22  ;;  %v449_v34 = vshll.u32 %v7720_v33, %v437_v22  ;;  %v452_v36 = vshll.u32 %v7722_v35, %v437_v22  ;;  %vm455_vm2 = vcmp.lt.s32.totalorder %v5310_v23, 1 }
  0x73   : > { %v441_v38 = vshrl.u32 %v7726_v27, %v438_v24  ;;  %v444_v39 = vshrl.u32 %v7718_v29, %v438_v24  ;;  %v447_v40 = vshrl.u32 %v7720_v33, %v438_v24  ;;  %v450_v41 = vshrl.u32 %v7722_v35, %v438_v24 }
  0x74   : > { %v453_v43 = vshrl.u32 %v7716_v42, %v438_v24  ;;  %v538_v44 = vsel %vm537_vm1, %v536_v17, 0  ;;  %vm458_vm3 = vcmp.lt.s32.totalorder %v5310_v23, 4  ;;  %vm457_vm4 = vcmp.lt.s32.totalorder %v5310_v23, 3 }
  0x75   : > { %v442_v45 = vor.u32 %v441_v38, %v440_v26  ;;  %v445_v46 = vor.u32 %v444_v39, %v443_v28  ;;  %v448_v47 = vor.u32 %v447_v40, %v446_v30  ;;  %v451_v49 = vor.u32 %v450_v41, %v449_v34 }
  0x76   : > { %v454_v50 = vor.u32 %v453_v43, %v452_v36  ;;  %v540_v52 = vand.u32 31, %v538_v44  ;;  %vm456_vm5 = vcmp.lt.s32.totalorder %v5310_v23, 2  ;;  %v439_v9 = vshrl.u32 %v7728_v25, %v438_v24 }
  0x77   : > { %v463_v53 = vsel %vm455_vm2, %v442_v45, %v445_v46  ;;  %v464_v54 = vsel %vm458_vm3, %v451_v49, 920167782  ;;  %v467_v58 = vsel %vm455_vm2, %v445_v46, %v448_v47  ;;  %v460_v10 = vsel %vm458_vm3, %v448_v47, 2102212464 }
  0x78   : > { %v468_v55 = vsel %vm458_vm3, %v454_v50, 1326507024  ;;  %v465_v57 = vsel %vm457_vm4, %v448_v47, %v464_v54  ;;  %v541_v62 = vsub.s32 32, %v540_v52  ;;  %v552_v16 = vshll.u32 %v7720_v33, %v540_v52 }
  0x79   : > { %v469_v59 = vsel %vm457_vm4, %v451_v49, %v468_v55  ;;  %v466_v61 = vsel %vm456_vm5, %v463_v53, %v465_v57  ;;  %v539_v18 = vshrl.u32 %v538_v44, 5  ;;  %v555_v20 = vshll.u32 %v7722_v35, %v540_v52 }
  0x7a   : > { %v470_v63 = vsel %vm456_vm5, %v467_v58, %v469_v59  ;;  %v5355_v11 = vmul.u32.u64.low %v471_v60, %v466_v61  ;;  %v5356_v12 = vmul.u32.u64.high %v471_v60, %v466_v61, %v5355_v11  ;;  %v553_v17 = vshrl.u32 %v7722_v35, %v541_v62 }
  0x7b   : > { %v5360_v14 = vmul.u32.u64.low %v471_v60, %v470_v63  ;;  %v5361_v15 = vmul.u32.u64.high %v471_v60, %v470_v63, %v5360_v14  ;;  %v556_v21 = vshrl.u32 %v7716_v42, %v541_v62  ;;  %v736_v22 = vshrl.u32 %v735_v0, 23 }
  0x7c   : > { %v459_v24 = vsel %vm455_vm2, %v439_v9, %v442_v45  ;;  %v461_v26 = vsel %vm457_vm4, %v445_v46, %v460_v10  ;;  %v543_v28 = vshll.u32 %v7728_v25, %v540_v52  ;;  %v546_v30 = vshll.u32 %v7726_v27, %v540_v52 }
  0x7d   : > { %v544_v31 = vshrl.u32 %v7726_v27, %v541_v62  ;;  %v547_v32 = vshrl.u32 %v7718_v29, %v541_v62  ;;  %v549_v34 = vshll.u32 %v7718_v29, %v540_v52  ;;  %v550_v36 = vshrl.u32 %v7720_v33, %v541_v62 }
  0x7e   : > { %v554_v37 = vor.u32 %v553_v17, %v552_v16  ;;  %v533_v38 = vand.u32 8388607, %v7714_v13  ;;  %v557_v39 = vor.u32 %v556_v21, %v555_v20  ;;  %vm561_vm6 = vcmp.lt.s32.totalorder %v539_v18, 4 }
  0x7f   : > { %v462_v40 = vsel %vm456_vm5, %v459_v24, %v461_v26  ;;  %v4546_v41 = vadd.s32 4294967169, %v736_v22  ;;  %v838_v43 = vand.u32 2139095040, %v5350_v2  ;;  %v481_v44 = vadd.s32 1, %v5356_v12 }
  0x80   : > { %v545_v45 = vor.u32 %v544_v31, %v543_v28  ;;  %v548_v46 = vor.u32 %v547_v32, %v546_v30  ;;  %v551_v47 = vor.u32 %v550_v36, %v549_v34  ;;  %vm480_vm7 = vc.u32 %v5361_v15, %v5355_v11 }
  0x81   : > { %vm558_vm8 = vcmp.lt.s32.totalorder %v539_v18, 1  ;;  %vm560_vm9 = vcmp.lt.s32.totalorder %v539_v18, 3  ;;  %v567_v48 = vsel %vm561_vm6, %v554_v37, 920167782  ;;  %v534_v49 = vor.u32 8388608, %v533_v38 }
  0x82   : > { %v571_v50 = vsel %vm561_vm6, %v557_v39, 1326507024  ;;  %v478_v23 = vmul.u32 %v471_v60, %v462_v40  ;;  %v742_v52 = vadd.s32 1, %v4546_v41  ;;  %v482_v53 = vsel %vm480_vm7, %v481_v44, %v5356_v12 }
  0x83   : > { %vm559_vm10 = vcmp.lt.s32.totalorder %v539_v18, 2  ;;  %v566_v54 = vsel %vm558_vm8, %v545_v45, %v548_v46  ;;  %v568_v55 = vsel %vm560_vm9, %v551_v47, %v567_v48  ;;  %v570_v56 = vsel %vm558_vm8, %v548_v46, %v551_v47 }
  0x84   : > { %v572_v57 = vsel %vm560_vm9, %v554_v37, %v571_v50  ;;  %v839_v58 = vshrl.u32 %v838_v43, 23  ;;  %v574_v59 = vshll.u32 %v534_v49, 8  ;;  %v483_v61 = vadd.s32 %v482_v53, %v478_v23 }
  0x85   : > { %v569_v63 = vsel %vm559_vm10, %v566_v54, %v568_v55  ;;  %vm743_vm11 = vcmp.gt.s32.totalorder %v742_v52, 0  ;;  %v573_v60 = vsel %vm559_vm10, %v570_v56, %v572_v57  ;;  %v542_v9 = vshrl.u32 %v7728_v25, %v541_v62 }
  0x86   : > { %v4550_v0 = vadd.s32 4294967169, %v839_v58  ;;  %v5395_v10 = vmul.u32.u64.low %v574_v59, %v569_v63  ;;  %v5396_v12 = vmul.u32.u64.high %v574_v59, %v569_v63, %v5395_v10  ;;  %v744_v14 = vsel %vm743_vm11, %v742_v52, 0 }
  0x87   : > { %v484_v16 = vadd.s32 536870912, %v483_v61  ;;  %v563_v17 = vsel %vm561_vm6, %v551_v47, 2102212464  ;;  %v5400_v20 = vmul.u32.u64.low %v574_v59, %v573_v60  ;;  %v5401_v21 = vmul.u32.u64.high %v574_v59, %v573_v60, %v5400_v20 }
  0x88   : > { %v746_v22 = vand.u32 31, %v744_v14  ;;  %v562_v24 = vsel %vm558_vm8, %v542_v9, %v545_v45  ;;  %v564_v26 = vsel %vm560_vm9, %v548_v46, %v563_v17  ;;  %v845_v30 = vadd.s32 1, %v4550_v0 }
  0x89   : > { %v5405_v28 = vshrl.u32 %v484_v16, 30  ;;  %v565_v62 = vsel %vm559_vm10, %v562_v24, %v564_v26  ;;  %v584_v32 = vadd.s32 1, %v5396_v12  ;;  %v327_v34 = vadd.s32 40, %v5286_v1 }
  0x8a   : > { %v5408_v31 = vsub.s32 32, %v746_v22  ;;  %vm583_vm12 = vc.u32 %v5401_v21, %v5395_v10  ;;  %vm846_vm13 = vcmp.gt.s32.totalorder %v845_v30, 0  ;;  %v5416_v37 = vadd.s32 48, %v5286_v1 }
  0x8b   : > { %v486_v36 = vshll.u32 %v5405_v28, 30  ;;  %v5419_v38 = vadd.s32 56, %v5286_v1  ;;  %v5422_v18 = vadd.s32 64, %v5286_v1  ;;  %v581_v39 = vmul.u32 %v574_v59, %v565_v62 }
  0x8c   : > { %v758_v40 = vshll.u32 %v7720_v33, %v746_v22  ;;  %v759_v41 = vshrl.u32 %v7722_v35, %v5408_v31  ;;  %v761_v43 = vshll.u32 %v7722_v35, %v746_v22  ;;  %v762_v44 = vshrl.u32 %v7716_v42, %v5408_v31 }
  0x8d   : > { %v585_v45 = vsel %vm583_vm12, %v584_v32, %v5396_v12  ;;  %v7713_v46 = vand.u32 2147483647, %v5329_v51  ;;  %v5432_v47 = vshrl.u32 %v744_v14, 5  ;;  %v847_v48 = vsel %vm846_vm13, %v845_v30, 0 }
  0x8e   : > { %v5435_v49 = vadd.s32 72, %v5286_v1  ;;  %v5437_v50 = vsub.s32 %v483_v61, %v486_v36  ;;  %v749_v23 = vshll.u32 %v7728_v25, %v746_v22  ;;  %v752_v52 = vshll.u32 %v7726_v27, %v746_v22 }
  0x8f   : > { %v750_v53 = vshrl.u32 %v7726_v27, %v5408_v31  ;;  %v753_v54 = vshrl.u32 %v7718_v29, %v5408_v31  ;;  %v755_v55 = vshll.u32 %v7718_v29, %v746_v22  ;;  %v756_v56 = vshrl.u32 %v7720_v33, %v5408_v31 }
  0x90   : > { %v586_v57 = vadd.s32 %v585_v45, %v581_v39  ;;  %v760_v58 = vor.u32 %v759_v41, %v758_v40  ;;  %v763_v59 = vor.u32 %v762_v44, %v761_v43  ;;  %v849_v61 = vand.u32 31, %v847_v48 }
  0x91   : > { %v5449_v63 = vadd.s32 80, %v5286_v1  ;;  %v5452_v60 = vadd.s32 88, %v5286_v1  ;;  %v739_v0 = vand.u32 8388607, %v7713_v46  ;;  %vm767_vm14 = vcmp.lt.s32.totalorder %v5432_v47, 4 }
  0x92   : > { %v4522_v9 = vadd.s32 4294967280, %v327_v34  ;;  %vm764_vm15 = vcmp.lt.s32.totalorder %v5432_v47, 1  ;;  %vm766_vm0 = vcmp.lt.s32.totalorder %v5432_v47, 3  ;;  %v7712_v12 = vand.u32 2147483647, %v5350_v2 }
  0x93   : > { %v489_v14 = vsub.s32 0, %v5437_v50  ;;  %v751_v16 = vor.u32 %v750_v53, %v749_v23  ;;  %v754_v17 = vor.u32 %v753_v54, %v752_v52  ;;  %v757_v20 = vor.u32 %v756_v56, %v755_v55 }
  0x94   : > { %v587_v22 = vadd.s32 536870912, %v586_v57  ;;  %v773_v24 = vsel %vm767_vm14, %v760_v58, 920167782  ;;  %v777_v26 = vsel %vm767_vm14, %v763_v59, 1326507024  ;;  %v5465_v30 = vsub.s32 32, %v849_v61 }
  0x95   : > { %v5468_v62 = vadd.s32 96, %v5286_v1  ;;  %v5471_v32 = vadd.s32 104, %v5286_v1  ;;  %v5474_v34 = vadd.s32 112, %v5286_v1  ;;  %v740_v36 = vor.u32 8388608, %v739_v0 }
  0x96   : > { %v5477_v39 = vadd.s32 120, %v5286_v1  ;;  %v390_v40 = vcvt.s32.f32 %v4522_v9  ;;  %vm765_vm1 = vcmp.lt.s32.totalorder %v5432_v47, 2  ;;  %v842_v41 = vand.u32 8388607, %v7712_v12 }
  0x97   : > { %v772_v43 = vsel %vm764_vm15, %v751_v16, %v754_v17  ;;  %v774_v44 = vsel %vm766_vm0, %v757_v20, %v773_v24  ;;  %v776_v45 = vsel %vm764_vm15, %v754_v17, %v757_v20  ;;  %v778_v23 = vsel %vm766_vm0, %v760_v58, %v777_v26 }
  0x98   : > { %v4535_v52 = vmin.u32 %v489_v14, %v5437_v50  ;;  %v5491_v53 = vshrl.u32 %v587_v22, 30  ;;  %v861_v54 = vshll.u32 %v7720_v33, %v849_v61  ;;  %v862_v55 = vshrl.u32 %v7722_v35, %v5465_v30 }
  0x99   : > { %v5496_v56 = vshll.u32 %v740_v36, 8  ;;  %v5498_v59 = vshrl.u32 %v847_v48, 5  ;;  %v864_v0 = vshll.u32 %v7722_v35, %v849_v61  ;;  %v865_v9 = vshrl.u32 %v7716_v42, %v5465_v30 }
  0x9a   : > { %v775_v58 = vsel %vm765_vm1, %v772_v43, %v774_v44  ;;  %v779_v14 = vsel %vm765_vm1, %v776_v45, %v778_v23  ;;  %v852_v22 = vshll.u32 %v7728_v25, %v849_v61  ;;  %v853_v24 = vshrl.u32 %v7726_v27, %v5465_v30 }
  0x9b   : > { %v855_v26 = vshll.u32 %v7726_v27, %v849_v61  ;;  %v856_v48 = vshrl.u32 %v7718_v29, %v5465_v30  ;;  %v858_v36 = vshll.u32 %v7718_v29, %v849_v61  ;;  %v859_v6 = vshrl.u32 %v7720_v33, %v5465_v30 }
  0x9c   : > { %v491_v4 = vclz %v4535_v52  ;;  %v589_v43 = vshll.u32 %v5491_v53, 30  ;;  %v748_v44 = vshrl.u32 %v7728_v25, %v5408_v31  ;;  %v863_v45 = vor.u32 %v862_v55, %v861_v54 }
  0x9d   : > { %v5520_v23 = vmul.u32.u64.low %v5496_v56, %v775_v58  ;;  %v5521_v12 = vmul.u32.u64.high %v5496_v56, %v775_v58, %v5520_v23  ;;  %v866_v46 = vor.u32 %v865_v9, %v864_v0  ;;  %vm870_vm2 = vcmp.lt.s32.totalorder %v5498_v59, 4 }
  0x9e   : > { %v5526_v61 = vmul.f32 %v5292_v5, %v390_v40  ;;  %v769_v52 = vsel %vm767_vm14, %v757_v20, 2102212464  ;;  %v5531_v13 = vmul.u32.u64.low %v5496_v56, %v779_v14  ;;  %v5532_v19 = vmul.u32.u64.high %v5496_v56, %v779_v14, %v5531_v13 }
  0x9f   : > { %v843_v31 = vor.u32 8388608, %v842_v41  ;;  %v5534_v54 = vor.u32 %v853_v24, %v852_v22  ;;  %v5536_v55 = vor.u32 %v856_v48, %v855_v26  ;;  %v860_v58 = vor.u32 %v859_v6, %v858_v36 }
  0xa0   : > { %7840 = vst [vmem:[#allocation23_spill] sm:$0xff] %v5526_v61  ;;  %v5538_v42 = vsub.s32 %v586_v57, %v589_v43  ;;  %vm867_vm3 = vcmp.lt.s32.totalorder %v5498_v59, 1  ;;  %vm869_vm4 = vcmp.lt.s32.totalorder %v5498_v59, 3  ;;  %v876_v40 = vsel %vm870_vm2, %v863_v45, 920167782 }
  0xa1   : > { %v4536_v20 = vadd.s32 4294967294, %v491_v4  ;;  %v768_v0 = vsel %vm764_vm15, %v748_v44, %v751_v16  ;;  %v770_v13 = vsel %vm766_vm0, %v754_v17, %v769_v52  ;;  %v880_v41 = vsel %vm870_vm2, %v866_v46, 1326507024 }
  0xa2   : > { %v5551_v6 = vadd.s32 4294967280, %v5416_v37  ;;  %v5554_v57 = vadd.s32 4294967280, %v5419_v38  ;;  %v5557_v9 = vadd.s32 4294967280, %v5422_v18  ;;  %v5560_v4 = vadd.s32 4294967280, %v5435_v49 }
  0xa3   : > { %vm868_vm5 = vcmp.lt.s32.totalorder %v5498_v59, 2  ;;  %v875_v16 = vsel %vm867_vm3, %v5534_v54, %v5536_v55  ;;  %v877_v37 = vsel %vm869_vm4, %v860_v58, %v876_v40  ;;  %v941_v46 = vand.u32 2139095040, %v5526_v61 }
  0xa4   : > { %v592_v38 = vsub.s32 0, %v5538_v42  ;;  %v771_v18 = vsel %vm765_vm1, %v768_v0, %v770_v13  ;;  %v879_v49 = vsel %vm867_vm3, %v5536_v55, %v860_v58  ;;  %v881_v17 = vsel %vm869_vm4, %v863_v45, %v880_v41 }
  0xa5   : > { %vm4537_vm6 = vcmp.lt.s32.totalorder %v4536_v20, 0  ;;  %v790_v14 = vadd.s32 1, %v5521_v12  ;;  %v5579_v22 = vshll.u32 %v843_v31, 8  ;;  %v942_v24 = vshrl.u32 %v941_v46, 23 }
  0xa6   : > { %v5582_v26 = vadd.s32 4294967280, %v5449_v63  ;;  %v5585_v48 = vadd.s32 4294967280, %v5452_v60  ;;  %vm789_vm7 = vc.u32 %v5532_v19, %v5520_v23  ;;  %v878_v47 = vsel %vm868_vm5, %v875_v16, %v877_v37 }
  0xa7   : > { %v5592_v36 = vadd.s32 4294967280, %v5468_v62  ;;  %v5595_v43 = vadd.s32 4294967280, %v5471_v32  ;;  %v882_v44 = vsel %vm868_vm5, %v879_v49, %v881_v17  ;;  %v4554_v63 = vadd.s32 4294967169, %v942_v24 }
  0xa8   : > { %v5600_v45 = vadd.s32 4294967280, %v5474_v34  ;;  %v5602_v60 = vsel %vm4537_vm6, 0, %v4536_v20  ;;  %v4539_v52 = vmin.u32 %v592_v38, %v5538_v42  ;;  %v787_v31 = vmul.u32 %v5496_v56, %v771_v18 }
  0xa9   : > { %v791_v40 = vsel %vm789_vm7, %v790_v14, %v5521_v12  ;;  %v5608_v62 = vmul.u32.u64.low %v5579_v22, %v878_v47  ;;  %v5609_v0 = vmul.u32.u64.high %v5579_v22, %v878_v47, %v5608_v62  ;;  %v948_v32 = vadd.s32 1, %v4554_v63 }
  0xaa   : > { %v5613_v13 = vadd.s32 4294967280, %v5477_v39  ;;  %v391_v34 = vcvt.s32.f32 %v5551_v6  ;;  %v5617_v20 = vmul.u32.u64.low %v5579_v22, %v882_v44  ;;  %v5618_v41 = vmul.u32.u64.high %v5579_v22, %v882_v44, %v5617_v20 }
  0xab   : > { %v392_v16 = vcvt.s32.f32 %v5554_v57  ;;  %v499_v56 = vsub.s32 4294967266, %v5602_v60  ;;  %v851_v12 = vshrl.u32 %v7728_v25, %v5465_v30  ;;  %vm949_vm8 = vcmp.gt.s32.totalorder %v948_v32, 0 }
  0xac   : > { %v594_v37 = vclz %v4539_v52  ;;  %v5624_v46 = vadd.s32 %v791_v40, %v787_v31  ;;  %v872_v39 = vsel %vm870_vm2, %v860_v58, 2102212464  ;;  %v950_v38 = vsel %vm949_vm8, %v948_v32, 0 }
  0xad   : > { %v393_v6 = vcvt.s32.f32 %v5557_v9  ;;  %v394_v18 = vcvt.s32.f32 %v5560_v4  ;;  %v395_v49 = vcvt.s32.f32 %v5582_v26  ;;  %v952_v57 = vand.u32 31, %v950_v38 }
  0xae   : > { %v396_v17 = vcvt.s32.f32 %v5585_v48  ;;  %v397_v14 = vcvt.s32.f32 %v5592_v36  ;;  %v398_v30 = vcvt.s32.f32 %v5595_v43  ;;  %v479_v24 = vadd.s32 %v5355_v11, %v5361_v15 }
  0xaf   : > { %v495_v47 = vsub.s32 32, %v5602_v60  ;;  %v500_v58 = vadd.s32 127, %v499_v56  ;;  %v871_v9 = vsel %vm867_vm3, %v851_v12, %v5534_v54  ;;  %v873_v4 = vsel %vm869_vm4, %v5536_v55, %v872_v39 }
  0xb0   : > { %v399_v26 = vcvt.s32.f32 %v5600_v45  ;;  %v4540_v48 = vadd.s32 4294967294, %v594_v37  ;;  %v793_v36 = vadd.s32 536870912, %v5624_v46  ;;  %v5645_v44 = vsub.s32 32, %v952_v57 }
  0xb1   : > { %v5649_v15 = vmul.f32 %v5292_v5, %v391_v34  ;;  %v5652_v63 = vmul.f32 %v5292_v5, %v392_v16  ;;  %v893_v54 = vadd.s32 1, %v5609_v0  ;;  %v5656_v52 = vmul.f32 %v5292_v5, %v393_v6 }
  0xb2   : > { %v5659_v55 = vmul.f32 %v5292_v5, %v394_v18  ;;  %v874_v31 = vsel %vm868_vm5, %v871_v9, %v873_v4  ;;  %vm892_vm9 = vc.u32 %v5618_v41, %v5608_v62  ;;  %v496_v40 = vshll.u32 %v5437_v50, %v5602_v60 }
  0xb3   : > { %7841 = vst [vmem:[#allocation24_spill] sm:$0xff] %v5649_v15  ;;  %7842 = vst [vmem:[#allocation25_spill] sm:$0xff] %v5652_v63  ;;  %v497_v32 = vshrl.u32 %v479_v24, %v495_v47  ;;  %v501_v34 = vshll.u32 %v500_v58, 23  ;;  %v7725_v20 = vand.u32 2147483647, %v5526_v61  ;;  %vm4541_vm10 = vcmp.lt.s32.totalorder %v4540_v48, 0 }
  0xb4   : > { %v5668_v16 = vshrl.u32 %v793_v36, 30  ;;  %v964_v56 = vshll.u32 %v7720_v33, %v952_v57  ;;  %v965_v12 = vshrl.u32 %v7722_v35, %v5645_v44  ;;  %v890_v59 = vmul.u32 %v5579_v22, %v874_v31 }
  0xb5   : > { %v894_v37 = vsel %vm892_vm9, %v893_v54, %v5609_v0  ;;  %v5675_v39 = vshrl.u32 %v950_v38, 5  ;;  %v1044_v50 = vand.u32 2139095040, %v5649_v15  ;;  %v955_v60 = vshll.u32 %v7728_v25, %v952_v57 }
  0xb6   : > { %v956_v6 = vshrl.u32 %v7726_v27, %v5645_v44  ;;  %v958_v18 = vshll.u32 %v7726_v27, %v952_v57  ;;  %v959_v24 = vshrl.u32 %v7718_v29, %v5645_v44  ;;  %v961_v47 = vshll.u32 %v7718_v29, %v952_v57 }
  0xb7   : > { %v962_v22 = vshrl.u32 %v7720_v33, %v5645_v44  ;;  %v967_v0 = vshll.u32 %v7722_v35, %v952_v57  ;;  %v7843_v38 = vmov 1326507024   ;;  %v5691_v9 = vmul.f32 %v5292_v5, %v395_v49 }
  0xb8   : > { %v968_v58 = vshrl.u32 %v7843_v38, %v5645_v44  ;;  %v498_v4 = vor.u32 %v497_v32, %v496_v40  ;;  %v795_v36 = vshll.u32 %v5668_v16, 30  ;;  %v966_v54 = vor.u32 %v965_v12, %v964_v56 }
  0xb9   : > { %7844 = vst [vmem:[#allocation26_spill] sm:$0xff] %v5691_v9  ;;  %v502_v31 = vor.u32 4788187, %v501_v34  ;;  %v945_v11 = vand.u32 8388607, %v7725_v20  ;;  %vm973_vm11 = vcmp.lt.s32.totalorder %v5675_v39, 4  ;;  %v5698_v33 = vmul.f32 %v5292_v5, %v396_v17 }
  0xba   : > { %v969_v29 = vor.u32 %v968_v58, %v967_v0  ;;  %v5701_v57 = vmul.f32 %v5292_v5, %v397_v14  ;;  %v597_v49 = vsel %vm4541_vm10, 0, %v4540_v48  ;;  %v5704_v35 = vadd.s32 %v894_v37, %v890_v59 }
  0xbb   : > { %v957_v40 = vor.u32 %v956_v6, %v955_v60  ;;  %v960_v32 = vor.u32 %v959_v24, %v958_v18  ;;  %v963_v56 = vor.u32 %v962_v22, %v961_v47  ;;  %v1045_v34 = vshrl.u32 %v1044_v50, 23 }
  0xbc   : > { %7845 = vst [vmem:[#allocation27_spill] sm:$0xff] %v5701_v57  ;;  %v5707_v12 = vsub.s32 %v5624_v46, %v795_v36  ;;  %vm970_vm12 = vcmp.lt.s32.totalorder %v5675_v39, 1  ;;  %vm972_vm13 = vcmp.lt.s32.totalorder %v5675_v39, 3  ;;  %v979_v17 = vsel %vm973_vm11, %v966_v54, 920167782 }
  0xbd   : > { %v503_v14 = vand.u32 2147483647, %v502_v31  ;;  %v505_v0 = vcvt.s32.f32 %v498_v4  ;;  %v946_v58 = vor.u32 8388608, %v945_v11  ;;  %v983_v48 = vsel %vm973_vm11, %v969_v29, 1326507024 }
  0xbe   : > { %v582_v59 = vadd.s32 %v5395_v10, %v5401_v21  ;;  %v598_v37 = vsub.s32 32, %v597_v49  ;;  %v602_v50 = vsub.s32 4294967266, %v597_v49  ;;  %v896_v46 = vadd.s32 536870912, %v5704_v35 }
  0xbf   : > { %vm971_vm14 = vcmp.lt.s32.totalorder %v5675_v39, 2  ;;  %v978_v60 = vsel %vm970_vm12, %v957_v40, %v960_v32  ;;  %v980_v6 = vsel %vm972_vm13, %v963_v56, %v979_v17  ;;  %v4558_v18 = vadd.s32 4294967169, %v1045_v34 }
  0xc0   : > { %v5726_v29 = vmul.f32 %v5292_v5, %v398_v30  ;;  %v798_v10 = vsub.s32 0, %v5707_v12  ;;  %v982_v21 = vsel %vm970_vm12, %v960_v32, %v963_v56  ;;  %v984_v11 = vsel %vm972_vm13, %v966_v54, %v983_v48 }
  0xc1   : > { %v5736_v24 = vmul.f32 %v5292_v5, %v399_v26  ;;  %v506_v47 = vmul.f32 %v505_v0, %v503_v14  ;;  %v5738_v22 = vshll.u32 %v946_v58, 8  ;;  %v1051_v43 = vadd.s32 1, %v4558_v18 }
  0xc2   : > { %7846 = vst [vmem:[#allocation28_spill] sm:$0xff] %v5726_v29  ;;  %v599_v30 = vshll.u32 %v5538_v42, %v597_v49  ;;  %v600_v4 = vshrl.u32 %v582_v59, %v598_v37  ;;  %v603_v36 = vadd.s32 127, %v602_v50  ;;  %v981_v31 = vsel %vm971_vm14, %v978_v60, %v980_v6 }
  0xc3   : > { %7847 = vst [vmem:[#allocation29_spill] sm:$0xff] %v5736_v24  ;;  %v5743_v34 = vshrl.u32 %v896_v46, 30  ;;  %v985_v54 = vsel %vm971_vm14, %v982_v21, %v984_v11  ;;  %v7724_v45 = vand.u32 2147483647, %v5649_v15  ;;  %vm1052_vm15 = vcmp.gt.s32.totalorder %v1051_v43, 0 }
  0xc4   : > { %vm425_vm0 = vcmp.lt.s32.totalorder %v5298_v7, 0  ;;  %v4547_v17 = vmin.u32 %v798_v10, %v5707_v12  ;;  %v1053_v42 = vsel %vm1052_vm15, %v1051_v43, 0  ;;  %v507_v49 = vxor.u32 2147483648, %v506_v47 }
  0xc5   : > { %v954_v14 = vshrl.u32 %v7728_v25, %v5645_v44  ;;  %v5754_v0 = vmul.u32.u64.low %v5738_v22, %v981_v31  ;;  %v5755_v58 = vmul.u32.u64.high %v5738_v22, %v981_v31, %v5754_v0  ;;  %v975_v48 = vsel %vm973_vm11, %v963_v56, 2102212464 }
  0xc6   : > { %v5761_v59 = vmul.u32.u64.low %v5738_v22, %v985_v54  ;;  %v5762_v37 = vmul.u32.u64.high %v5738_v22, %v985_v54, %v5761_v59  ;;  %v1055_v50 = vand.u32 31, %v1053_v42  ;;  %v5764_v46 = vor.u32 %v600_v4, %v599_v30 }
  0xc7   : > { %v604_v60 = vshll.u32 %v603_v36, 23  ;;  %v898_v6 = vshll.u32 %v5743_v34, 30  ;;  %v1048_v44 = vand.u32 8388607, %v7724_v45  ;;  %v800_v18 = vclz %v4547_v17 }
  0xc8   : > { %v1056_v10 = vsub.s32 32, %v1055_v50  ;;  %v1058_v21 = vshll.u32 %v7728_v25, %v1055_v50  ;;  %v1061_v11 = vshll.u32 %v7726_v27, %v1055_v50  ;;  %v974_v56 = vsel %vm970_vm12, %v954_v14, %v957_v40 }
  0xc9   : > { %v976_v43 = vsel %vm972_vm13, %v960_v32, %v975_v48  ;;  %v5775_v30 = vshrl.u32 %v1053_v42, 5  ;;  %v7848_v4 = vmov 2102212464   ;;  %v7849_v54 = vmov 2131351028  }
  0xca   : > { %v1067_v36 = vshll.u32 %v7848_v4, %v1055_v50  ;;  %v1059_v31 = vshrl.u32 %v7726_v27, %v1056_v10  ;;  %v1062_v59 = vshrl.u32 %v7849_v54, %v1056_v10  ;;  %v1064_v17 = vshll.u32 %v7849_v54, %v1055_v50 }
  0xcb   : > { %v1065_v45 = vshrl.u32 %v7848_v4, %v1056_v10  ;;  %v508_v20 = vsel %vm425_vm0, %v507_v49, %v506_v47  ;;  %v5785_v40 = vsub.s32 %v5704_v35, %v898_v6  ;;  %v1049_v14 = vor.u32 8388608, %v1048_v44 }
  0xcc   : > { %v7850_v32 = vmov 920167782   ;;  %v977_v48 = vsel %vm971_vm14, %v974_v56, %v976_v43  ;;  %v1060_v26 = vor.u32 %v1059_v31, %v1058_v21  ;;  %v1063_v27 = vor.u32 %v1062_v59, %v1061_v11 }
  0xcd   : > { %v1068_v42 = vshrl.u32 %v7850_v32, %v1056_v10  ;;  %v1070_v25 = vshll.u32 %v7850_v32, %v1055_v50  ;;  %vm5793_vm1 = vcmp.le.f32.partialorder %v7851_v3, 0.7853982  ;;  %v996_v47 = vadd.s32 1, %v5755_v58 }
  0xce   : > { %vm1073_vm2 = vcmp.lt.s32.totalorder %v5775_v30, 1  ;;  %v1147_v49 = vand.u32 2139095040, %v5652_v63  ;;  %v4548_v6 = vadd.s32 4294967294, %v800_v18  ;;  %vm995_vm3 = vc.u32 %v5762_v37, %v5754_v0 }
  0xcf   : > { %v1069_v35 = vor.u32 %v1068_v42, %v1067_v36  ;;  %v1066_v39 = vor.u32 %v1065_v45, %v1064_v17  ;;  %v1071_v50 = vshrl.u32 %v7843_v38, %v1056_v10  ;;  %v993_v44 = vmul.u32 %v5738_v22, %v977_v48 }
  0xd0   : > { %vm1075_vm4 = vcmp.lt.s32.totalorder %v5775_v30, 3  ;;  %vm1076_vm5 = vcmp.lt.s32.totalorder %v5775_v30, 4  ;;  %v5806_v3 = vshll.u32 %v1049_v14, 8  ;;  %vm1074_vm6 = vcmp.lt.s32.totalorder %v5775_v30, 2 }
  0xd1   : > { %v1072_v21 = vor.u32 %v1071_v50, %v1070_v25  ;;  %v1081_v18 = vsel %vm1073_vm2, %v1060_v26, %v1063_v27  ;;  %v1082_v11 = vsel %vm1076_vm5, %v1069_v35, 920167782  ;;  %v605_v56 = vor.u32 4788187, %v604_v60 }
  0xd2   : > { %v901_v45 = vsub.s32 0, %v5785_v40  ;;  %v997_v43 = vsel %vm995_vm3, %v996_v47, %v5755_v58  ;;  %v1148_v36 = vshrl.u32 %v1147_v49, 23  ;;  %v7854_v22 = vmov 683565275  }
  0xd3   : > { %v1057_v31 = vshrl.u32 %v7854_v22, %v1056_v10  ;;  %v1083_v59 = vsel %vm1075_vm4, %v1066_v39, %v1082_v11  ;;  %v1085_v25 = vsel %vm1073_vm2, %v1063_v27, %v1066_v39  ;;  %v1086_v17 = vsel %vm1076_vm5, %v1072_v21, 1326507024 }
  0xd4   : > { %vm4549_vm7 = vcmp.lt.s32.totalorder %v4548_v6, 0  ;;  %v1078_v14 = vsel %vm1076_vm5, %v1066_v39, 2102212464  ;;  %v1084_v42 = vsel %vm1074_vm6, %v1081_v18, %v1083_v59  ;;  %v1087_v60 = vsel %vm1075_vm4, %v1069_v35, %v1086_v17 }
  0xd5   : > { %v5822_v48 = vadd.s32 %v997_v43, %v993_v44  ;;  %v1088_v58 = vsel %vm1074_vm6, %v1085_v25, %v1087_v60  ;;  %v5827_v10 = vmul.u32.u64.low %v5806_v3, %v1084_v42  ;;  %v5828_v47 = vmul.u32.u64.high %v5806_v3, %v1084_v42, %v5827_v10 }
  0xd6   : > { %v4551_v49 = vmin.u32 %v901_v45, %v5785_v40  ;;  %v5833_v39 = vmul.u32.u64.low %v5806_v3, %v1088_v58  ;;  %v5834_v50 = vmul.u32.u64.high %v5806_v3, %v1088_v58, %v5833_v39  ;;  %v4562_v21 = vadd.s32 4294967169, %v1148_v36 }
  0xd7   : > { %v612_v18 = vsub.s32 4, %v5491_v53  ;;  %v5837_v35 = vsel %vm4549_vm7, 0, %v4548_v6  ;;  %v1077_v44 = vsel %vm1073_vm2, %v1057_v31, %v1060_v26  ;;  %v1079_v11 = vsel %vm1075_vm4, %v1063_v27, %v1078_v14 }
  0xd8   : > { %v7855_v43 = vsub.s32 4, %v5405_v28  ;;  %v606_v59 = vand.u32 2147483647, %v605_v56  ;;  %v608_v25 = vcvt.s32.f32 %v5764_v46  ;;  %v1154_v36 = vadd.s32 1, %v4562_v21 }
  0xd9   : > { %v511_v6 = vsel %vm5793_vm1, %v5298_v7, %v508_v20  ;;  %v7856_v17 = vand.u32 2147483647, %v5303_v8  ;;  %vm528_vm9 = vcmp.lt.s32.totalorder %v5303_v8, 0  ;;  %v999_v27 = vadd.s32 536870912, %v5822_v48 }
  0xda   : > { %v510_v45 = vsel %vm425_vm0, %v7855_v43, %v5405_v28  ;;  %v808_v28 = vsub.s32 4294967266, %v5837_v35  ;;  %v903_v56 = vclz %v4551_v49  ;;  %v1080_v46 = vsel %vm1074_vm6, %v1077_v44, %v1079_v11 }
  0xdb   : > { %vm5854_vm8 = vcmp.le.f32.partialorder %v7856_v17, 0.7853982  ;;  %v1099_v31 = vadd.s32 1, %v5828_v47  ;;  %v5866_v20 = vsel %vm5793_vm1, 0, %v510_v45  ;;  %v613_v14 = vsel %vm528_vm9, %v612_v18, %v5491_v53 }
  0xdc   : > { %7859 = vst [vmem:[#allocation30_spill] sm:$0xff] %v5866_v20  ;;  %vm1098_vm10 = vc.u32 %v5834_v50, %v5827_v10  ;;  %vm1155_vm11 = vcmp.gt.s32.totalorder %v1154_v36, 0  ;;  %4837 = vcosq.f32 %v511_v6  ;;  %v609_v42 = vmul.f32 %v608_v25, %v606_v59 }
  0xdd   : > { %v788_v30 = vadd.s32 %v5520_v23, %v5532_v19  ;;  %v804_v60 = vsub.s32 32, %v5837_v35  ;;  %4839 = vsinq.f32 %v511_v6  ;;  %v5876_v58 = vshrl.u32 %v999_v27, 30 }
  0xde   : > { %v1096_v1 = vmul.u32 %v5806_v3, %v1080_v46  ;;  %v1156_v49 = vsel %vm1155_vm11, %v1154_v36, 0  ;;  %v5881_v53 = vsel %vm5854_vm8, 0, %v613_v14  ;;  %v809_v39 = vadd.s32 127, %v808_v28 }
  0xdf   : > { %7860 = vst [vmem:[#allocation31_spill] sm:$0xff] %v5881_v53  ;;  %v4552_v21 = vadd.s32 4294967294, %v903_v56  ;;  %v1100_v18 = vsel %vm1098_vm10, %v1099_v31, %v5828_v47  ;;  %v7861_v44 = vcvt.s32.f32 %v5613_v13  ;;  %v5890_v23 = vand.u32 3, %v5866_v20 }
  0xe0   : > { %v5893_v11 = vand.u32 3, %v5881_v53  ;;  %v1158_v3 = vand.u32 31, %v1156_v49  ;;  %v610_v43 = vxor.u32 2147483648, %v609_v42  ;;  %v805_v45 = vshll.u32 %v5707_v12, %v5837_v35 }
  0xe1   : > { %v5887_v19 = vmul.f32 %v5292_v5, %v7861_v44  ;;  %v806_v59 = vshrl.u32 %v788_v30, %v804_v60  ;;  %v1001_v47 = vshll.u32 %v5876_v58, 30  ;;  %v5899_v13 = vadd.s32 %v1100_v18, %v1096_v1 }
  0xe2   : > { %v7735_v5 = vand.u32 2147483647, %v5652_v63  ;;  %v5902_v36 = vsub.s32 32, %v1158_v3  ;;  %v810_v6 = vshll.u32 %v809_v39, 23  ;;  %vm4553_vm12 = vcmp.lt.s32.totalorder %v4552_v21, 0 }
  0xe3   : > { %7862 = vst [vmem:[#allocation32_spill] sm:$0xff] %v5887_v19  ;;  %v5904_v17 = vshrl.u32 %v1156_v49, 5  ;;  %v1161_v27 = vshll.u32 %v7854_v22, %v1158_v3  ;;  %v7863_v28 = vmov 2475754826   ;;  %v1167_v56 = vshll.u32 %v7849_v54, %v1158_v3 }
  0xe4   : > { %v1162_v12 = vshrl.u32 %v7863_v28, %v5902_v36  ;;  %v1164_v35 = vshll.u32 %v7863_v28, %v1158_v3  ;;  %v1170_v46 = vshll.u32 %v7848_v4, %v1158_v3  ;;  %vm518_vm13 = vcmp.eq.s32.totalorder %v5890_v23, 0 }
  0xe5   : > { %vm521_vm14 = vcmp.eq.s32.totalorder %v5890_v23, 2  ;;  %v1165_v31 = vshrl.u32 %v7849_v54, %v5902_v36  ;;  %v1168_v14 = vshrl.u32 %v7848_v4, %v5902_v36  ;;  %v1171_v30 = vshrl.u32 %v7850_v32, %v5902_v36 }
  0xe6   : > { %v1173_v60 = vshll.u32 %v7850_v32, %v1158_v3  ;;  %vm734_vm15 = vcmp.lt.s32.totalorder %v5329_v51, 0  ;;  %v5923_v1 = vsub.s32 %v5822_v48, %v1001_v47  ;;  %v1102_v49 = vadd.s32 536870912, %v5899_v13  ;;  %v5930_v44 = vpop.eup %4837 }
  0xe7   : > { %v1151_v39 = vand.u32 8388607, %v7735_v5  ;;  %v1174_v18 = vshrl.u32 %v7843_v38, %v5902_v36  ;;  %7864 = vst [vmem:[#allocation33_spill] sm:$0xff] %v5930_v44  ;;  %v611_v25 = vsel %vm528_vm9, %v610_v43, %v609_v42  ;;  %v807_v53 = vor.u32 %v806_v59, %v805_v45  ;;  %v5935_v19 = vpop.eup %4839 }
  0xe8   : > { %v811_v3 = vor.u32 4788187, %v810_v6  ;;  %v1250_v20 = vand.u32 2139095040, %v5656_v52  ;;  %7865 = vst [vmem:[#allocation34_spill] sm:$0xff] %v5935_v19  ;;  %v5938_v48 = vsel %vm4553_vm12, 0, %v4552_v21  ;;  %v5940_v47 = vor.u32 %v1162_v12, %v1161_v27 }
  0xe9   : > { %v5942_v5 = vor.u32 %v1165_v31, %v1164_v35  ;;  %v1172_v24 = vor.u32 %v1171_v30, %v1170_v46  ;;  %vm517_vm0 = vcmp.lt.s32.totalorder %v5890_v23, 2  ;;  %v1169_v29 = vor.u32 %v1168_v14, %v1167_v56 }
  0xea   : > { %v1175_v57 = vor.u32 %v1174_v18, %v1173_v60  ;;  %vm1176_vm1 = vcmp.lt.s32.totalorder %v5904_v17, 1  ;;  %vm1179_vm2 = vcmp.lt.s32.totalorder %v5904_v17, 4  ;;  %v1004_v42 = vsub.s32 0, %v5923_v1 }
  0xeb   : > { %v5948_v43 = vshrl.u32 %v1102_v49, 30  ;;  %v1152_v45 = vor.u32 8388608, %v1151_v39  ;;  %vm1178_vm3 = vcmp.lt.s32.totalorder %v5904_v17, 3  ;;  %v7739_v21 = vxor.u32 2147483648, %v5935_v19 }
  0xec   : > { %v7742_v59 = vxor.u32 2147483648, %v5930_v44  ;;  %v814_v6 = vcvt.s32.f32 %v807_v53  ;;  %v1251_v27 = vshrl.u32 %v1250_v20, 23  ;;  %v812_v12 = vand.u32 2147483647, %v811_v3 }
  0xed   : > { %vm1177_vm4 = vcmp.lt.s32.totalorder %v5904_v17, 2  ;;  %v1184_v35 = vsel %vm1176_vm1, %v5940_v47, %v5942_v5  ;;  %v1185_v56 = vsel %vm1179_vm2, %v1172_v24, 920167782  ;;  %v7866_v46 = vand.u32 2147483647, %v5329_v51 }
  0xee   : > { %v911_v53 = vsub.s32 4294967266, %v5938_v48  ;;  %v1186_v20 = vsel %vm1178_vm3, %v1169_v29, %v1185_v56  ;;  %v1188_v14 = vsel %vm1176_vm1, %v5942_v5, %v1169_v29  ;;  %v1189_v30 = vsel %vm1179_vm2, %v1175_v57, 1326507024 }
  0xef   : > { %vm5962_vm5 = vcmp.le.f32.partialorder %v7866_v46, 0.7853982  ;;  %v4555_v60 = vmin.u32 %v1004_v42, %v5923_v1  ;;  %v1104_v49 = vshll.u32 %v5948_v43, 30  ;;  %v1190_v39 = vsel %vm1178_vm3, %v1172_v24, %v1189_v30 }
  0xf0   : > { %v5978_v18 = vshll.u32 %v1152_v45, 8  ;;  %vm515_vm6 = vweird.f32 %v5298_v7  ;;  %v614_v3 = vsel %vm5854_vm8, %v5303_v8, %v611_v25  ;;  %v7869_v56 = vsub.s32 4, %v5668_v16 }
  0xf1   : > { %vm837_vm7 = vcmp.lt.s32.totalorder %v5350_v2, 0  ;;  %v1187_v42 = vsel %vm1177_vm4, %v1184_v35, %v1186_v20  ;;  %v4566_v24 = vadd.s32 4294967169, %v1251_v27  ;;  %v520_v45 = vsel %vm518_vm13, %v5930_v44, %v7739_v21 }
  0xf2   : > { %v819_v57 = vsel %vm734_vm15, %v7869_v56, %v5668_v16  ;;  %v523_v26 = vsel %vm521_vm14, %v7742_v59, %v5935_v19  ;;  %v815_v25 = vmul.f32 %v814_v6, %v812_v12  ;;  %v1191_v16 = vsel %vm1177_vm4, %v1188_v14, %v1190_v39 }
  0xf3   : > { %v891_v35 = vadd.s32 %v5608_v62, %v5618_v41  ;;  %v907_v27 = vsub.s32 32, %v5938_v48  ;;  %v912_v46 = vadd.s32 127, %v911_v53  ;;  %v1257_v20 = vadd.s32 1, %v4566_v24 }
  0xf4   : > { %v1006_v30 = vclz %v4555_v60  ;;  %v6008_v56 = vsub.s32 %v5899_v13, %v1104_v49  ;;  %v6011_v21 = vmul.u32.u64.low %v5978_v18, %v1187_v42  ;;  %v6012_v44 = vmul.u32.u64.high %v5978_v18, %v1187_v42, %v6011_v21 }
  0xf5   : > { %v1160_v6 = vshrl.u32 %v7854_v22, %v5902_v36  ;;  %v6018_v12 = vmul.u32.u64.low %v5978_v18, %v1191_v16  ;;  %v6019_v14 = vmul.u32.u64.high %v5978_v18, %v1191_v16, %v6018_v12  ;;  %vm1258_vm8 = vcmp.gt.s32.totalorder %v1257_v20, 0 }
  0xf6   : > { %v524_v62 = vsel %vm517_vm0, %v520_v45, %v523_v26  ;;  %v816_v41 = vxor.u32 2147483648, %v815_v25  ;;  %v921_v13 = vsub.s32 4, %v5743_v34  ;;  %v1181_v53 = vsel %vm1179_vm2, %v1169_v29, 2102212464 }
  0xf7   : > { %v908_v60 = vshll.u32 %v5785_v40, %v5938_v48  ;;  %v909_v49 = vshrl.u32 %v891_v35, %v907_v27  ;;  %v913_v39 = vshll.u32 %v912_v46, 23  ;;  %v1259_v36 = vsel %vm1258_vm8, %v1257_v20, 0 }
  0xf8   : > { %v6030_v42 = vsel %vm5962_vm5, 0, %v819_v57  ;;  %v4556_v24 = vadd.s32 4294967294, %v1006_v30  ;;  %v1107_v23 = vsub.s32 0, %v6008_v56  ;;  %v7743_v45 = vand.u32 2147483647, %v5656_v52 }
  0xf9   : > { %7870 = vst [vmem:[#allocation35_spill] sm:$0xff] %v6030_v42  ;;  %4841 = vcosq.f32 %v614_v3  ;;  %v1180_v29 = vsel %vm1176_vm1, %v1160_v6, %v5940_v47  ;;  %v1182_v40 = vsel %vm1178_vm3, %v5942_v5, %v1181_v53  ;;  %v1261_v48 = vand.u32 31, %v1259_v36 }
  0xfa   : > { %v6042_v26 = vsel %vm515_vm6, nan, %v524_v62  ;;  %4843 = vsinq.f32 %v614_v3  ;;  %v6045_v57 = vand.u32 3, %v6030_v42  ;;  %v6050_v16 = vsel %vm837_vm7, %v921_v13, %v5743_v34 }
  0xfb   : > { %7871 = vst [vmem:[#allocation36_spill] sm:$0xff] %v6042_v26  ;;  %v6054_v47 = vsel %vm734_vm15, %v816_v41, %v815_v25  ;;  %v910_v35 = vor.u32 %v909_v49, %v908_v60  ;;  %v914_v5 = vor.u32 4788187, %v913_v39  ;;  %v1262_v27 = vsub.s32 32, %v1261_v48 }
  0xfc   : > { %vm4557_vm9 = vcmp.lt.s32.totalorder %v4556_v24, 0  ;;  %v4559_v46 = vmin.u32 %v1107_v23, %v6008_v56  ;;  %v1183_v3 = vsel %vm1177_vm4, %v1180_v29, %v1182_v40  ;;  %v1254_v20 = vand.u32 8388607, %v7743_v45 }
  0xfd   : > { %vm1201_vm10 = vc.u32 %v6019_v14, %v6011_v21  ;;  %v1202_v34 = vadd.s32 1, %v6012_v44  ;;  %v6064_v30 = vshrl.u32 %v1259_v36, 5  ;;  %v1353_v25 = vand.u32 2139095040, %v5659_v55 }
  0xfe   : > { %v1264_v6 = vshll.u32 %v7854_v22, %v1261_v48  ;;  %v1265_v12 = vshrl.u32 %v7863_v28, %v1262_v27  ;;  %v1267_v62 = vshll.u32 %v7863_v28, %v1261_v48  ;;  %v1268_v17 = vshrl.u32 %v7849_v54, %v1262_v27 }
  0xff   : > { %v1270_v41 = vshll.u32 %v7849_v54, %v1261_v48  ;;  %v1271_v13 = vshrl.u32 %v7848_v4, %v1262_v27  ;;  %v1273_v53 = vshll.u32 %v7848_v4, %v1261_v48  ;;  %v1274_v60 = vshrl.u32 %v7850_v32, %v1262_v27 }
 0x100   : > { %v915_v49 = vand.u32 2147483647, %v914_v5  ;;  %v917_v39 = vcvt.s32.f32 %v910_v35  ;;  %v6076_v36 = vsel %vm4557_vm9, 0, %v4556_v24  ;;  %v1109_v23 = vclz %v4559_v46 }
 0x101   : > { %v1199_v29 = vmul.u32 %v5978_v18, %v1183_v3  ;;  %v1255_v40 = vor.u32 8388608, %v1254_v20  ;;  %v1276_v59 = vshll.u32 %v7850_v32, %v1261_v48  ;;  %v1277_v45 = vshrl.u32 %v7843_v38, %v1262_v27 }
 0x102   : > { %v1203_v7 = vsel %vm1201_vm10, %v1202_v34, %v6012_v44  ;;  %v1266_v19 = vor.u32 %v1265_v12, %v1264_v6  ;;  %v1269_v42 = vor.u32 %v1268_v17, %v1267_v62  ;;  %v1275_v5 = vor.u32 %v1274_v60, %v1273_v53 }
 0x103   : > { %v6085_v35 = vpop.eup %4841  ;;  %vm624_vm11 = vcmp.eq.s32.totalorder %v5893_v11, 2  ;;  %v1272_v24 = vor.u32 %v1271_v13, %v1270_v41  ;;  %v1278_v46 = vor.u32 %v1277_v45, %v1276_v59  ;;  %vm1279_vm12 = vcmp.lt.s32.totalorder %v6064_v30, 1 }
 0x104   : > { %7872 = vst [vmem:[#allocation37_spill] sm:$0xff] %v6085_v35  ;;  %v1354_v18 = vshrl.u32 %v1353_v25, 23  ;;  %v6089_v48 = vpop.eup %4843  ;;  %v7874_v3 = vand.u32 2147483647, %v5350_v2  ;;  %v918_v44 = vmul.f32 %v917_v39, %v915_v49  ;;  %v994_v34 = vadd.s32 %v5754_v0, %v5762_v37 }
 0x105   : > { %7873 = vst [vmem:[#allocation38_spill] sm:$0xff] %v6089_v48  ;;  %v1014_v6 = vsub.s32 4294967266, %v6076_v36  ;;  %vm1281_vm14 = vcmp.lt.s32.totalorder %v6064_v30, 3  ;;  %v6101_v59 = vadd.s32 %v1203_v7, %v1199_v29  ;;  %vm1280_vm15 = vcmp.lt.s32.totalorder %v6064_v30, 2 }
 0x106   : > { %vm6093_vm13 = vcmp.le.f32.partialorder %v7874_v3, 0.7853982  ;;  %vm1282_vm0 = vcmp.lt.s32.totalorder %v6064_v30, 4  ;;  %v6105_v45 = vshll.u32 %v1255_v40, 8  ;;  %v1010_v25 = vsub.s32 32, %v6076_v36 }
 0x107   : > { %v4560_v12 = vadd.s32 4294967294, %v1109_v23  ;;  %v1287_v62 = vsel %vm1279_vm12, %v1266_v19, %v1269_v42  ;;  %v1288_v0 = vsel %vm1282_vm0, %v1275_v5, 920167782  ;;  %vm621_vm1 = vcmp.eq.s32.totalorder %v5893_v11, 0 }
 0x108   : > { %v1289_v7 = vsel %vm1281_vm14, %v1272_v24, %v1288_v0  ;;  %v1291_v37 = vsel %vm1279_vm12, %v1269_v42, %v1272_v24  ;;  %v1292_v17 = vsel %vm1282_vm0, %v1278_v46, 1326507024  ;;  %v4570_v41 = vadd.s32 4294967169, %v1354_v18 }
 0x109   : > { %v919_v13 = vxor.u32 2147483648, %v918_v44  ;;  %v1015_v53 = vadd.s32 127, %v1014_v6  ;;  %v1290_v60 = vsel %vm1280_vm15, %v1287_v62, %v1289_v7  ;;  %v1293_v49 = vsel %vm1281_vm14, %v1275_v5, %v1292_v17 }
 0x10a   : > { %v1205_v39 = vadd.s32 536870912, %v6101_v59  ;;  %v1294_v23 = vsel %vm1280_vm15, %v1291_v37, %v1293_v49  ;;  %v6127_v29 = vmul.u32.u64.low %v6105_v45, %v1290_v60  ;;  %v6128_v40 = vmul.u32.u64.high %v6105_v45, %v1290_v60, %v6127_v29 }
 0x10b   : > { %vm4561_vm2 = vcmp.lt.s32.totalorder %v4560_v12, 0  ;;  %v1263_v46 = vshrl.u32 %v7854_v22, %v1262_v27  ;;  %v6133_v18 = vmul.u32.u64.low %v6105_v45, %v1294_v23  ;;  %v6134_v3 = vmul.u32.u64.high %v6105_v45, %v1294_v23, %v6133_v18 }
 0x10c   : > { %v1011_v5 = vshll.u32 %v5923_v1, %v6076_v36  ;;  %v1012_v6 = vshrl.u32 %v994_v34, %v1010_v25  ;;  %v1284_v62 = vsel %vm1282_vm0, %v1272_v24, 2102212464  ;;  %v1360_v0 = vadd.s32 1, %v4570_v41 }
 0x10d   : > { %v7748_v7 = vxor.u32 2147483648, %v6085_v35  ;;  %v820_v37 = vsel %vm5962_vm5, %v5329_v51, %v6054_v47  ;;  %v920_v27 = vsel %vm837_vm7, %v919_v13, %v918_v44  ;;  %v1016_v17 = vshll.u32 %v1015_v53, 23 }
 0x10e   : > { %v7749_v60 = vxor.u32 2147483648, %v6089_v48  ;;  %v6148_v49 = vsel %vm4561_vm2, 0, %v4560_v12  ;;  %v6150_v1 = vshrl.u32 %v1205_v39, 30  ;;  %vm1361_vm3 = vcmp.gt.s32.totalorder %v1360_v0, 0 }
 0x10f   : > { %v6157_v36 = vsel %vm624_vm11, %v7748_v7, %v6089_v48  ;;  %v6162_v31 = vsel %vm6093_vm13, 0, %v6050_v16  ;;  %v1283_v47 = vsel %vm1279_vm12, %v1263_v46, %v1266_v19  ;;  %v1285_v24 = vsel %vm1281_vm14, %v1269_v42, %v1284_v62 }
 0x110   : > { %7877 = vst [vmem:[#allocation39_spill] sm:$0xff] %v6162_v31  ;;  %4845 = vcosq.f32 %v820_v37  ;;  %v923_v44 = vsel %vm6093_vm13, %v5350_v2, %v920_v27  ;;  %v1013_v34 = vor.u32 %v1012_v6, %v1011_v5  ;;  %v1362_v25 = vsel %vm1361_vm3, %v1360_v0, 0 }
 0x111   : > { %4847 = vsinq.f32 %v820_v37  ;;  %v1017_v12 = vor.u32 4788187, %v1016_v17  ;;  %v1117_v41 = vsub.s32 4294967266, %v6148_v49  ;;  %v7750_v16 = vand.u32 2147483647, %v5659_v55 }
 0x112   : > { %v1207_v13 = vshll.u32 %v6150_v1, 30  ;;  %v1286_v19 = vsel %vm1280_vm15, %v1283_v47, %v1285_v24  ;;  %v1305_v42 = vadd.s32 1, %v6128_v40  ;;  %v1364_v53 = vand.u32 31, %v1362_v25 }
 0x113   : > { %v6182_v20 = vsel %vm621_vm1, %v6085_v35, %v7749_v60  ;;  %4849 = vcosq.f32 %v923_v44  ;;  %v6185_v39 = vand.u32 3, %v6162_v31  ;;  %vm1304_vm4 = vc.u32 %v6134_v3, %v6127_v29 }
 0x114   : > { %4851 = vsinq.f32 %v923_v44  ;;  %v1020_v30 = vcvt.s32.f32 %v1013_v34  ;;  %v1097_v23 = vadd.s32 %v5827_v10, %v5834_v50  ;;  %v1365_v46 = vsub.s32 32, %v1364_v53 }
 0x115   : > { %v1018_v18 = vand.u32 2147483647, %v1017_v12  ;;  %v1113_v5 = vsub.s32 32, %v6148_v49  ;;  %v1118_v6 = vadd.s32 127, %v1117_v41  ;;  %v1302_v62 = vmul.u32 %v6105_v45, %v1286_v19 }
 0x116   : > { %v6194_v0 = vsub.s32 %v6101_v59, %v1207_v13  ;;  %v1306_v37 = vsel %vm1304_vm4, %v1305_v42, %v6128_v40  ;;  %v1357_v27 = vand.u32 8388607, %v7750_v16  ;;  %v1367_v17 = vshll.u32 %v7854_v22, %v1364_v53 }
 0x117   : > { %v1368_v47 = vshrl.u32 %v7863_v28, %v1365_v46  ;;  %v1370_v10 = vshll.u32 %v7863_v28, %v1364_v53  ;;  %v1371_v50 = vshrl.u32 %v7849_v54, %v1365_v46  ;;  %v1376_v24 = vshll.u32 %v7848_v4, %v1364_v53 }
 0x118   : > { %v6204_v44 = vshrl.u32 %v1362_v25, 5  ;;  %v1373_v59 = vshll.u32 %v7849_v54, %v1364_v53  ;;  %v1374_v45 = vshrl.u32 %v7848_v4, %v1365_v46  ;;  %v1377_v40 = vshrl.u32 %v7850_v32, %v1365_v46 }
 0x119   : > { %v6209_v34 = vmul.f32 %v1020_v30, %v1018_v18  ;;  %v1114_v12 = vshll.u32 %v6008_v56, %v6148_v49  ;;  %v6213_v41 = vadd.s32 %v1306_v37, %v1302_v62  ;;  %v1379_v13 = vshll.u32 %v7850_v32, %v1364_v53 }
 0x11a   : > { %v6216_v19 = vpop.eup %4845  ;;  %vm830_vm5 = vcmp.eq.s32.totalorder %v6045_v57, 2  ;;  %v1115_v25 = vshrl.u32 %v1097_v23, %v1113_v5  ;;  %v1119_v42 = vshll.u32 %v1118_v6, 23  ;;  %v1358_v7 = vor.u32 8388608, %v1357_v27 }
 0x11b   : > { %7878 = vst [vmem:[#allocation40_spill] sm:$0xff] %v6216_v19  ;;  %v1380_v60 = vshrl.u32 %v7843_v38, %v1365_v46  ;;  %v6220_v16 = vpop.eup %4847  ;;  %vm827_vm7 = vcmp.eq.s32.totalorder %v6045_v57, 0  ;;  %vm940_vm8 = vcmp.lt.s32.totalorder %v5526_v61, 0  ;;  %v1210_v56 = vsub.s32 0, %v6194_v0 }
 0x11c   : > { %7879 = vst [vmem:[#allocation41_spill] sm:$0xff] %v6220_v16  ;;  %v1369_v49 = vor.u32 %v1368_v47, %v1367_v17  ;;  %v1372_v30 = vor.u32 %v1371_v50, %v1370_v10  ;;  %v1378_v53 = vor.u32 %v1377_v40, %v1376_v24  ;;  %v1375_v18 = vor.u32 %v1374_v45, %v1373_v59 }
 0x11d   : > { %v1381_v62 = vor.u32 %v1380_v60, %v1379_v13  ;;  %vm1382_vm9 = vcmp.lt.s32.totalorder %v6204_v44, 1  ;;  %vm1385_vm10 = vcmp.lt.s32.totalorder %v6204_v44, 4  ;;  %v6227_v23 = vpop.eup %4849  ;;  %vm933_vm11 = vcmp.eq.s32.totalorder %v6185_v39, 2 }
 0x11e   : > { %7880 = vst [vmem:[#allocation42_spill] sm:$0xff] %v6227_v23  ;;  %v1022_v6 = vxor.u32 2147483648, %v6209_v34  ;;  %v1308_v37 = vadd.s32 536870912, %v6213_v41  ;;  %vm1384_vm12 = vcmp.lt.s32.totalorder %v6204_v44, 3  ;;  %v6234_v27 = vpop.eup %4851  ;;  %vm930_vm13 = vcmp.eq.s32.totalorder %v6185_v39, 0 }
 0x11f   : > { %7881 = vst [vmem:[#allocation43_spill] sm:$0xff] %v6234_v27  ;;  %v7882_v60 = vand.u32 2147483647, %v5526_v61  ;;  %v1116_v47 = vor.u32 %v1115_v25, %v1114_v12  ;;  %vm1383_vm15 = vcmp.lt.s32.totalorder %v6204_v44, 2  ;;  %v6244_v10 = vshll.u32 %v1358_v7, 8 }
 0x120   : > { %v1456_v50 = vand.u32 2139095040, %v5691_v9  ;;  %vm620_vm0 = vcmp.lt.s32.totalorder %v5893_v11, 2  ;;  %v1120_v24 = vor.u32 4788187, %v1119_v42  ;;  %v4563_v59 = vmin.u32 %v1210_v56, %v6194_v0 }
 0x121   : > { %vm6239_vm14 = vcmp.le.f32.partialorder %v7882_v60, 0.7853982  ;;  %v1390_v45 = vsel %vm1382_vm9, %v1369_v49, %v1372_v30  ;;  %v1391_v40 = vsel %vm1385_vm10, %v1378_v53, 920167782  ;;  %vm826_vm1 = vcmp.lt.s32.totalorder %v6045_v57, 2 }
 0x122   : > { %v1366_v12 = vshrl.u32 %v7854_v22, %v1365_v46  ;;  %v1392_v7 = vsel %vm1384_vm12, %v1375_v18, %v1391_v40  ;;  %v1394_v13 = vsel %vm1382_vm9, %v1372_v30, %v1375_v18  ;;  %v1395_v25 = vsel %vm1385_vm10, %v1381_v62, 1326507024 }
 0x123   : > { %vm929_vm2 = vcmp.lt.s32.totalorder %v6185_v39, 2  ;;  %v6262_v42 = vshrl.u32 %v1308_v37, 30  ;;  %v1387_v56 = vsel %vm1385_vm10, %v1375_v18, 2102212464  ;;  %v1393_v60 = vsel %vm1383_vm15, %v1390_v45, %v1392_v7 }
 0x124   : > { %v1396_v46 = vsel %vm1384_vm12, %v1378_v53, %v1395_v25  ;;  %v6273_v5 = vmul.u32.u64.low %v6244_v10, %v1393_v60  ;;  %v6274_v35 = vmul.u32.u64.high %v6244_v10, %v1393_v60, %v6273_v5  ;;  %v1457_v62 = vshrl.u32 %v1456_v50, 23 }
 0x125   : > { %v1397_v40 = vsel %vm1383_vm15, %v1394_v13, %v1396_v46  ;;  %v7758_v37 = vxor.u32 2147483648, %v6220_v16  ;;  %v1212_v48 = vclz %v4563_v59  ;;  %v1024_v45 = vsub.s32 4, %v5876_v58 }
 0x126   : > { %v6279_v18 = vmul.u32.u64.low %v6244_v10, %v1397_v40  ;;  %v6280_v31 = vmul.u32.u64.high %v6244_v10, %v1397_v40, %v6279_v18  ;;  %v1386_v53 = vsel %vm1382_vm9, %v1366_v12, %v1369_v49  ;;  %v1388_v7 = vsel %vm1384_vm12, %v1372_v30, %v1387_v56 }
 0x127   : > { %v4574_v13 = vadd.s32 4294967169, %v1457_v62  ;;  %v7885_v25 = vxor.u32 2147483648, %v6216_v19  ;;  %v1121_v59 = vand.u32 2147483647, %v1120_v24  ;;  %v1123_v60 = vcvt.s32.f32 %v1116_v47 }
 0x128   : > { %v1310_v46 = vshll.u32 %v6262_v42, 30  ;;  %v829_v49 = vsel %vm827_vm7, %v6216_v19, %v7758_v37  ;;  %v7756_v12 = vxor.u32 2147483648, %v6227_v23  ;;  %v1023_v30 = vsel %vm940_vm8, %v1022_v6, %v6209_v34 }
 0x129   : > { %v832_v50 = vsel %vm830_vm5, %v7885_v25, %v6220_v16  ;;  %v1463_v56 = vadd.s32 1, %v4574_v13  ;;  %v7757_v40 = vxor.u32 2147483648, %v6234_v27  ;;  %vm1043_vm3 = vcmp.lt.s32.totalorder %v5649_v15, 0 }
 0x12a   : > { %v4564_v47 = vadd.s32 4294967294, %v1212_v48  ;;  %v1389_v24 = vsel %vm1383_vm15, %v1386_v53, %v1388_v7  ;;  %v1408_v62 = vadd.s32 1, %v6274_v35  ;;  %v935_v18 = vsel %vm933_vm11, %v7756_v12, %v6234_v27 }
 0x12b   : > { %v1025_v34 = vsel %vm940_vm8, %v1024_v45, %v5876_v58  ;;  %vm1407_vm4 = vc.u32 %v6280_v31, %v6273_v5  ;;  %vm1464_vm5 = vcmp.gt.s32.totalorder %v1463_v56, 0  ;;  %v932_v48 = vsel %vm930_vm13, %v6227_v23, %v7757_v40 }
 0x12c   : > { %v1026_v44 = vsel %vm6239_vm14, %v5526_v61, %v1023_v30  ;;  %v1124_v6 = vmul.f32 %v1123_v60, %v1121_v59  ;;  %v6326_v53 = vsub.s32 %v6213_v41, %v1310_v46  ;;  %v6332_v58 = vsel %vm620_vm0, %v6182_v20, %v6157_v36 }
 0x12d   : > { %v1405_v45 = vmul.u32 %v6244_v10, %v1389_v24  ;;  %v7759_v7 = vand.u32 2147483647, %v5691_v9  ;;  %v1465_v13 = vsel %vm1464_vm5, %v1463_v56, 0  ;;  %v6338_v25 = vsel %vm826_vm1, %v829_v49, %v832_v50 }
 0x12e   : > { %v6342_v59 = vsel %vm6239_vm14, 0, %v1025_v34  ;;  %vm4565_vm7 = vcmp.lt.s32.totalorder %v4564_v47, 0  ;;  %v1409_v41 = vsel %vm1407_vm4, %v1408_v62, %v6274_v35  ;;  %v6347_v11 = vsel %vm929_vm2, %v932_v48, %v935_v18 }
 0x12f   : > { %7886 = vst [vmem:[#allocation44_spill] sm:$0xff] %v6342_v59  ;;  %4853 = vcosq.f32 %v1026_v44  ;;  %v6350_v36 = vand.u32 3, %v6342_v59  ;;  %v1467_v20 = vand.u32 31, %v1465_v13  ;;  %v1125_v57 = vxor.u32 2147483648, %v1124_v6 }
 0x130   : > { %4855 = vsinq.f32 %v1026_v44  ;;  %v1313_v17 = vsub.s32 0, %v6326_v53  ;;  %v6354_v50 = vsel %vm4565_vm7, 0, %v4564_v47  ;;  %v6356_v60 = vadd.s32 %v1409_v41, %v1405_v45 }
 0x131   : > { %v1460_v35 = vand.u32 8388607, %v7759_v7  ;;  %v1468_v39 = vsub.s32 32, %v1467_v20  ;;  %v1200_v46 = vadd.s32 %v6011_v21, %v6019_v14  ;;  %v1470_v49 = vshll.u32 %v7854_v22, %v1467_v20 }
 0x132   : > { %v1473_v30 = vshll.u32 %v7863_v28, %v1467_v20  ;;  %v1476_v56 = vshll.u32 %v7849_v54, %v1467_v20  ;;  %v1479_v18 = vshll.u32 %v7848_v4, %v1467_v20  ;;  %v1220_v34 = vsub.s32 4294967266, %v6354_v50 }
 0x133   : > { %v1471_v24 = vshrl.u32 %v7863_v28, %v1468_v39  ;;  %v1474_v47 = vshrl.u32 %v7849_v54, %v1468_v39  ;;  %v1477_v62 = vshrl.u32 %v7848_v4, %v1468_v39  ;;  %v4567_v48 = vmin.u32 %v1313_v17, %v6326_v53 }
 0x134   : > { %v1466_v44 = vshrl.u32 %v1465_v13, 5  ;;  %v1480_v21 = vshrl.u32 %v7850_v32, %v1468_v39  ;;  %v1126_v14 = vsel %vm1043_vm3, %v1125_v57, %v1124_v6  ;;  %v1411_v45 = vadd.s32 536870912, %v6356_v60 }
 0x135   : > { %v1461_v41 = vor.u32 8388608, %v1460_v35  ;;  %v1559_v12 = vand.u32 2139095040, %v5698_v33  ;;  %v7887_v40 = vand.u32 2147483647, %v5649_v15  ;;  %v1216_v7 = vsub.s32 32, %v6354_v50 }
 0x136   : > { %v1469_v13 = vshrl.u32 %v7854_v22, %v1468_v39  ;;  %v1472_v17 = vor.u32 %v1471_v24, %v1470_v49  ;;  %v1475_v10 = vor.u32 %v1474_v47, %v1473_v30  ;;  %vm618_vm9 = vweird.f32 %v5303_v8 }
 0x137   : > { %vm6378_vm8 = vcmp.le.f32.partialorder %v7887_v40, 0.7853982  ;;  %vm824_vm10 = vweird.f32 %v5329_v51  ;;  %v1478_v6 = vor.u32 %v1477_v62, %v1476_v56  ;;  %v1481_v57 = vor.u32 %v1480_v21, %v1479_v18 }
 0x138   : > { %v1482_v35 = vshll.u32 %v7850_v32, %v1467_v20  ;;  %v1483_v23 = vshrl.u32 %v7843_v38, %v1468_v39  ;;  %vm7808_vm11 = vweird.f32 %v5350_v2  ;;  %v1217_v40 = vshll.u32 %v6194_v0, %v6354_v50 }
 0x139   : > { %v1221_v27 = vadd.s32 127, %v1220_v34  ;;  %v1315_v19 = vclz %v4567_v48  ;;  %vm1485_vm12 = vcmp.lt.s32.totalorder %v1466_v44, 1  ;;  %v6391_v49 = vpop.eup %4853  ;;  %v6393_v30 = vshrl.u32 %v1411_v45, 30 }
 0x13a   : > { %7890 = vst [vmem:[#allocation45_spill] sm:$0xff] %v6391_v49  ;;  %v1484_v24 = vor.u32 %v1483_v23, %v1482_v35  ;;  %v1501_v47 = vshll.u32 %v1461_v41, 8  ;;  %v1560_v56 = vshrl.u32 %v1559_v12, 23  ;;  %v6395_v62 = vpop.eup %4855  ;;  %vm1486_vm13 = vcmp.lt.s32.totalorder %v1466_v44, 2 }
 0x13b   : > { %7891 = vst [vmem:[#allocation46_spill] sm:$0xff] %v6395_v62  ;;  %vm1487_vm14 = vcmp.lt.s32.totalorder %v1466_v44, 3  ;;  %vm1488_vm15 = vcmp.lt.s32.totalorder %v1466_v44, 4  ;;  %v1489_v20 = vsel %vm1485_vm12, %v1469_v13, %v1472_v17  ;;  %v1493_v18 = vsel %vm1485_vm12, %v1472_v17, %v1475_v10 }
 0x13c   : > { %v1490_v39 = vsel %vm1488_vm15, %v1478_v6, 2102212464  ;;  %v1494_v21 = vsel %vm1488_vm15, %v1481_v57, 920167782  ;;  %v1497_v0 = vsel %vm1485_vm12, %v1475_v10, %v1478_v6  ;;  %v1218_v50 = vshrl.u32 %v1200_v46, %v1216_v7 }
 0x13d   : > { %v1491_v34 = vsel %vm1487_vm14, %v1475_v10, %v1490_v39  ;;  %v1495_v48 = vsel %vm1487_vm14, %v1478_v6, %v1494_v21  ;;  %v1498_v16 = vsel %vm1488_vm15, %v1484_v24, 1326507024  ;;  %v4568_v59 = vadd.s32 4294967294, %v1315_v19 }
 0x13e   : > { %v1496_v45 = vsel %vm1486_vm13, %v1493_v18, %v1495_v48  ;;  %v1499_v23 = vsel %vm1487_vm14, %v1481_v57, %v1498_v16  ;;  %v4578_v41 = vadd.s32 4294967169, %v1560_v56  ;;  %v1492_v12 = vsel %vm1486_vm13, %v1489_v20, %v1491_v34 }
 0x13f   : > { %v1500_v35 = vsel %vm1486_vm13, %v1497_v0, %v1499_v23  ;;  %v6400_v26 = vmul.u32.u64.low %v1501_v47, %v1496_v45  ;;  %v6401_v9 = vmul.u32.u64.high %v1501_v47, %v1496_v45, %v6400_v26  ;;  %v1222_v13 = vshll.u32 %v1221_v27, 23 }
 0x140   : > { %v1413_v17 = vshll.u32 %v6393_v30, 30  ;;  %v6405_v7 = vmul.u32.u64.low %v1501_v47, %v1500_v35  ;;  %v6406_v10 = vmul.u32.u64.high %v1501_v47, %v1500_v35, %v6405_v7  ;;  %v6411_v19 = vsel %vm618_vm9, nan, %v6332_v58 }
 0x141   : > { %v6416_v16 = vsel %vm824_vm10, nan, %v6338_v25  ;;  %vm1036_vm0 = vcmp.eq.s32.totalorder %v6350_v36, 2  ;;  %v1566_v46 = vadd.s32 1, %v4578_v41  ;;  %v6422_v27 = vsel %vm7808_vm11, nan, %v6347_v11 }
 0x142   : > { %v7892_v44 = vsub.s32 4, %v5948_v43  ;;  %v1129_v6 = vsel %vm6378_vm8, %v5649_v15, %v1126_v14  ;;  %v1508_v25 = vmul.u32 %v1501_v47, %v1492_v12  ;;  %v1219_v57 = vor.u32 %v1218_v50, %v1217_v40 }
 0x143   : > { %vm4569_vm1 = vcmp.lt.s32.totalorder %v4568_v59, 0  ;;  %v1511_v24 = vadd.s32 1, %v6401_v9  ;;  %vm1567_vm2 = vcmp.gt.s32.totalorder %v1566_v46, 0  ;;  %v1223_v56 = vor.u32 4788187, %v1222_v13 }
 0x144   : > { %v1128_v58 = vsel %vm1043_vm3, %v7892_v44, %v5948_v43  ;;  %v6434_v11 = vsub.s32 %v6356_v60, %v1413_v17  ;;  %vm1510_vm4 = vc.u32 %v6406_v10, %v6400_v26  ;;  %v1568_v20 = vsel %vm1567_vm2, %v1566_v46, 0 }
 0x145   : > { %v7772_v43 = vxor.u32 2147483648, %v6391_v49  ;;  %v6441_v39 = vsel %vm6378_vm8, 0, %v1128_v58  ;;  %v1512_v14 = vsel %vm1510_vm4, %v1511_v24, %v6401_v9  ;;  %v7773_v40 = vand.u32 2147483647, %v5698_v33 }
 0x146   : > { %7893 = vst [vmem:[#allocation47_spill] sm:$0xff] %v6441_v39  ;;  %4857 = vcosq.f32 %v1129_v6  ;;  %v6445_v47 = vsel %vm4569_vm1, 0, %v4568_v59  ;;  %v6447_v18 = vadd.s32 %v1512_v14, %v1508_v25  ;;  %v1570_v60 = vand.u32 31, %v1568_v20 }
 0x147   : > { %v6455_v37 = vsel %vm1036_vm0, %v7772_v43, %v6395_v62  ;;  %4859 = vsinq.f32 %v1129_v6  ;;  %v6458_v9 = vand.u32 3, %v6441_v39  ;;  %v1224_v0 = vand.u32 2147483647, %v1223_v56 }
 0x148   : > { %v1226_v50 = vcvt.s32.f32 %v1219_v57  ;;  %v1416_v59 = vsub.s32 0, %v6434_v11  ;;  %v1571_v34 = vsub.s32 32, %v1570_v60  ;;  %v1323_v48 = vsub.s32 4294967266, %v6445_v47 }
 0x149   : > { %v1514_v45 = vadd.s32 536870912, %v6447_v18  ;;  %v1563_v23 = vand.u32 8388607, %v7773_v40  ;;  %v1569_v41 = vshrl.u32 %v1568_v20, 5  ;;  %v1573_v12 = vshll.u32 %v7854_v22, %v1570_v60 }
 0x14a   : > { %v1574_v35 = vshrl.u32 %v7863_v28, %v1571_v34  ;;  %v1576_v13 = vshll.u32 %v7863_v28, %v1570_v60  ;;  %v1577_v17 = vshrl.u32 %v7849_v54, %v1571_v34  ;;  %v1579_v7 = vshll.u32 %v7849_v54, %v1570_v60 }
 0x14b   : > { %v1580_v46 = vshrl.u32 %v7848_v4, %v1571_v34  ;;  %v1582_v44 = vshll.u32 %v7848_v4, %v1570_v60  ;;  %v1583_v58 = vshrl.u32 %v7850_v32, %v1571_v34  ;;  %vm1033_vm3 = vcmp.eq.s32.totalorder %v6350_v36, 0 }
 0x14c   : > { %v1227_v6 = vmul.f32 %v1226_v50, %v1224_v0  ;;  %v1230_v25 = vsub.s32 4, %v6150_v1  ;;  %v1303_v57 = vadd.s32 %v6127_v29, %v6134_v3  ;;  %v4571_v24 = vmin.u32 %v1416_v59, %v6434_v11 }
 0x14d   : > { %v1319_v56 = vsub.s32 32, %v6445_v47  ;;  %v1324_v20 = vadd.s32 127, %v1323_v48  ;;  %v6479_v14 = vshrl.u32 %v1514_v45, 30  ;;  %v1585_v43 = vshll.u32 %v7850_v32, %v1570_v60 }
 0x14e   : > { %vm1146_vm5 = vcmp.lt.s32.totalorder %v5652_v63, 0  ;;  %v1564_v40 = vor.u32 8388608, %v1563_v23  ;;  %v1575_v21 = vor.u32 %v1574_v35, %v1573_v12  ;;  %v1578_v2 = vor.u32 %v1577_v17, %v1576_v13 }
 0x14f   : > { %v1586_v0 = vshrl.u32 %v7843_v38, %v1571_v34  ;;  %vm1032_vm7 = vcmp.lt.s32.totalorder %v6350_v36, 2  ;;  %v1572_v29 = vshrl.u32 %v7854_v22, %v1571_v34  ;;  %v1581_v3 = vor.u32 %v1580_v46, %v1579_v7 }
 0x150   : > { %v1584_v50 = vor.u32 %v1583_v58, %v1582_v44  ;;  %vm1588_vm8 = vcmp.lt.s32.totalorder %v1569_v41, 1  ;;  %v6486_v59 = vpop.eup %4857  ;;  %vm1136_vm12 = vcmp.eq.s32.totalorder %v6458_v9, 0  ;;  %vm1139_vm13 = vcmp.eq.s32.totalorder %v6458_v9, 2 }
 0x151   : > { %7894 = vst [vmem:[#allocation48_spill] sm:$0xff] %v6486_v59  ;;  %v1228_v60 = vxor.u32 2147483648, %v1227_v6  ;;  %v1320_v48 = vshll.u32 %v6326_v53, %v6445_v47  ;;  %v1418_v45 = vclz %v4571_v24  ;;  %v1587_v23 = vor.u32 %v1586_v0, %v1585_v43  ;;  %v6492_v12 = vpop.eup %4859 }
 0x152   : > { %7895 = vst [vmem:[#allocation49_spill] sm:$0xff] %v6492_v12  ;;  %v7896_v35 = vand.u32 2147483647, %v5652_v63  ;;  %v1321_v13 = vshrl.u32 %v1303_v57, %v1319_v56  ;;  %v1516_v17 = vshll.u32 %v6479_v14, 30  ;;  %vm1590_vm15 = vcmp.lt.s32.totalorder %v1569_v41, 3 }
 0x153   : > { %vm1591_vm0 = vcmp.lt.s32.totalorder %v1569_v41, 4  ;;  %v1325_v7 = vshll.u32 %v1324_v20, 23  ;;  %vm1589_vm1 = vcmp.lt.s32.totalorder %v1569_v41, 2  ;;  %v1596_v46 = vsel %vm1588_vm8, %v1575_v21, %v1578_v2 }
 0x154   : > { %vm6496_vm14 = vcmp.le.f32.partialorder %v7896_v35, 0.7853982  ;;  %v1604_v53 = vshll.u32 %v1564_v40, 8  ;;  %v1592_v43 = vsel %vm1588_vm8, %v1572_v29, %v1575_v21  ;;  %v1593_v47 = vsel %vm1591_vm0, %v1581_v3, 2102212464  ;;  %v7899_v21 = vld [vmem:[#allocation27_spill] sm:$0xff] }
 0x155   : > { %v1597_v44 = vsel %vm1591_vm0, %v1584_v50, 920167782  ;;  %v1600_v58 = vsel %vm1588_vm8, %v1578_v2, %v1581_v3  ;;  %v4572_v24 = vadd.s32 4294967294, %v1418_v45  ;;  %v1594_v0 = vsel %vm1590_vm15, %v1578_v2, %v1593_v47 }
 0x156   : > { %v1598_v57 = vsel %vm1590_vm15, %v1581_v3, %v1597_v44  ;;  %v1601_v56 = vsel %vm1591_vm0, %v1587_v23, 1326507024  ;;  %vm1135_vm2 = vcmp.lt.s32.totalorder %v6458_v9, 2  ;;  %v6508_v20 = vsub.s32 %v6447_v18, %v1516_v17 }
 0x157   : > { %v1599_v35 = vsel %vm1589_vm1, %v1596_v46, %v1598_v57  ;;  %v1602_v40 = vsel %vm1590_vm15, %v1584_v50, %v1601_v56  ;;  %v1662_v29 = vand.u32 2139095040, %v7899_v21  ;;  %vm7807_vm4 = vweird.f32 %v5526_v61 }
 0x158   : > { %v1595_v45 = vsel %vm1589_vm1, %v1592_v43, %v1594_v0  ;;  %v1603_v2 = vsel %vm1589_vm1, %v1600_v58, %v1602_v40  ;;  %v6516_v47 = vmul.u32.u64.low %v1604_v53, %v1599_v35  ;;  %v6517_v3 = vmul.u32.u64.high %v1604_v53, %v1599_v35, %v6516_v47 }
 0x159   : > { %v7900_v23 = vxor.u32 2147483648, %v6395_v62  ;;  %v6525_v17 = vmul.u32.u64.low %v1604_v53, %v1603_v2  ;;  %v6526_v50 = vmul.u32.u64.high %v1604_v53, %v1603_v2, %v6525_v17  ;;  %v1663_v46 = vshrl.u32 %v1662_v29, 23 }
 0x15a   : > { %v7776_v44 = vxor.u32 2147483648, %v6492_v12  ;;  %v7775_v43 = vxor.u32 2147483648, %v6486_v59  ;;  %v1322_v41 = vor.u32 %v1321_v13, %v1320_v48  ;;  %v1326_v58 = vor.u32 4788187, %v1325_v7 }
 0x15b   : > { %v1035_v18 = vsel %vm1033_vm3, %v6391_v49, %v7900_v23  ;;  %v1229_v0 = vsel %vm1146_vm5, %v1228_v60, %v1227_v6  ;;  %v1519_v57 = vsub.s32 0, %v6508_v20  ;;  %v1611_v56 = vmul.u32 %v1604_v53, %v1595_v45 }
 0x15c   : > { %v4582_v35 = vadd.s32 4294967169, %v1663_v46  ;;  %v1039_v40 = vsel %vm1032_vm7, %v1035_v18, %v6455_v37  ;;  %v1231_v29 = vsel %vm1146_vm5, %v1230_v25, %v6150_v1  ;;  %vm4573_vm3 = vcmp.lt.s32.totalorder %v4572_v24, 0 }
 0x15d   : > { %v1614_v48 = vadd.s32 1, %v6517_v3  ;;  %v1138_v6 = vsel %vm1136_vm12, %v6486_v59, %v7776_v44  ;;  %v1141_v36 = vsel %vm1139_vm13, %v7775_v43, %v6492_v12  ;;  %vm1613_vm7 = vc.u32 %v6526_v50, %v6516_v47 }
 0x15e   : > { %v1669_v37 = vadd.s32 1, %v4582_v35  ;;  %v1232_v1 = vsel %vm6496_vm14, %v5652_v63, %v1229_v0  ;;  %v1327_v25 = vand.u32 2147483647, %v1326_v58  ;;  %v1329_v60 = vcvt.s32.f32 %v1322_v41 }
 0x15f   : > { %v1615_v13 = vsel %vm1613_vm7, %v1614_v48, %v6517_v3  ;;  %vm7806_vm5 = vweird.f32 %v5649_v15  ;;  %v1421_v7 = vsel %vm4573_vm3, 0, %v4572_v24  ;;  %v4575_v53 = vmin.u32 %v1519_v57, %v6508_v20 }
 0x160   : > { %v1616_v45 = vadd.s32 %v1615_v13, %v1611_v56  ;;  %vm1670_vm8 = vcmp.gt.s32.totalorder %v1669_v37, 0  ;;  %v1406_v2 = vadd.s32 %v6273_v5, %v6280_v31  ;;  %v1422_v23 = vsub.s32 32, %v1421_v7 }
 0x161   : > { %v7777_v18 = vand.u32 2147483647, %v7899_v21  ;;  %v1671_v17 = vsel %vm1670_vm8, %v1669_v37, 0  ;;  %v6565_v46 = vsel %vm7807_vm4, nan, %v1039_v40  ;;  %4861 = vcosq.f32 %v1232_v1 }
 0x162   : > { %v1617_v3 = vadd.s32 536870912, %v1616_v45  ;;  %v1673_v41 = vand.u32 31, %v1671_v17  ;;  %v1142_v24 = vsel %vm1135_vm2, %v1138_v6, %v1141_v36  ;;  %v6571_v58 = vsel %vm6496_vm14, 0, %v1231_v29 }
 0x163   : > { %7901 = vst [vmem:[#allocation27_spill] sm:$0xff] %v6571_v58  ;;  %4863 = vsinq.f32 %v1232_v1  ;;  %v6573_v31 = vmul.f32 %v1329_v60, %v1327_v25  ;;  %v1426_v5 = vsub.s32 4294967266, %v1421_v7  ;;  %v1521_v0 = vclz %v4575_v53 }
 0x164   : > { %v6575_v57 = vshrl.u32 %v1617_v3, 30  ;;  %v1674_v56 = vsub.s32 32, %v1673_v41  ;;  %v1423_v35 = vshll.u32 %v6434_v11, %v1421_v7  ;;  %v1424_v40 = vshrl.u32 %v1406_v2, %v1422_v23 }
 0x165   : > { %v1666_v48 = vand.u32 8388607, %v7777_v18  ;;  %v1676_v9 = vshll.u32 %v7854_v22, %v1673_v41  ;;  %v1679_v29 = vshll.u32 %v7863_v28, %v1673_v41  ;;  %v1682_v6 = vshll.u32 %v7849_v54, %v1673_v41 }
 0x166   : > { %v1619_v34 = vshll.u32 %v6575_v57, 30  ;;  %v1685_v36 = vshll.u32 %v7848_v4, %v1673_v41  ;;  %v1677_v37 = vshrl.u32 %v7863_v28, %v1674_v56  ;;  %v1680_v1 = vshrl.u32 %v7849_v54, %v1674_v56 }
 0x167   : > { %v1683_v11 = vshrl.u32 %v7848_v4, %v1674_v56  ;;  %v1686_v25 = vshrl.u32 %v7850_v32, %v1674_v56  ;;  %v6590_v60 = vand.u32 3, %v6571_v58  ;;  %v1427_v13 = vadd.s32 127, %v1426_v5 }
 0x168   : > { %v4576_v7 = vadd.s32 4294967294, %v1521_v0  ;;  %v1672_v53 = vshrl.u32 %v1671_v17, 5  ;;  %v6594_v2 = vsel %vm7806_vm5, nan, %v1142_v24  ;;  %v1331_v23 = vxor.u32 2147483648, %v6573_v31 }
 0x169   : > { %7902 = vst [vmem:[#allocation50_spill] sm:$0xff] %v6594_v2  ;;  %v6597_v3 = vsub.s32 %v1616_v45, %v1619_v34  ;;  %v1688_v43 = vshll.u32 %v7850_v32, %v1673_v41  ;;  %vm1249_vm12 = vcmp.lt.s32.totalorder %v5656_v52, 0  ;;  %v6601_v44 = vor.u32 %v1424_v40, %v1423_v35  ;;  %v7904_v41 = vld [vmem:[#allocation28_spill] sm:$0xff] }
 0x16a   : > { %v1667_v18 = vor.u32 8388608, %v1666_v48  ;;  %v1675_v61 = vshrl.u32 %v7854_v22, %v1674_v56  ;;  %v1689_v5 = vshrl.u32 %v7843_v38, %v1674_v56  ;;  %v1678_v17 = vor.u32 %v1677_v37, %v1676_v9 }
 0x16b   : > { %v1681_v0 = vor.u32 %v1680_v1, %v1679_v29  ;;  %v1684_v15 = vor.u32 %v1683_v11, %v1682_v6  ;;  %v1687_v24 = vor.u32 %v1686_v25, %v1685_v36  ;;  %v6605_v2 = vpop.eup %4861  ;;  %vm1242_vm13 = vcmp.eq.s32.totalorder %v6590_v60, 2 }
 0x16c   : > { %7903 = vst [vmem:[#allocation51_spill] sm:$0xff] %v6605_v2  ;;  %v1428_v45 = vshll.u32 %v1427_v13, 23  ;;  %vm4577_vm14 = vcmp.lt.s32.totalorder %v4576_v7, 0  ;;  %vm1691_vm15 = vcmp.lt.s32.totalorder %v1672_v53, 1  ;;  %v1765_v34 = vand.u32 2139095040, %v7904_v41 }
 0x16d   : > { %v6609_v35 = vpop.eup %4863  ;;  %vm1239_vm0 = vcmp.eq.s32.totalorder %v6590_v60, 0  ;;  %v7906_v40 = vand.u32 2147483647, %v5656_v52  ;;  %v1622_v48 = vsub.s32 0, %v6597_v3  ;;  %v1690_v9 = vor.u32 %v1689_v5, %v1688_v43 }
 0x16e   : > { %7905 = vst [vmem:[#allocation28_spill] sm:$0xff] %v6609_v35  ;;  %vm1693_vm2 = vcmp.lt.s32.totalorder %v1672_v53, 3  ;;  %vm1694_vm3 = vcmp.lt.s32.totalorder %v1672_v53, 4  ;;  %vm1692_vm7 = vcmp.lt.s32.totalorder %v1672_v53, 2  ;;  %v1695_v29 = vsel %vm1691_vm15, %v1675_v61, %v1678_v17 }
 0x16f   : > { %vm6614_vm1 = vcmp.le.f32.partialorder %v7906_v40, 0.7853982  ;;  %v1696_v6 = vsel %vm1694_vm3, %v1684_v15, 2102212464  ;;  %v1707_v36 = vshll.u32 %v1667_v18, 8  ;;  %v1699_v1 = vsel %vm1691_vm15, %v1678_v17, %v1681_v0 }
 0x170   : > { %v1697_v37 = vsel %vm1693_vm2, %v1681_v0, %v1696_v6  ;;  %v1700_v11 = vsel %vm1694_vm3, %v1687_v24, 920167782  ;;  %v1703_v25 = vsel %vm1691_vm15, %v1681_v0, %v1684_v15  ;;  %v1429_v13 = vor.u32 4788187, %v1428_v45 }
 0x171   : > { %v1524_v40 = vsel %vm4577_vm14, 0, %v4576_v7  ;;  %v1701_v51 = vsel %vm1693_vm2, %v1684_v15, %v1700_v11  ;;  %v1704_v43 = vsel %vm1694_vm3, %v1690_v9, 1326507024  ;;  %vm1238_vm8 = vcmp.lt.s32.totalorder %v6590_v60, 2 }
 0x172   : > { %v4579_v5 = vmin.u32 %v1622_v48, %v6597_v3  ;;  %v1702_v61 = vsel %vm1692_vm7, %v1699_v1, %v1701_v51  ;;  %v1705_v18 = vsel %vm1693_vm2, %v1687_v24, %v1704_v43  ;;  %v1766_v6 = vshrl.u32 %v1765_v34, 23 }
 0x173   : > { %v1698_v17 = vsel %vm1692_vm7, %v1695_v29, %v1697_v37  ;;  %v1706_v59 = vsel %vm1692_vm7, %v1703_v25, %v1705_v18  ;;  %v6631_v0 = vmul.u32.u64.low %v1707_v36, %v1702_v61  ;;  %v6632_v45 = vmul.u32.u64.high %v1707_v36, %v1702_v61, %v6631_v0 }
 0x174   : > { %v1333_v15 = vsub.s32 4, %v6262_v42  ;;  %v6636_v7 = vmul.u32.u64.low %v1707_v36, %v1706_v59  ;;  %v6637_v9 = vmul.u32.u64.high %v1707_v36, %v1706_v59, %v6636_v7  ;;  %v4586_v11 = vadd.s32 4294967169, %v1766_v6 }
 0x175   : > { %v7784_v48 = vxor.u32 2147483648, %v6609_v35  ;;  %v7783_v51 = vxor.u32 2147483648, %v6605_v2  ;;  %v1430_v24 = vand.u32 2147483647, %v1429_v13  ;;  %v1432_v34 = vcvt.s32.f32 %v6601_v44 }
 0x176   : > { %v1332_v53 = vsel %vm1249_vm12, %v1331_v23, %v6573_v31  ;;  %v1529_v29 = vsub.s32 4294967266, %v1524_v40  ;;  %v1714_v37 = vmul.u32 %v1707_v36, %v1698_v17  ;;  %v1772_v1 = vadd.s32 1, %v4586_v11 }
 0x177   : > { %v1509_v25 = vadd.s32 %v6400_v26, %v6406_v10  ;;  %v1525_v59 = vsub.s32 32, %v1524_v40  ;;  %v1624_v43 = vclz %v4579_v5  ;;  %v1717_v61 = vadd.s32 1, %v6632_v45 }
 0x178   : > { %v1244_v44 = vsel %vm1242_vm13, %v7783_v51, %v6609_v35  ;;  %v1334_v31 = vsel %vm1249_vm12, %v1333_v15, %v6262_v42  ;;  %vm1716_vm14 = vc.u32 %v6637_v9, %v6631_v0  ;;  %vm1773_vm15 = vcmp.gt.s32.totalorder %v1772_v1, 0 }
 0x179   : > { %v1241_v26 = vsel %vm1239_vm0, %v6605_v2, %v7784_v48  ;;  %v1335_v10 = vsel %vm6614_vm1, %v5656_v52, %v1332_v53  ;;  %v6666_v23 = vmul.f32 %v1432_v34, %v1430_v24  ;;  %v1718_v36 = vsel %vm1716_vm14, %v1717_v61, %v6632_v45 }
 0x17a   : > { %v1530_v13 = vadd.s32 127, %v1529_v29  ;;  %v1719_v42 = vadd.s32 %v1718_v36, %v1714_v37  ;;  %v7785_v5 = vand.u32 2147483647, %v7904_v41  ;;  %v1774_v18 = vsel %vm1773_vm15, %v1772_v1, 0 }
 0x17b   : > { %v6672_v6 = vsel %vm6614_vm1, 0, %v1334_v31  ;;  %v1526_v17 = vshll.u32 %v6508_v20, %v1524_v40  ;;  %v1527_v15 = vshrl.u32 %v1509_v25, %v1525_v59  ;;  %v4580_v7 = vadd.s32 4294967294, %v1624_v43 }
 0x17c   : > { %7909 = vst [vmem:[#allocation52_spill] sm:$0xff] %v6672_v6  ;;  %4865 = vcosq.f32 %v1335_v10  ;;  %v6676_v11 = vand.u32 3, %v6672_v6  ;;  %v1720_v24 = vadd.s32 536870912, %v1719_v42  ;;  %v1776_v34 = vand.u32 31, %v1774_v18 }
 0x17d   : > { %v6680_v45 = vsel %vm1238_vm8, %v1241_v26, %v1244_v44  ;;  %4867 = vsinq.f32 %v1335_v10  ;;  %v1531_v29 = vshll.u32 %v1530_v13, 23  ;;  %v1769_v20 = vand.u32 8388607, %v7785_v5 }
 0x17e   : > { %v6684_v37 = vshrl.u32 %v1720_v24, 30  ;;  %v1777_v40 = vsub.s32 32, %v1776_v34  ;;  %v6688_v1 = vor.u32 %v1527_v15, %v1526_v17  ;;  %vm4581_vm12 = vcmp.lt.s32.totalorder %v4580_v7, 0 }
 0x17f   : > { %v1775_v25 = vshrl.u32 %v1774_v18, 5  ;;  %v1779_v60 = vshll.u32 %v7854_v22, %v1776_v34  ;;  %v1782_v61 = vshll.u32 %v7863_v28, %v1776_v34  ;;  %v1788_v44 = vshll.u32 %v7848_v4, %v1776_v34 }
 0x180   : > { %v1722_v59 = vshll.u32 %v6684_v37, 30  ;;  %v1780_v43 = vshrl.u32 %v7863_v28, %v1777_v40  ;;  %v1783_v31 = vshrl.u32 %v7849_v54, %v1777_v40  ;;  %v1785_v26 = vshll.u32 %v7849_v54, %v1776_v34 }
 0x181   : > { %v1786_v10 = vshrl.u32 %v7848_v4, %v1777_v40  ;;  %v1789_v36 = vshrl.u32 %v7850_v32, %v1777_v40  ;;  %vm1352_vm13 = vcmp.lt.s32.totalorder %v5659_v55, 0  ;;  %v1532_v13 = vor.u32 4788187, %v1531_v29 }
 0x182   : > { %v1612_v18 = vadd.s32 %v6516_v47, %v6526_v50  ;;  %v6702_v17 = vsub.s32 %v1719_v42, %v1722_v59  ;;  %v1770_v15 = vor.u32 8388608, %v1769_v20  ;;  %v1535_v24 = vcvt.s32.f32 %v6688_v1 }
 0x183   : > { %v6706_v51 = vsel %vm4581_vm12, 0, %v4580_v7  ;;  %v1778_v48 = vshrl.u32 %v7854_v22, %v1777_v40  ;;  %v1791_v5 = vshll.u32 %v7850_v32, %v1776_v34  ;;  %v1781_v53 = vor.u32 %v1780_v43, %v1779_v60  ;;  %v7913_v43 = vld [vmem:[#allocation29_spill] sm:$0xff] }
 0x184   : > { %v1725_v56 = vsub.s32 0, %v6702_v17  ;;  %v1784_v2 = vor.u32 %v1783_v31, %v1782_v61  ;;  %v1790_v29 = vor.u32 %v1789_v36, %v1788_v44  ;;  %v1787_v35 = vor.u32 %v1786_v10, %v1785_v26  ;;  %v7914_v44 = vld [vmem:[#allocation26_spill] sm:$0xff] }
 0x185   : > { %v1792_v47 = vshrl.u32 %v7843_v38, %v1777_v40  ;;  %vm1794_vm0 = vcmp.lt.s32.totalorder %v1775_v25, 1  ;;  %vm1797_vm1 = vcmp.lt.s32.totalorder %v1775_v25, 4  ;;  %v7910_v42 = vand.u32 2147483647, %v5659_v55 }
 0x186   : > { %v6712_v50 = vpop.eup %4865  ;;  %v1533_v20 = vand.u32 2147483647, %v1532_v13  ;;  %v1632_v34 = vsub.s32 4294967266, %v6706_v51  ;;  %vm1796_vm3 = vcmp.lt.s32.totalorder %v1775_v25, 3  ;;  %v1810_v1 = vshll.u32 %v1770_v15, 8 }
 0x187   : > { %vm6716_vm2 = vcmp.le.f32.partialorder %v7910_v42, 0.7853982  ;;  %v6721_v60 = vpop.eup %4867  ;;  %vm7805_vm7 = vweird.f32 %v5652_v63  ;;  %v1793_v40 = vor.u32 %v1792_v47, %v1791_v5  ;;  %vm1795_vm8 = vcmp.lt.s32.totalorder %v1775_v25, 2 }
 0x188   : > { %v1799_v59 = vsel %vm1797_vm1, %v1787_v35, 2102212464  ;;  %v1868_v61 = vand.u32 2139095040, %v7913_v43  ;;  %vm1455_vm14 = vcmp.lt.s32.totalorder %v7914_v44, 0  ;;  %v4583_v31 = vmin.u32 %v1725_v56, %v6702_v17 }
 0x189   : > { %v1798_v26 = vsel %vm1794_vm0, %v1778_v48, %v1781_v53  ;;  %v1802_v10 = vsel %vm1794_vm0, %v1781_v53, %v1784_v2  ;;  %v1803_v36 = vsel %vm1797_vm1, %v1790_v29, 920167782  ;;  %v1800_v13 = vsel %vm1796_vm3, %v1784_v2, %v1799_v59 }
 0x18a   : > { %v1804_v15 = vsel %vm1796_vm3, %v1787_v35, %v1803_v36  ;;  %v1806_v5 = vsel %vm1794_vm0, %v1784_v2, %v1787_v35  ;;  %v1807_v47 = vsel %vm1797_vm1, %v1793_v40, 1326507024  ;;  %v1628_v42 = vsub.s32 32, %v6706_v51 }
 0x18b   : > { %v1633_v12 = vadd.s32 127, %v1632_v34  ;;  %v1805_v49 = vsel %vm1795_vm8, %v1802_v10, %v1804_v15  ;;  %v1808_v56 = vsel %vm1796_vm3, %v1790_v29, %v1807_v47  ;;  %v1869_v59 = vshrl.u32 %v1868_v61, 23 }
 0x18c   : > { %v1809_v48 = vsel %vm1795_vm8, %v1806_v5, %v1808_v56  ;;  %v6739_v53 = vmul.u32.u64.low %v1810_v1, %v1805_v49  ;;  %v6740_v62 = vmul.u32.u64.high %v1810_v1, %v1805_v49, %v6739_v53  ;;  %v7915_v36 = vand.u32 2147483647, %v7914_v44 }
 0x18d   : > { %v1727_v35 = vclz %v4583_v31  ;;  %v1801_v34 = vsel %vm1795_vm8, %v1798_v26, %v1800_v13  ;;  %v6750_v40 = vmul.u32.u64.low %v1810_v1, %v1809_v48  ;;  %v6751_v10 = vmul.u32.u64.high %v1810_v1, %v1809_v48, %v6750_v40 }
 0x18e   : > { %vm6745_vm15 = vcmp.le.f32.partialorder %v7915_v36, 0.7853982  ;;  %v7918_v29 = vxor.u32 2147483648, %v6666_v23  ;;  %v7919_v61 = vsub.s32 4, %v6393_v30  ;;  %v1539_v5 = vsub.s32 4, %v6479_v14 }
 0x18f   : > { %v4590_v31 = vadd.s32 4294967169, %v1869_v59  ;;  %v1536_v25 = vmul.f32 %v1535_v24, %v1533_v20  ;;  %v1629_v26 = vshll.u32 %v6597_v3, %v6706_v51  ;;  %v1630_v13 = vshrl.u32 %v1612_v18, %v1628_v42 }
 0x190   : > { %v1435_v49 = vsel %vm1352_vm13, %v7918_v29, %v6666_v23  ;;  %v1437_v15 = vsel %vm1352_vm13, %v7919_v61, %v6393_v30  ;;  %v1634_v47 = vshll.u32 %v1633_v12, 23  ;;  %vm1345_vm12 = vcmp.eq.s32.totalorder %v6676_v11, 2 }
 0x191   : > { %v1817_v56 = vmul.u32 %v1810_v1, %v1801_v34  ;;  %v1820_v23 = vadd.s32 1, %v6740_v62  ;;  %v1875_v48 = vadd.s32 1, %v4590_v31  ;;  %v6771_v36 = vsel %vm7805_vm7, nan, %v6680_v45 }
 0x192   : > { %7920 = vst [vmem:[#allocation29_spill] sm:$0xff] %v6771_v36  ;;  %v7796_v30 = vxor.u32 2147483648, %v6712_v50  ;;  %v6776_v24 = vsel %vm6716_vm2, 0, %v1437_v15  ;;  %v4584_v3 = vadd.s32 4294967294, %v1727_v35  ;;  %v1438_v12 = vsel %vm6716_vm2, %v5659_v55, %v1435_v49 }
 0x193   : > { %7921 = vst [vmem:[#allocation26_spill] sm:$0xff] %v6776_v24  ;;  %v1540_v51 = vsel %vm1455_vm14, %v1539_v5, %v6479_v14  ;;  %vm1819_vm13 = vc.u32 %v6751_v10, %v6739_v53  ;;  %vm1876_vm0 = vcmp.gt.s32.totalorder %v1875_v48, 0  ;;  %v1537_v45 = vxor.u32 2147483648, %v1536_v25 }
 0x194   : > { %v6786_v18 = vor.u32 %v1630_v13, %v1629_v26  ;;  %v6788_v20 = vor.u32 4788187, %v1634_v47  ;;  %v1821_v1 = vsel %vm1819_vm13, %v1820_v23, %v6740_v62  ;;  %v6792_v42 = vand.u32 3, %v6776_v24 }
 0x195   : > { %v1822_v7 = vadd.s32 %v1821_v1, %v1817_v56  ;;  %v7797_v59 = vand.u32 2147483647, %v7913_v43  ;;  %v1877_v35 = vsel %vm1876_vm0, %v1875_v48, 0  ;;  %v6801_v34 = vsel %vm1345_vm12, %v7796_v30, %v6721_v60  ;;  %v7922_v48 = vld [vmem:[#allocation32_spill] sm:$0xff] }
 0x196   : > { %4869 = vcosq.f32 %v1438_v12  ;;  %vm4585_vm1 = vcmp.lt.s32.totalorder %v4584_v3, 0  ;;  %v6805_v62 = vsel %vm6745_vm15, 0, %v1540_v51  ;;  %v1879_v29 = vand.u32 31, %v1877_v35 }
 0x197   : > { %4871 = vsinq.f32 %v1438_v12  ;;  %v1823_v40 = vadd.s32 536870912, %v1822_v7  ;;  %v6809_v49 = vsel %vm1455_vm14, %v1537_v45, %v1536_v25  ;;  %v1715_v5 = vadd.s32 %v6631_v0, %v6637_v9 }
 0x198   : > { %v6815_v31 = vsel %vm4585_vm1, 0, %v4584_v3  ;;  %v1872_v13 = vand.u32 8388607, %v7797_v59  ;;  %v1880_v47 = vsub.s32 32, %v1879_v29  ;;  %v1878_v56 = vshrl.u32 %v1877_v35, 5 }
 0x199   : > { %v6817_v26 = vshrl.u32 %v1823_v40, 30  ;;  %v1882_v23 = vshll.u32 %v7854_v22, %v1879_v29  ;;  %v1885_v25 = vshll.u32 %v7863_v28, %v1879_v29  ;;  %v1971_v12 = vand.u32 2139095040, %v7922_v48 }
 0x19a   : > { %v1883_v45 = vshrl.u32 %v7863_v28, %v1880_v47  ;;  %v1888_v0 = vshll.u32 %v7849_v54, %v1879_v29  ;;  %v1891_v9 = vshll.u32 %v7848_v4, %v1879_v29  ;;  %v1886_v3 = vshrl.u32 %v7849_v54, %v1880_v47 }
 0x19b   : > { %v1825_v51 = vshll.u32 %v6817_v26, 30  ;;  %v1889_v1 = vshrl.u32 %v7848_v4, %v1880_v47  ;;  %v1892_v35 = vshrl.u32 %v7850_v32, %v1880_v47  ;;  %v1894_v40 = vshll.u32 %v7850_v32, %v1879_v29 }
 0x19c   : > { %vm1342_vm2 = vcmp.eq.s32.totalorder %v6676_v11, 0  ;;  %v1731_v30 = vsub.s32 32, %v6815_v31  ;;  %v1873_v15 = vor.u32 8388608, %v1872_v13  ;;  %v1895_v61 = vshrl.u32 %v7843_v38, %v1880_v47 }
 0x19d   : > { %v6834_v59 = vsub.s32 %v1822_v7, %v1825_v51  ;;  %v1735_v14 = vsub.s32 4294967266, %v6815_v31  ;;  %v1884_v36 = vor.u32 %v1883_v45, %v1882_v23  ;;  %v1887_v63 = vor.u32 %v1886_v3, %v1885_v25 }
 0x19e   : > { %vm1897_vm3 = vcmp.lt.s32.totalorder %v1878_v56, 1  ;;  %v1881_v24 = vshrl.u32 %v7854_v22, %v1880_v47  ;;  %v1890_v6 = vor.u32 %v1889_v1, %v1888_v0  ;;  %v1893_v29 = vor.u32 %v1892_v35, %v1891_v9 }
 0x19f   : > { %v1828_v8 = vsub.s32 0, %v6834_v59  ;;  %v1896_v39 = vor.u32 %v1895_v61, %v1894_v40  ;;  %vm1899_vm8 = vcmp.lt.s32.totalorder %v1878_v56, 3  ;;  %vm1900_vm14 = vcmp.lt.s32.totalorder %v1878_v56, 4 }
 0x1a0   : > { %v6840_v58 = vpop.eup %4869  ;;  %v1972_v7 = vshrl.u32 %v1971_v12, 23  ;;  %v1732_v51 = vshll.u32 %v6702_v17, %v6815_v31  ;;  %vm1898_vm12 = vcmp.lt.s32.totalorder %v1878_v56, 2  ;;  %v1913_v25 = vshll.u32 %v1873_v15, 8 }
 0x1a1   : > { %v6842_v13 = vpop.eup %4871  ;;  %v4587_v23 = vmin.u32 %v1828_v8, %v6834_v59  ;;  %v1736_v45 = vadd.s32 127, %v1735_v14  ;;  %v1902_v47 = vsel %vm1900_vm14, %v1890_v6, 2102212464  ;;  %v1905_v0 = vsel %vm1897_vm3, %v1884_v36, %v1887_v63 }
 0x1a2   : > { %v1906_v9 = vsel %vm1900_vm14, %v1893_v29, 920167782  ;;  %v1901_v3 = vsel %vm1897_vm3, %v1881_v24, %v1884_v36  ;;  %v1909_v1 = vsel %vm1897_vm3, %v1887_v63, %v1890_v6  ;;  %vm1558_vm13 = vcmp.lt.s32.totalorder %v5698_v33, 0 }
 0x1a3   : > { %v1830_v61 = vclz %v4587_v23  ;;  %v1907_v12 = vsel %vm1899_vm8, %v1890_v6, %v1906_v9  ;;  %v1903_v8 = vsel %vm1899_vm8, %v1887_v63, %v1902_v47  ;;  %v1910_v14 = vsel %vm1900_vm14, %v1896_v39, 1326507024 }
 0x1a4   : > { %v1908_v17 = vsel %vm1898_vm12, %v1905_v0, %v1907_v12  ;;  %v4594_v15 = vadd.s32 4294967169, %v1972_v7  ;;  %v1911_v35 = vsel %vm1899_vm8, %v1893_v29, %v1910_v14  ;;  %v1733_v36 = vshrl.u32 %v1715_v5, %v1731_v30 }
 0x1a5   : > { %v4588_v31 = vadd.s32 4294967294, %v1830_v61  ;;  %v6858_v40 = vmul.u32.u64.low %v1913_v25, %v1908_v17  ;;  %v6859_v23 = vmul.u32.u64.high %v1913_v25, %v1908_v17, %v6858_v40  ;;  %v1737_v24 = vshll.u32 %v1736_v45, 23 }
 0x1a6   : > { %v1912_v6 = vsel %vm1898_vm12, %v1909_v1, %v1911_v35  ;;  %v1978_v9 = vadd.s32 1, %v4594_v15  ;;  %v1904_v63 = vsel %vm1898_vm12, %v1901_v3, %v1903_v8  ;;  %v7923_v39 = vxor.u32 2147483648, %v6721_v60 }
 0x1a7   : > { %vm4589_vm0 = vcmp.lt.s32.totalorder %v4588_v31, 0  ;;  %v6864_v47 = vmul.u32.u64.low %v1913_v25, %v1912_v6  ;;  %v6865_v0 = vmul.u32.u64.high %v1913_v25, %v1912_v6, %v6864_v47  ;;  %v6875_v7 = vand.u32 3, %v6805_v62 }
 0x1a8   : > { %v6872_v29 = vsel %vm1342_vm2, %v6712_v50, %v7923_v39  ;;  %v1833_v30 = vsel %vm4589_vm0, 0, %v4588_v31  ;;  %vm1979_vm1 = vcmp.gt.s32.totalorder %v1978_v9, 0  ;;  %v1541_v5 = vsel %vm6745_vm15, %v7914_v44, %v6809_v49 }
 0x1a9   : > { %v1642_v56 = vsub.s32 4, %v6575_v57  ;;  %v1838_v45 = vsub.s32 4294967266, %v1833_v30  ;;  %v1923_v61 = vadd.s32 1, %v6859_v23  ;;  %v7924_v3 = vand.u32 2147483647, %v6788_v20 }
 0x1aa   : > { %v7925_v12 = vcvt.s32.f32 %v6786_v18  ;;  %v1734_v8 = vor.u32 %v1733_v36, %v1732_v51  ;;  %v1920_v17 = vmul.u32 %v1913_v25, %v1904_v63  ;;  %v1980_v14 = vsel %vm1979_vm1, %v1978_v9, 0 }
 0x1ab   : > { %v1738_v15 = vor.u32 4788187, %v1737_v24  ;;  %v1818_v31 = vadd.s32 %v6739_v53, %v6751_v10  ;;  %v1834_v35 = vsub.s32 32, %v1833_v30  ;;  %v7804_v2 = vand.u32 2147483647, %v7922_v48 }
 0x1ac   : > { %v1639_v1 = vmul.f32 %v7925_v12, %v7924_v3  ;;  %v7926_v6 = vand.u32 2147483647, %v5698_v33  ;;  %v1839_v18 = vadd.s32 127, %v1838_v45  ;;  %vm1922_vm2 = vc.u32 %v6865_v0, %v6858_v40 }
 0x1ad   : > { %v1982_v20 = vand.u32 31, %v1980_v14  ;;  %4873 = vcosq.f32 %v1541_v5  ;;  %v6903_v53 = vsel %vm1558_vm13, %v1642_v56, %v6575_v57  ;;  %v1924_v10 = vsel %vm1922_vm2, %v1923_v61, %v6859_v23 }
 0x1ae   : > { %vm6893_vm15 = vcmp.le.f32.partialorder %v7926_v6, 0.7853982  ;;  %v1640_v25 = vxor.u32 2147483648, %v1639_v1  ;;  %v1741_v36 = vcvt.s32.f32 %v1734_v8  ;;  %v1925_v24 = vadd.s32 %v1924_v10, %v1920_v17 }
 0x1af   : > { %v1983_v9 = vsub.s32 32, %v1982_v20  ;;  %v1739_v63 = vand.u32 2147483647, %v1738_v15  ;;  %v1835_v39 = vshll.u32 %v6834_v59, %v1833_v30  ;;  %v1836_v45 = vshrl.u32 %v1818_v31, %v1834_v35 }
 0x1b0   : > { %v1975_v3 = vand.u32 8388607, %v7804_v2  ;;  %v1840_v12 = vshll.u32 %v1839_v18, 23  ;;  %v1926_v6 = vadd.s32 536870912, %v1925_v24  ;;  %v6909_v49 = vshrl.u32 %v1980_v14, 5 }
 0x1b1   : > { %v1985_v57 = vshll.u32 %v7854_v22, %v1982_v20  ;;  %v1986_v56 = vshrl.u32 %v7863_v28, %v1983_v9  ;;  %v1988_v23 = vshll.u32 %v7863_v28, %v1982_v20  ;;  %v1989_v61 = vshrl.u32 %v7849_v54, %v1983_v9 }
 0x1b2   : > { %v1991_v8 = vshll.u32 %v7849_v54, %v1982_v20  ;;  %v6916_v17 = vshrl.u32 %v1926_v6, 30  ;;  %v1992_v59 = vshrl.u32 %v7848_v4, %v1983_v9  ;;  %v1994_v30 = vshll.u32 %v7848_v4, %v1982_v20  ;;  %v7955_v4 = vld [vmem:[#allocation47_spill] sm:$0xff] }
 0x1b3   : > { %v1995_v15 = vshrl.u32 %v7850_v32, %v1983_v9  ;;  %v1641_v14 = vsel %vm1558_vm13, %v1640_v25, %v1639_v1  ;;  %v1742_v31 = vmul.f32 %v1741_v36, %v1739_v63  ;;  %v1976_v35 = vor.u32 8388608, %v1975_v3 }
 0x1b4   : > { %v1997_v18 = vshll.u32 %v7850_v32, %v1982_v20  ;;  %vm1341_vm3 = vcmp.lt.s32.totalorder %v6676_v11, 2  ;;  %vm1661_vm8 = vcmp.lt.s32.totalorder %v7899_v21, 0  ;;  %v1837_v10 = vor.u32 %v1836_v45, %v1835_v39 }
 0x1b5   : > { %v1841_v6 = vor.u32 4788187, %v1840_v12  ;;  %v1928_v2 = vshll.u32 %v6916_v17, 30  ;;  %v1998_v51 = vshrl.u32 %v7843_v38, %v1983_v9  ;;  %vm1445_vm14 = vcmp.eq.s32.totalorder %v6792_v42, 0 }
 0x1b6   : > { %vm1448_vm12 = vcmp.eq.s32.totalorder %v6792_v42, 2  ;;  %v1984_v1 = vshrl.u32 %v7854_v22, %v1983_v9  ;;  %v1987_v25 = vor.u32 %v1986_v56, %v1985_v57  ;;  %v1990_v36 = vor.u32 %v1989_v61, %v1988_v23  ;;  %v7954_v22 = vld [vmem:[#allocation44_spill] sm:$0xff] }
 0x1b7   : > { %v1996_v63 = vor.u32 %v1995_v15, %v1994_v30  ;;  %v6931_v20 = vsub.s32 %v1925_v24, %v1928_v2  ;;  %v1993_v3 = vor.u32 %v1992_v59, %v1991_v8  ;;  %vm2000_vm13 = vcmp.lt.s32.totalorder %v6909_v49, 1  ;;  %v6935_v39 = vpop.eup %4873 }
 0x1b8   : > { %vm2003_vm0 = vcmp.lt.s32.totalorder %v6909_v49, 4  ;;  %4875 = vsinq.f32 %v1541_v5  ;;  %v1644_v45 = vsel %vm6893_vm15, %v5698_v33, %v1641_v14  ;;  %v7929_v12 = vand.u32 2147483647, %v7899_v21 }
 0x1b9   : > { %v1999_v2 = vor.u32 %v1998_v51, %v1997_v18  ;;  %v6946_v24 = vshll.u32 %v1976_v35, 8  ;;  %v1844_v57 = vcvt.s32.f32 %v1837_v10  ;;  %v1931_v56 = vsub.s32 0, %v6931_v20 }
 0x1ba   : > { %vm6942_vm1 = vcmp.le.f32.partialorder %v7929_v12, 0.7853982  ;;  %vm2002_vm2 = vcmp.lt.s32.totalorder %v6909_v49, 3  ;;  %v2005_v5 = vsel %vm2003_vm0, %v1993_v3, 2102212464  ;;  %vm1444_vm7 = vcmp.lt.s32.totalorder %v6792_v42, 2 }
 0x1bb   : > { %v1842_v23 = vand.u32 2147483647, %v1841_v6  ;;  %vm2001_vm5 = vcmp.lt.s32.totalorder %v6909_v49, 2  ;;  %v2008_v61 = vsel %vm2000_vm13, %v1987_v25, %v1990_v36  ;;  %v2009_v51 = vsel %vm2003_vm0, %v1996_v63, 920167782 }
 0x1bc   : > { %4877 = vcosq.f32 %v1644_v45  ;;  %v1743_v8 = vxor.u32 2147483648, %v1742_v31  ;;  %v4591_v59 = vmin.u32 %v1931_v56, %v6931_v20  ;;  %v2004_v30 = vsel %vm2000_vm13, %v1984_v1, %v1987_v25 }
 0x1bd   : > { %v2006_v15 = vsel %vm2002_vm2, %v1990_v36, %v2005_v5  ;;  %v2010_v14 = vsel %vm2002_vm2, %v1993_v3, %v2009_v51  ;;  %v2012_v35 = vsel %vm2000_vm13, %v1990_v36, %v1993_v3  ;;  %v2013_v18 = vsel %vm2003_vm0, %v1999_v2, 1326507024 }
 0x1be   : > { %4879 = vsinq.f32 %v1644_v45  ;;  %v1933_v10 = vclz %v4591_v59  ;;  %v2011_v6 = vsel %vm2001_vm5, %v2008_v61, %v2010_v14  ;;  %v2014_v1 = vsel %vm2002_vm2, %v1996_v63, %v2013_v18 }
 0x1bf   : > { %v1845_v25 = vmul.f32 %v1844_v57, %v1842_v23  ;;  %v2015_v12 = vsel %vm2001_vm5, %v2012_v35, %v2014_v1  ;;  %v6976_v56 = vmul.u32.u64.low %v6946_v24, %v2011_v6  ;;  %v6977_v5 = vmul.u32.u64.high %v6946_v24, %v2011_v6, %v6976_v56  ;;  %v7948_v6 = vld [vmem:[#allocation34_spill] sm:$0xff] }
 0x1c0   : > { %v4592_v36 = vadd.s32 4294967294, %v1933_v10  ;;  %v2007_v3 = vsel %vm2001_vm5, %v2004_v30, %v2006_v15  ;;  %v6983_v45 = vmul.u32.u64.low %v6946_v24, %v2015_v12  ;;  %v6984_v2 = vmul.u32.u64.high %v6946_v24, %v2015_v12, %v6983_v45 }
 0x1c1   : > { %v1348_v63 = vsel %vm1341_vm3, %v6872_v29, %v6801_v34  ;;  %vm1548_vm13 = vcmp.eq.s32.totalorder %v6875_v7, 0  ;;  %vm1551_vm0 = vcmp.eq.s32.totalorder %v6875_v7, 2  ;;  %v1744_v57 = vsel %vm1661_vm8, %v1743_v8, %v1742_v31 }
 0x1c2   : > { %v7932_v23 = vxor.u32 2147483648, %v6842_v13  ;;  %v7933_v61 = vxor.u32 2147483648, %v6840_v58  ;;  %v7007_v34 = vsel %vm6893_vm15, 0, %v6903_v53  ;;  %vm4593_vm5 = vcmp.lt.s32.totalorder %v4592_v36, 0  ;;  %v7009_v29 = vpop.eup %4875 }
 0x1c3   : > { %v1649_v31 = vand.u32 3, %v7007_v34  ;;  %v1936_v51 = vsel %vm4593_vm5, 0, %v4592_v36  ;;  %v2023_v8 = vmul.u32 %v6946_v24, %v2007_v3  ;;  %v2026_v59 = vadd.s32 1, %v6977_v5 }
 0x1c4   : > { %v1447_v49 = vsel %vm1445_vm14, %v6840_v58, %v7932_v23  ;;  %v1450_v11 = vsel %vm1448_vm12, %v7933_v61, %v6842_v13  ;;  %vm1547_vm3 = vcmp.lt.s32.totalorder %v6875_v7, 2  ;;  %v1745_v30 = vsub.s32 4, %v6684_v37 }
 0x1c5   : > { %v1747_v47 = vsel %vm6942_vm1, %v7899_v21, %v1744_v57  ;;  %v1846_v53 = vxor.u32 2147483648, %v1845_v25  ;;  %v1941_v15 = vsub.s32 4294967266, %v1936_v51  ;;  %vm1339_vm15 = vweird.f32 %v5656_v52 }
 0x1c6   : > { %vm7824_vm14 = vweird.f32 %v5659_v55  ;;  %vm1764_vm12 = vcmp.lt.s32.totalorder %v7904_v41, 0  ;;  %v1921_v24 = vadd.s32 %v6858_v40, %v6865_v0  ;;  %v1937_v14 = vsub.s32 32, %v1936_v51  ;;  %v7026_v35 = vpop.eup %4877 }
 0x1c7   : > { %vm2025_vm2 = vc.u32 %v6984_v2, %v6976_v56  ;;  %v1451_v18 = vsel %vm1444_vm7, %v1447_v49, %v1450_v11  ;;  %v7934_v10 = vand.u32 2147483647, %v7904_v41  ;;  %v1942_v1 = vadd.s32 127, %v1941_v15 }
 0x1c8   : > { %v2027_v12 = vsel %vm2025_vm2, %v2026_v59, %v6977_v5  ;;  %v7811_v40 = vxor.u32 2147483648, %v6935_v39  ;;  %vm1654_vm4 = vcmp.eq.s32.totalorder %v1649_v31, 2  ;;  %4881 = vcosq.f32 %v1747_v47  ;;  %v7038_v36 = vpop.eup %4879 }
 0x1c9   : > { %vm7032_vm5 = vcmp.le.f32.partialorder %v7934_v10, 0.7853982  ;;  %v2028_v0 = vadd.s32 %v2027_v12, %v2023_v8  ;;  %v7814_v3 = vxor.u32 2147483648, %v7009_v29  ;;  %v1746_v42 = vsel %vm1661_vm8, %v1745_v30, %v6684_v37 }
 0x1ca   : > { %4883 = vsinq.f32 %v1747_v47  ;;  %v1847_v45 = vsel %vm1764_vm12, %v1846_v53, %v1845_v25  ;;  %vm7823_vm7 = vweird.f32 %v7914_v44  ;;  %v1938_v5 = vshll.u32 %v6931_v20, %v1936_v51  ;;  %v7937_v47 = vld [vmem:[#allocation30_spill] sm:$0xff] }
 0x1cb   : > { %v1939_v57 = vshrl.u32 %v1921_v24, %v1937_v14  ;;  %v1943_v23 = vshll.u32 %v1942_v1, 23  ;;  %v2029_v49 = vadd.s32 536870912, %v2028_v0  ;;  %v1553_v61 = vsel %vm1551_vm0, %v7811_v40, %v7009_v29 }
 0x1cc   : > { %vm7822_vm2 = vweird.f32 %v5698_v33  ;;  %vm1650_vm8 = vcmp.lt.s32.totalorder %v1649_v31, 2  ;;  %vm1651_vm11 = vcmp.eq.s32.totalorder %v1649_v31, 0  ;;  %v7809_v37 = vxor.u32 2147483648, %v7026_v35 }
 0x1cd   : > { %v1550_v20 = vsel %vm1548_vm13, %v6935_v39, %v7814_v3  ;;  %v7810_v25 = vxor.u32 2147483648, %v7038_v36  ;;  %v1848_v11 = vsub.s32 4, %v6817_v26  ;;  %v7062_v51 = vshrl.u32 %v2029_v49, 30 }
 0x1ce   : > { %v1656_v8 = vsel %vm1654_vm4, %v7809_v37, %v7038_v36  ;;  %v7070_v59 = vsel %vm6942_vm1, 0, %v1746_v42  ;;  %v1850_v30 = vsel %vm7032_vm5, %v7904_v41, %v1847_v45  ;;  %v2180_v53 = vadd.s32 3, %v7937_v47 }
 0x1cf   : > { %v1653_v15 = vsel %vm1651_vm11, %v7026_v35, %v7810_v25  ;;  %v1940_v24 = vor.u32 %v1939_v57, %v1938_v5  ;;  %v1944_v14 = vor.u32 4788187, %v1943_v23  ;;  %v2031_v10 = vshll.u32 %v7062_v51, 30 }
 0x1d0   : > { %v7082_v1 = vsel %vm1339_vm15, nan, %v1348_v63  ;;  %v7086_v9 = vsel %vm7824_vm14, nan, %v1451_v18  ;;  %v7089_v12 = vand.u32 3, %v7070_v59  ;;  %vm1867_vm4 = vcmp.lt.s32.totalorder %v7913_v43, 0 }
 0x1d1   : > { %7938 = vst [vmem:[#allocation32_spill] sm:$0xff] %v7082_v1  ;;  %7939 = vst [vmem:[#allocation30_spill] sm:$0xff] %v7086_v9  ;;  %v1554_v42 = vsel %vm1547_vm3, %v1550_v20, %v1553_v61  ;;  %v1849_v45 = vsel %vm1764_vm12, %v1848_v11, %v6817_v26  ;;  %4885 = vcosq.f32 %v1850_v30  ;;  %v7097_v5 = vsub.s32 %v2028_v0, %v2031_v10  ;;  %v7971_v9 = vld [vmem:[#allocation43_spill] sm:$0xff] }
 0x1d2   : > { %v1657_v63 = vsel %vm1650_vm8, %v1653_v15, %v1656_v8  ;;  %4887 = vsinq.f32 %v1850_v30  ;;  %v7940_v18 = vand.u32 2147483647, %v7913_v43  ;;  %v2181_v23 = vand.u32 3, %v2180_v53  ;;  %v7106_v49 = vpop.eup %4881  ;;  %v7944_v8 = vld [vmem:[#allocation31_spill] sm:$0xff] }
 0x1d3   : > { %v1945_v7 = vand.u32 2147483647, %v1944_v14  ;;  %v1947_v61 = vcvt.s32.f32 %v1940_v24  ;;  %v1951_v20 = vsub.s32 4, %v6916_v17  ;;  %v2034_v26 = vsub.s32 0, %v7097_v5  ;;  %v7946_v24 = vld [vmem:[#allocation36_spill] sm:$0xff]  ;;  %v7947_v14 = vld [vmem:[#allocation35_spill] sm:$0xff] }
 0x1d4   : > { %vm7102_vm11 = vcmp.le.f32.partialorder %v7940_v18, 0.7853982  ;;  %v7110_v0 = vpop.eup %4883  ;;  %v7114_v31 = vsel %vm7823_vm7, nan, %v1554_v42  ;;  %vm1754_vm1 = vcmp.eq.s32.totalorder %v7089_v12, 0  ;;  %v7119_v11 = vsel %vm7032_vm5, 0, %v1849_v45 }
 0x1d5   : > { %7943 = vst [vmem:[#allocation53_spill] sm:$0xff] %v7114_v31  ;;  %v2284_v30 = vadd.s32 3, %v7944_v8  ;;  %v7124_v47 = vsel %vm7822_vm2, nan, %v1657_v63  ;;  %vm1757_vm13 = vcmp.eq.s32.totalorder %v7089_v12, 2  ;;  %v7128_v53 = vand.u32 3, %v7119_v11  ;;  %v7970_v31 = vld [vmem:[#allocation26_spill] sm:$0xff] }
 0x1d6   : > { %7945 = vst [vmem:[#allocation31_spill] sm:$0xff] %v7124_v47  ;;  %v4595_v15 = vmin.u32 %v2034_v26, %v7097_v5  ;;  %vm2183_vm0 = vcmp.eq.s32.totalorder %v2181_v23, 0  ;;  %vm2186_vm3 = vcmp.eq.s32.totalorder %v2181_v23, 2  ;;  %v1948_v10 = vmul.f32 %v1947_v61, %v1945_v7  ;;  %v7950_v7 = vld [vmem:[#allocation33_spill] sm:$0xff] }
 0x1d7   : > { %v1952_v42 = vsel %vm1867_vm4, %v1951_v20, %v6916_v17  ;;  %v7813_v18 = vxor.u32 2147483648, %v7110_v0  ;;  %v7812_v26 = vxor.u32 2147483648, %v7106_v49  ;;  %v2285_v8 = vand.u32 3, %v2284_v30  ;;  %v7952_v30 = vld [vmem:[#allocation39_spill] sm:$0xff] }
 0x1d8   : > { %v2036_v45 = vclz %v4595_v15  ;;  %v2492_v37 = vadd.s32 3, %v7947_v14  ;;  %vm2182_vm12 = vcmp.lt.s32.totalorder %v2181_v23, 2  ;;  %v7949_v40 = vxor.u32 2147483648, %v7948_v6 }
 0x1d9   : > { %v7951_v17 = vxor.u32 2147483648, %v7950_v7  ;;  %v7154_v15 = vsel %vm1754_vm1, %v7106_v49, %v7813_v18  ;;  %v7161_v23 = vsel %vm1757_vm13, %v7812_v26, %v7110_v0  ;;  %v2596_v14 = vadd.s32 3, %v7952_v30 }
 0x1da   : > { %v4596_v25 = vadd.s32 4294967294, %v2036_v45  ;;  %v2185_v61 = vsel %vm2183_vm0, %v7950_v7, %v7949_v40  ;;  %v7165_v40 = vsel %vm7102_vm11, 0, %v1952_v42  ;;  %v1949_v45 = vxor.u32 2147483648, %v1948_v10 }
 0x1db   : > { %v2188_v20 = vsel %vm2186_vm3, %v7951_v17, %v7948_v6  ;;  %v7168_v6 = vpop.eup %4885  ;;  %v7171_v7 = vand.u32 3, %v7165_v40  ;;  %v2024_v17 = vadd.s32 %v6976_v56, %v6984_v2  ;;  %vm2287_vm8 = vcmp.eq.s32.totalorder %v2285_v8, 0  ;;  %v7962_v56 = vld [vmem:[#allocation52_spill] sm:$0xff] }
 0x1dc   : > { %vm4597_vm5 = vcmp.lt.s32.totalorder %v4596_v25, 0  ;;  %v7175_v63 = vpop.eup %4887  ;;  %v2189_v18 = vsel %vm2182_vm12, %v2185_v61, %v2188_v20  ;;  %vm2290_vm1 = vcmp.eq.s32.totalorder %v2285_v8, 2  ;;  %v2493_v54 = vand.u32 3, %v2492_v37  ;;  %v7957_v37 = vld [vmem:[#allocation38_spill] sm:$0xff]  ;;  %v7961_v20 = vld [vmem:[#allocation27_spill] sm:$0xff] }
 0x1dd   : > { %7953 = vst [vmem:[#allocation36_spill] sm:$0xff] %v7171_v7  ;;  %v2039_v26 = vsel %vm4597_vm5, 0, %v4596_v25  ;;  %v2597_v38 = vand.u32 3, %v2596_v14  ;;  %v2700_v32 = vadd.s32 3, %v7954_v22  ;;  %v2804_v47 = vadd.s32 3, %v7955_v4  ;;  %v7959_v14 = vld [vmem:[#allocation37_spill] sm:$0xff] }
 0x1de   : > { %v2040_v42 = vsub.s32 32, %v2039_v26  ;;  %v2041_v3 = vshll.u32 %v7097_v5, %v2039_v26  ;;  %v2044_v30 = vsub.s32 4294967266, %v2039_v26  ;;  %v1950_v2 = vsel %vm1867_vm4, %v1949_v45, %v1948_v10  ;;  %v7973_v7 = vld [vmem:[#allocation42_spill] sm:$0xff] }
 0x1df   : > { %vm1970_vm13 = vcmp.lt.s32.totalorder %v7922_v48, 0  ;;  %v7187_v5 = vsel %vm515_vm6, nan, %v2189_v18  ;;  %vm2286_vm0 = vcmp.lt.s32.totalorder %v2285_v8, 2  ;;  %v7958_v26 = vxor.u32 2147483648, %v7957_v37 }
 0x1e0   : > { %v2042_v25 = vshrl.u32 %v2024_v17, %v2040_v42  ;;  %v2045_v61 = vadd.s32 127, %v2044_v30  ;;  %v7960_v4 = vxor.u32 2147483648, %v7959_v14  ;;  %vm2495_vm4 = vcmp.eq.s32.totalorder %v2493_v54, 0 }
 0x1e1   : > { %v2289_v22 = vsel %vm2287_vm8, %v7959_v14, %v7958_v26  ;;  %vm2498_vm3 = vcmp.eq.s32.totalorder %v2493_v54, 2  ;;  %v1953_v18 = vsel %vm7102_vm11, %v7913_v43, %v1950_v2  ;;  %vm2599_vm6 = vcmp.eq.s32.totalorder %v2597_v38, 0  ;;  %v7966_v2 = vld [vmem:[#allocation41_spill] sm:$0xff] }
 0x1e2   : > { %v2292_v28 = vsel %vm2290_vm1, %v7960_v4, %v7957_v37  ;;  %v2043_v10 = vor.u32 %v2042_v25, %v2041_v3  ;;  %v2046_v45 = vshll.u32 %v2045_v61, 23  ;;  %vm2602_vm12 = vcmp.eq.s32.totalorder %v2597_v38, 2  ;;  %v7968_v61 = vld [vmem:[#allocation40_spill] sm:$0xff] }
 0x1e3   : > { %v7200_v17 = vand.u32 3, %v2700_v32  ;;  %v2908_v26 = vadd.s32 3, %v7961_v20  ;;  %v3012_v14 = vadd.s32 3, %v7962_v56  ;;  %v7963_v37 = vand.u32 2147483647, %v7922_v48 }
 0x1e4   : > { %v2047_v42 = vor.u32 4788187, %v2046_v45  ;;  %v2050_v30 = vcvt.s32.f32 %v2043_v10  ;;  %v2054_v25 = vsub.s32 4, %v7062_v51  ;;  %v2293_v57 = vsel %vm2286_vm0, %v2289_v22, %v2292_v28 }
 0x1e5   : > { %vm7206_vm5 = vcmp.le.f32.partialorder %v7963_v37, 0.7853982  ;;  %vm2494_vm11 = vcmp.lt.s32.totalorder %v2493_v54, 2  ;;  %v7967_v32 = vxor.u32 2147483648, %v7966_v2  ;;  %v7969_v45 = vxor.u32 2147483648, %v7968_v61 }
 0x1e6   : > { %v2048_v10 = vand.u32 2147483647, %v2047_v42  ;;  %v2805_v20 = vand.u32 3, %v2804_v47  ;;  %v3116_v37 = vadd.s32 3, %v7970_v31  ;;  %4889 = vcosq.f32 %v1953_v18 }
 0x1e7   : > { %v2497_v4 = vsel %vm2495_vm4, %v7968_v61, %v7967_v32  ;;  %v2500_v56 = vsel %vm2498_vm3, %v7969_v45, %v7966_v2  ;;  %vm2598_vm8 = vcmp.lt.s32.totalorder %v2597_v38, 2  ;;  %v7972_v1 = vxor.u32 2147483648, %v7971_v9 }
 0x1e8   : > { %v7974_v8 = vxor.u32 2147483648, %v7973_v7  ;;  %v2051_v42 = vmul.f32 %v2050_v30, %v2048_v10  ;;  %vm2703_vm1 = vcmp.eq.s32.totalorder %v7200_v17, 0  ;;  %v2909_v32 = vand.u32 3, %v2908_v26  ;;  %v7976_v30 = vld [vmem:[#allocation46_spill] sm:$0xff] }
 0x1e9   : > { %v2601_v28 = vsel %vm2599_vm6, %v7973_v7, %v7972_v1  ;;  %v3013_v2 = vand.u32 3, %v3012_v14  ;;  %v2055_v31 = vsel %vm1970_vm13, %v2054_v25, %v7062_v51  ;;  %v7233_v61 = vsel %vm618_vm9, nan, %v2293_v57  ;;  %v7978_v14 = vld [vmem:[#allocation45_spill] sm:$0xff] }
 0x1ea   : > { %v2604_v22 = vsel %vm2602_vm12, %v7974_v8, %v7971_v9  ;;  %v2501_v1 = vsel %vm2494_vm11, %v2497_v4, %v2500_v56  ;;  %vm2706_vm0 = vcmp.eq.s32.totalorder %v7200_v17, 2  ;;  %4891 = vsinq.f32 %v1953_v18  ;;  %v7980_v18 = vld [vmem:[#allocation49_spill] sm:$0xff]  ;;  %v7982_v4 = vld [vmem:[#allocation48_spill] sm:$0xff] }
 0x1eb   : > { %v2052_v38 = vxor.u32 2147483648, %v2051_v42  ;;  %vm2807_vm4 = vcmp.eq.s32.totalorder %v2805_v20, 0  ;;  %v3117_v9 = vand.u32 3, %v3116_v37  ;;  %v2605_v7 = vsel %vm2598_vm8, %v2601_v28, %v2604_v22  ;;  %v7984_v28 = vld [vmem:[#allocation28_spill] sm:$0xff]  ;;  %v7986_v22 = vld [vmem:[#allocation51_spill] sm:$0xff] }
 0x1ec   : > { %vm2702_vm3 = vcmp.lt.s32.totalorder %v7200_v17, 2  ;;  %v7977_v26 = vxor.u32 2147483648, %v7976_v30  ;;  %vm2810_vm6 = vcmp.eq.s32.totalorder %v2805_v20, 2  ;;  %v7979_v51 = vxor.u32 2147483648, %v7978_v14 }
 0x1ed   : > { %vm2911_vm9 = vcmp.eq.s32.totalorder %v2909_v32, 0  ;;  %vm2914_vm12 = vcmp.eq.s32.totalorder %v2909_v32, 2  ;;  %vm3015_vm11 = vcmp.eq.s32.totalorder %v3013_v2, 0  ;;  %v2053_v54 = vsel %vm1970_vm13, %v2052_v38, %v2051_v42 }
 0x1ee   : > { %v2705_v10 = vsel %vm2703_vm1, %v7978_v14, %v7977_v26  ;;  %v2708_v25 = vsel %vm2706_vm0, %v7979_v51, %v7976_v30  ;;  %vm2806_vm2 = vcmp.lt.s32.totalorder %v2805_v20, 2  ;;  %v7981_v57 = vxor.u32 2147483648, %v7980_v18  ;;  %v7997_v20 = vld [vmem:[#allocation24_spill] sm:$0xff] }
 0x1ef   : > { %vm3018_vm8 = vcmp.eq.s32.totalorder %v3013_v2, 2  ;;  %v7983_v56 = vxor.u32 2147483648, %v7982_v4  ;;  %vm2910_vm1 = vcmp.lt.s32.totalorder %v2909_v32, 2  ;;  %vm3119_vm7 = vcmp.eq.s32.totalorder %v3117_v9, 0 }
 0x1f0   : > { %v2809_v45 = vsel %vm2807_vm4, %v7982_v4, %v7981_v57  ;;  %vm3122_vm14 = vcmp.eq.s32.totalorder %v3117_v9, 2  ;;  %v7985_v8 = vxor.u32 2147483648, %v7984_v28  ;;  %v7987_v42 = vxor.u32 2147483648, %v7986_v22 }
 0x1f1   : > { %v2812_v37 = vsel %vm2810_vm6, %v7983_v56, %v7980_v18  ;;  %vm3014_vm13 = vcmp.lt.s32.totalorder %v3013_v2, 2  ;;  %v7988_v30 = vxor.u32 2147483648, %v6721_v60  ;;  %v2056_v14 = vsel %vm7206_vm5, %v7922_v48, %v2053_v54  ;;  %v7269_v56 = vpop.eup %4889  ;;  %v7999_v2 = vld [vmem:[#allocation25_spill] sm:$0xff] }
 0x1f2   : > { %v2913_v47 = vsel %vm2911_vm9, %v7986_v22, %v7985_v8  ;;  %v2916_v38 = vsel %vm2914_vm12, %v7987_v42, %v7984_v28  ;;  %v7989_v51 = vxor.u32 2147483648, %v6712_v50  ;;  %v3220_v57 = vadd.s32 3, %v6805_v62  ;;  %v7993_v42 = vld [vmem:[#allocation22_spill] sm:$0xff] }
 0x1f3   : > { %v3017_v26 = vsel %vm3015_vm11, %v6712_v50, %v7988_v30  ;;  %v3324_v4 = vadd.s32 3, %v7007_v34  ;;  %v7273_v28 = vsel %vm7206_vm5, 0, %v2055_v31  ;;  %vm3118_vm0 = vcmp.lt.s32.totalorder %v3117_v9, 2 }
 0x1f4   : > { %v3020_v18 = vsel %vm3018_vm8, %v7989_v51, %v6721_v60  ;;  %v7990_v8 = vxor.u32 2147483648, %v6842_v13  ;;  %v7991_v54 = vxor.u32 2147483648, %v6840_v58  ;;  %v2502_v62 = vsel %vm824_vm10, nan, %v2501_v1 }
 0x1f5   : > { %vm7994_vm4 = vweird.f32 %v7993_v42  ;;  %v2709_v3 = vsel %vm2702_vm3, %v2705_v10, %v2708_v25  ;;  %v2813_v31 = vsel %vm2806_vm2, %v2809_v45, %v2812_v37  ;;  %4893 = vcosq.f32 %v2056_v14 }
 0x1f6   : > { %v3121_v22 = vsel %vm3119_vm7, %v6840_v58, %v7990_v8  ;;  %v3124_v50 = vsel %vm3122_vm14, %v7991_v54, %v6842_v13  ;;  %v2606_v34 = vsel %vm7994_vm4, nan, %v2605_v7  ;;  %v2917_v9 = vsel %vm2910_vm1, %v2913_v47, %v2916_v38  ;;  %v7291_v58 = vpop.eup %4891  ;;  %v7995_v54 = vld [vmem:[#allocation23_spill] sm:$0xff] }
 0x1f7   : > { %v3021_v30 = vsel %vm3014_vm13, %v3017_v26, %v3020_v18  ;;  %v3428_v51 = vadd.s32 3, %v7070_v59  ;;  %4895 = vsinq.f32 %v2056_v14  ;;  %v3125_v13 = vsel %vm3118_vm0, %v3121_v22, %v3124_v50 }
 0x1f8   : > { %v3221_v1 = vand.u32 3, %v3220_v57  ;;  %v3325_v8 = vand.u32 3, %v3324_v4  ;;  %v1964_v7 = vxor.u32 2147483648, %v7269_v56  ;;  %vm7996_vm10 = vweird.f32 %v7995_v54 }
 0x1f9   : > { %v2710_v17 = vsel %vm7996_vm10, nan, %v2709_v3  ;;  %vm7998_vm14 = vweird.f32 %v7997_v20  ;;  %v3532_v32 = vadd.s32 3, %v7119_v11  ;;  %vm8000_vm7 = vweird.f32 %v7999_v2 }
 0x1fa   : > { %v7298_v10 = vsel %vm7998_vm14, nan, %v2813_v31  ;;  %v7303_v59 = vsel %vm8000_vm7, nan, %v2917_v9  ;;  %v3751_v25 = vsub.f32 0.0, %v7187_v5  ;;  %v3752_v45 = vsub.f32 0.0, %v7233_v61 }
 0x1fb   : > { %v3754_v37 = vsub.f32 0.0, %v2502_v62  ;;  %v1961_v47 = vxor.u32 2147483648, %v7291_v58  ;;  %v7310_v38 = vsel %vm1339_vm15, nan, %v3021_v30  ;;  %vm8001_vm2 = vweird.f32 %v5659_v55 }
 0x1fc   : > { %v7314_v26 = vsel %vm8001_vm2, nan, %v3125_v13  ;;  %v7316_v11 = vand.u32 3, %v3428_v51  ;;  %vm3223_vm5 = vcmp.eq.s32.totalorder %v3221_v1, 0  ;;  %vm3226_vm3 = vcmp.eq.s32.totalorder %v3221_v1, 2 }
 0x1fd   : > { %vm3327_vm6 = vcmp.eq.s32.totalorder %v3325_v8, 0  ;;  %v3636_v5 = vadd.s32 3, %v7165_v40  ;;  %vm3222_vm9 = vcmp.lt.s32.totalorder %v3221_v1, 2  ;;  %vm3330_vm12 = vcmp.eq.s32.totalorder %v3325_v8, 2 }
 0x1fe   : > { %v3533_v61 = vand.u32 3, %v3532_v32  ;;  %v3740_v14 = vadd.s32 3, %v7273_v28  ;;  %v3755_v18 = vsub.f32 0.0, %v2606_v34  ;;  %v3756_v52 = vsub.f32 0.0, %v2710_v17 }
 0x1ff   : > { %v3767_v57 = vpack.c.bf16 %v3752_v45, %v3751_v25  ;;  %v3768_v4 = vpack.c.bf16 %v3754_v37, %v3751_v25  ;;  %v8002_v55 = vxor.u32 2147483648, %v7009_v29  ;;  %v8003_v50 = vxor.u32 2147483648, %v6935_v39 }
 0x200   : > { %vm3326_vm15 = vcmp.lt.s32.totalorder %v3325_v8, 2  ;;  %v8004_v40 = vxor.u32 2147483648, %v7038_v36  ;;  %vm1751_vm11 = vweird.f32 %v7899_v21  ;;  %vm1753_vm8 = vcmp.lt.s32.totalorder %v7089_v12, 2 }
 0x201   : > { %v3225_v22 = vsel %vm3223_vm5, %v6935_v39, %v8002_v55  ;;  %v3228_v60 = vsel %vm3226_vm3, %v8003_v50, %v7009_v29  ;;  %vm1854_vm1 = vweird.f32 %v7904_v41  ;;  %v8005_v42 = vxor.u32 2147483648, %v7026_v35  ;;  %3809 = vmatprep.subr.bf16.mxu0 %v3767_v57  ;;  %v7339_v29 = vpop.eup %4893  ;;  %v8017_v50 = vld [vmem:[#allocation36_spill] sm:$0xff] }
 0x202   : > { %v3329_v62 = vsel %vm3327_vm6, %v7026_v35, %v8004_v40  ;;  %vm3431_vm13 = vcmp.eq.s32.totalorder %v7316_v11, 0  ;;  %vm3434_vm0 = vcmp.eq.s32.totalorder %v7316_v11, 2  ;;  %v7337_v39 = vand.u32 3, %v3636_v5 }
 0x203   : > { %v3332_v34 = vsel %vm3330_vm12, %v8005_v42, %v7038_v36  ;;  %vm1857_vm4 = vcmp.eq.s32.totalorder %v7128_v53, 0  ;;  %vm1860_vm10 = vcmp.eq.s32.totalorder %v7128_v53, 2  ;;  %vm3535_vm14 = vcmp.eq.s32.totalorder %v3533_v61, 0  ;;  %v7346_v36 = vpop.eup %4895  ;;  %v8020_v42 = vld [vmem:[#allocation32_spill] sm:$0xff] }
 0x204   : > { %vm3538_vm7 = vcmp.eq.s32.totalorder %v3533_v61, 2  ;;  %v3741_v3 = vand.u32 3, %v3740_v14  ;;  %v8006_v35 = vpack.c.bf16 %v6411_v19, %v7946_v24  ;;  %v3229_v31 = vsel %vm3222_vm9, %v3225_v22, %v3228_v60  ;;  %v8012_v14 = vld [vmem:[#allocation50_spill] sm:$0xff] }
 0x205   : > { %v3757_v9 = vsub.f32 0.0, %v7298_v10  ;;  %v3758_v30 = vsub.f32 0.0, %v7303_v59  ;;  %v3769_v51 = vpack.c.bf16 %v3756_v52, %v3755_v18  ;;  %v5095_v13 = vmov 0   ;;  %v8013_v18 = vld [vmem:[#allocation29_spill] sm:$0xff] }
 0x206   : > { %3810 = vmatpush1.bf16.msra.mxu0 %v8006_v35  ;;  %3841 = vmatprep.mubr.bf16.mxu0 %v5095_v13  ;;  %v3333_v54 = vsel %vm3326_vm15, %v3329_v62, %v3332_v34  ;;  %vm3430_vm2 = vcmp.lt.s32.totalorder %v7316_v11, 2  ;;  %v8007_v17 = vxor.u32 2147483648, %v7110_v0  ;;  %v8008_v1 = vxor.u32 2147483648, %v7106_v49  ;;  %v8021_v34 = vld [vmem:[#allocation30_spill] sm:$0xff] }
 0x207   : > { %3811 = vmatprep.subr.bf16.mxu0 %v3768_v4  ;;  %vm1856_vm5 = vcmp.lt.s32.totalorder %v7128_v53, 2  ;;  %vm1957_vm3 = vweird.f32 %v7913_v43  ;;  %vm3534_vm6 = vcmp.lt.s32.totalorder %v3533_v61, 2  ;;  %v8009_v8 = vxor.u32 2147483648, %v7175_v63  ;;  %v8024_v43 = vld [vmem:[#allocation17_spill] sm:$0xff] }
 0x208   : > { %v3433_v19 = vsel %vm3431_vm13, %v7106_v49, %v8007_v17  ;;  %v3436_v20 = vsel %vm3434_vm0, %v8008_v1, %v7110_v0  ;;  %v8010_v32 = vxor.u32 2147483648, %v7168_v6  ;;  %vm3639_vm9 = vcmp.eq.s32.totalorder %v7337_v39, 0  ;;  %v8022_v17 = vld [vmem:[#allocation53_spill] sm:$0xff] }
 0x209   : > { %v3537_v10 = vsel %vm3535_vm14, %v7168_v6, %v8009_v8  ;;  %v2064_v49 = vxor.u32 2147483648, %v7346_v36  ;;  %v2067_v0 = vxor.u32 2147483648, %v7339_v29  ;;  %vm3642_vm12 = vcmp.eq.s32.totalorder %v7337_v39, 2 }
 0x20a   : > { %v3540_v2 = vsel %vm3538_vm7, %v8010_v32, %v7175_v63  ;;  %vm3743_vm15 = vcmp.eq.s32.totalorder %v3741_v3, 0  ;;  %v8011_v59 = vpack.c.bf16 %v6416_v16, %v7946_v24  ;;  %vm3746_vm13 = vcmp.eq.s32.totalorder %v3741_v3, 2 }
 0x20b   : > { %v3759_v25 = vsub.f32 0.0, %v7310_v38  ;;  %v3760_v45 = vsub.f32 0.0, %v7314_v26  ;;  %v3770_v37 = vpack.c.bf16 %v3758_v30, %v3757_v9  ;;  %v2061_v5 = vand.u32 3, %v7273_v28 }
 0x20c   : > { %3812 = vmatpush1.bf16.msra.mxu0 %v8011_v59  ;;  %v2074_v52 = vpack.c.bf16 %v8013_v18, %v8012_v14  ;;  %vm8014_vm0 = vweird.f32 %v7914_v44  ;;  %vm8015_vm14 = vweird.f32 %v5698_v33  ;;  %v3437_v16 = vsel %vm3430_vm2, %v3433_v19, %v3436_v20  ;;  %v8023_v19 = vld [vmem:[#allocation31_spill] sm:$0xff] }
 0x20d   : > { %3813 = vmatprep.subr.bf16.mxu0 %v3769_v51  ;;  %v3230_v57 = vsel %vm8014_vm0, nan, %v3229_v31  ;;  %v3334_v4 = vsel %vm8015_vm14, nan, %v3333_v54  ;;  %v3541_v24 = vsel %vm3534_vm6, %v3537_v10, %v3540_v2  ;;  %vm3638_vm7 = vcmp.lt.s32.totalorder %v7337_v39, 2  ;;  %v4665_v2 = vld [vmem:[%s314_s10] ss:$0 sm:$0xff]  ;;  %s4971_s10 = scalar_lea.vmem %s4970_s9, 32 }
 0x20e   : > { %v3641_v28 = vsel %vm3639_vm9, %v7269_v56, %v1961_v47  ;;  %v3644_v33 = vsel %vm3642_vm12, %v1964_v7, %v7291_v58  ;;  %vm3742_vm0 = vcmp.lt.s32.totalorder %v3741_v3, 2  ;;  %v3745_v44 = vsel %vm3743_vm15, %v7339_v29, %v2064_v49  ;;  %p4973_p0 = scmp.lt.s32.totalorder %s4971_s10, %s4965_s27 }
 0x20f   : > { %v3748_v38 = vsel %vm3746_vm13, %v2067_v0, %v7346_v36  ;;  %v8016_v26 = vpack.c.bf16 %v6565_v46, %v6422_v27  ;;  %vm2060_vm2 = vweird.f32 %v7922_v48  ;;  %v3761_v11 = vsub.f32 0.0, %v3230_v57  ;;  %v8026_v48 = vld [vmem:[#allocation18_spill] sm:$0xff] }
 0x210   : > { %v3762_v61 = vsub.f32 0.0, %v3334_v4  ;;  %v3771_v55 = vpack.c.bf16 %v3760_v45, %v3759_v25  ;;  %v1760_v22 = vsel %vm1753_vm8, %v7154_v15, %v7161_v23  ;;  %vm1960_vm6 = vcmp.eq.s32.totalorder %v8017_v50, 0  ;;  %p4974_p9 = por %p4973_p0, %p4972_p7 }
 0x211   : > { %3814 = vmatpush1.bf16.msra.mxu0 %v8016_v26  ;;  %v3438_v60 = vsel %vm1751_vm11, nan, %v3437_v16  ;;  %v3542_v27 = vsel %vm1854_vm1, nan, %v3541_v24  ;;  %v8018_v46 = vmov %v8009_v8  ;;  %v8019_v62 = vmov %v8010_v32  ;;  %v4836_v32 = vld [vmem:[%s5274_s21] sm:$0xff]  }
 0x212   : > { %3815 = vmatprep.subr.bf16.mxu0 %v3770_v37  ;;  %v1859_v40 = vsel %vm1857_vm4, %v7168_v6, %v8018_v46  ;;  %v1862_v12 = vsel %vm1860_vm10, %v8019_v62, %v7175_v63  ;;  %v3645_v15 = vsel %vm3638_vm7, %v3641_v28, %v3644_v33  ;;  %v3749_v23 = vsel %vm3742_vm0, %v3745_v44, %v3748_v38  ;;  %p4975_p5 = pnand %p4974_p9, %p4968_p6 }
 0x213   : > { %vm1963_vm8 = vcmp.eq.s32.totalorder %v8017_v50, 2  ;;  %vm2063_vm9 = vcmp.eq.s32.totalorder %v2061_v5, 0  ;;  %vm2066_vm12 = vcmp.eq.s32.totalorder %v2061_v5, 2  ;;  %v2075_v35 = vpack.c.bf16 %v8021_v34, %v8020_v42 }
 0x214   : > { %vm1959_vm4 = vcmp.lt.s32.totalorder %v8017_v50, 2  ;;  %v3763_v31 = vsub.f32 0.0, %v3438_v60  ;;  %v3764_v6 = vsub.f32 0.0, %v3542_v27  ;;  %v3772_v9 = vpack.c.bf16 %v3762_v61, %v3761_v11 }
 0x215   : > { %3816 = vmatpush1.bf16.msra.mxu0 %v2074_v52  ;;  %v1863_v63 = vsel %vm1856_vm5, %v1859_v40, %v1862_v12  ;;  %vm2062_vm10 = vcmp.lt.s32.totalorder %v2061_v5, 2  ;;  %v3646_v39 = vsel %vm1957_vm3, nan, %v3645_v15  ;;  %v3750_v3 = vsel %vm2060_vm2, nan, %v3749_v23 }
 0x216   : > { %3817 = vmatprep.subr.bf16.mxu0 %v3771_v55  ;;  %v1962_v30 = vsel %vm1960_vm6, %v7269_v56, %v1961_v47  ;;  %v1965_v51 = vsel %vm1963_vm8, %v1964_v7, %v7291_v58  ;;  %v2065_v53 = vsel %vm2063_vm9, %v7339_v29, %v2064_v49  ;;  %v2068_v13 = vsel %vm2066_vm12, %v2067_v0, %v7346_v36 }
 0x217   : > { %v1761_v54 = vsel %vm1751_vm11, nan, %v1760_v22  ;;  %v2076_v1 = vpack.c.bf16 %v8023_v19, %v8022_v17  ;;  %v1864_v20 = vsel %vm1854_vm1, nan, %v1863_v63  ;;  %v3765_v47 = vsub.f32 0.0, %v3646_v39 }
 0x218   : > { %v3766_v8 = vsub.f32 0.0, %v3750_v3  ;;  %v3773_v10 = vpack.c.bf16 %v3764_v6, %v3763_v31  ;;  %v1966_v56 = vsel %vm1959_vm4, %v1962_v30, %v1965_v51  ;;  %v2069_v21 = vsel %vm2062_vm10, %v2065_v53, %v2068_v13 }
 0x219   : > { %3818 = vmatpush1.bf16.msra.mxu0 %v2075_v35  ;;  %v2077_v58 = vpack.c.bf16 %v1864_v20, %v1761_v54  ;;  %v1967_v7 = vsel %vm1957_vm3, nan, %v1966_v56  ;;  %v2070_v41 = vsel %vm2060_vm2, nan, %v2069_v21  ;;  %v8025_v49 = vcvt.s32.f32 %v8024_v43 }
 0x21a   : > { %3819 = vmatprep.subr.bf16.mxu0 %v3772_v9  ;;  %v3774_v29 = vpack.c.bf16 %v3766_v8, %v3765_v47  ;;  %v2078_v36 = vpack.c.bf16 %v2070_v41, %v1967_v7  ;;  %v8027_v59 = vcvt.s32.f32 %v8026_v48  ;;  %v8028_v26 = vmov 2102212464  }
 0x21b   : > { %v7474_v0 = vmul.f32 %v4665_v2, %v8025_v49  ;;  %v8029_v61 = vmov 920167782   ;;  %v8030_v27 = vmov 683565275   ;;  %v8031_v62 = vmov 1326507024  }
 0x21c   : > { %v7478_v25 = vmul.f32 %v4665_v2, %v8027_v59  ;;  %v8032_v15 = vmov 2475754826   ;;  %v8033_v34 = vmov 2131351028  }
 0x21d   : > { %3820 = vmatpush1.bf16.msra.mxu0 %v2076_v1  ;;  %v3879_v45 = vand.u32 2139095040, %v7474_v0  ;;  %v3876_v38 = vand.u32 2147483647, %v7474_v0  ;;  %vm3878_vm4 = vcmp.lt.s32.totalorder %v7474_v0, 0 }
 0x21e   : > { %3821 = vmatprep.subr.bf16.mxu0 %v3773_v10  ;;  %v3982_v5 = vand.u32 2139095040, %v7478_v25  ;;  %v3979_v3 = vand.u32 2147483647, %v7478_v25  ;;  %vm3981_vm10 = vcmp.lt.s32.totalorder %v7478_v25, 0 }
 0x21f   : > { %v3880_v37 = vshrl.u32 %v3879_v45, 23  ;;  %v3883_v50 = vand.u32 8388607, %v3876_v38 }
 0x220   : > { %v3983_v18 = vshrl.u32 %v3982_v5, 23 }
 0x221   : > { %3822 = vmatpush1.bf16.msra.mxu0 %v2077_v58  ;;  %v4666_v14 = vadd.s32 4294967169, %v3880_v37  ;;  %v3986_v58 = vand.u32 8388607, %v3979_v3  ;;  %v3884_v41 = vor.u32 8388608, %v3883_v50 }
 0x222   : > { %3823 = vmatprep.subr.bf16.mxu0 %v3774_v29  ;;  %v4670_v57 = vadd.s32 4294967169, %v3983_v18 }
 0x223   : > { %v3886_v52 = vadd.s32 1, %v4666_v14  ;;  %v3987_v45 = vor.u32 8388608, %v3986_v58  ;;  %v3924_v18 = vshll.u32 %v3884_v41, 8 }
 0x224   : > { %v3989_v4 = vadd.s32 1, %v4670_v57 }
 0x225   : > { %3824 = vmatpush1.bf16.msra.mxu0 %v2078_v36  ;;  %vm3887_vm11 = vcmp.gt.s32.totalorder %v3886_v52, 0 }
 0x226   : > { %v3888_v16 = vsel %vm3887_vm11, %v3886_v52, 0  ;;  %vm3990_vm1 = vcmp.gt.s32.totalorder %v3989_v4, 0  ;;  %vm3877_vm11 = vcmp.le.f32.partialorder %v3876_v38, 0.7853982 }
 0x227   : > { %v3890_v24 = vand.u32 31, %v3888_v16  ;;  %v3991_v28 = vsel %vm3990_vm1, %v3989_v4, 0  ;;  %v7492_v60 = vshrl.u32 %v3888_v16, 5  ;;  %vm3980_vm1 = vcmp.le.f32.partialorder %v3979_v3, 0.7853982 }
 0x228   : > { %3842 = vmatmul.mubr.bf16.vlgmr.msra.gmra.mrb[0].mxu0 %v4836_v32  ;;  %v3993_v44 = vand.u32 31, %v3991_v28  ;;  %v7510_v30 = vshrl.u32 %v3991_v28, 5 }
 0x229   : > { %v7482_v33 = vsub.s32 32, %v3890_v24  ;;  %v3902_v11 = vshll.u32 %v8028_v26, %v3890_v24  ;;  %v3893_v46 = vshll.u32 %v8030_v27, %v3890_v24  ;;  %v3905_v40 = vshll.u32 %v8029_v61, %v3890_v24 }
 0x22a   : > { %v7488_v22 = vsub.s32 32, %v3993_v44  ;;  %v3896_v42 = vshll.u32 %v8032_v15, %v3890_v24  ;;  %v3899_v31 = vshll.u32 %v8033_v34, %v3890_v24  ;;  %v4005_v63 = vshll.u32 %v8028_v26, %v3993_v44 }
 0x22b   : > { %v3903_v55 = vshrl.u32 %v8029_v61, %v7482_v33  ;;  %v3906_v12 = vshrl.u32 %v8031_v62, %v7482_v33  ;;  %v3894_v23 = vshrl.u32 %v8032_v15, %v7482_v33  ;;  %v3897_v35 = vshrl.u32 %v8033_v34, %v7482_v33 }
 0x22c   : > { %v3900_v6 = vshrl.u32 %v8028_v26, %v7482_v33  ;;  %v4006_v39 = vshrl.u32 %v8029_v61, %v7488_v22  ;;  %v4008_v51 = vshll.u32 %v8029_v61, %v3993_v44  ;;  %v4009_v53 = vshrl.u32 %v8031_v62, %v7488_v22 }
 0x22d   : > { %v3904_v9 = vor.u32 %v3903_v55, %v3902_v11  ;;  %v3907_v13 = vor.u32 %v3906_v12, %v3905_v40  ;;  %vm3911_vm5 = vcmp.lt.s32.totalorder %v7492_v60, 4  ;;  %v3996_v54 = vshll.u32 %v8030_v27, %v3993_v44 }
 0x22e   : > { %v3997_v17 = vshrl.u32 %v8032_v15, %v7488_v22  ;;  %v3999_v19 = vshll.u32 %v8032_v15, %v3993_v44  ;;  %v4000_v1 = vshrl.u32 %v8033_v34, %v7488_v22  ;;  %v4002_v20 = vshll.u32 %v8033_v34, %v3993_v44 }
 0x22f   : > { %v4003_v47 = vshrl.u32 %v8028_v26, %v7488_v22  ;;  %v3895_v8 = vor.u32 %v3894_v23, %v3893_v46  ;;  %v3898_v10 = vor.u32 %v3897_v35, %v3896_v42  ;;  %v4007_v56 = vor.u32 %v4006_v39, %v4005_v63 }
 0x230   : > { %v3901_v21 = vor.u32 %v3900_v6, %v3899_v31  ;;  %v4010_v7 = vor.u32 %v4009_v53, %v4008_v51  ;;  %vm4014_vm3 = vcmp.lt.s32.totalorder %v7510_v30, 4  ;;  %vm3908_vm15 = vcmp.lt.s32.totalorder %v7492_v60, 1 }
 0x231   : > { %vm3910_vm13 = vcmp.lt.s32.totalorder %v7492_v60, 3  ;;  %v3917_v29 = vsel %vm3911_vm5, %v3904_v9, 920167782  ;;  %v3921_v36 = vsel %vm3911_vm5, %v3907_v13, 1326507024  ;;  %v3998_v32 = vor.u32 %v3997_v17, %v3996_v54 }
 0x232   : > { %v4001_v2 = vor.u32 %v4000_v1, %v3999_v19  ;;  %v4004_v43 = vor.u32 %v4003_v47, %v4002_v20  ;;  %vm3909_vm14 = vcmp.lt.s32.totalorder %v7492_v60, 2  ;;  %vm4011_vm7 = vcmp.lt.s32.totalorder %v7510_v30, 1 }
 0x233   : > { %vm4013_vm0 = vcmp.lt.s32.totalorder %v7510_v30, 3  ;;  %v4020_v49 = vsel %vm4014_vm3, %v4007_v56, 920167782  ;;  %v3916_v48 = vsel %vm3908_vm15, %v3895_v8, %v3898_v10  ;;  %v3918_v59 = vsel %vm3910_vm13, %v3901_v21, %v3917_v29 }
 0x234   : > { %v4024_v37 = vsel %vm4014_vm3, %v4010_v7, 1326507024  ;;  %v3920_v5 = vsel %vm3908_vm15, %v3898_v10, %v3901_v21  ;;  %v3922_v14 = vsel %vm3910_vm13, %v3904_v9, %v3921_v36  ;;  %vm4012_vm2 = vcmp.lt.s32.totalorder %v7510_v30, 2 }
 0x235   : > { %v4019_v52 = vsel %vm4011_vm7, %v3998_v32, %v4001_v2  ;;  %v4021_v57 = vsel %vm4013_vm0, %v4004_v43, %v4020_v49  ;;  %v3919_v4 = vsel %vm3909_vm14, %v3916_v48, %v3918_v59  ;;  %v4023_v16 = vsel %vm4011_vm7, %v4001_v2, %v4004_v43 }
 0x236   : > { %v4025_v24 = vsel %vm4013_vm0, %v4007_v56, %v4024_v37  ;;  %v3923_v28 = vsel %vm3909_vm14, %v3920_v5, %v3922_v14  ;;  %v4027_v44 = vshll.u32 %v3987_v45, 8  ;;  %v4022_v26 = vsel %vm4012_vm2, %v4019_v52, %v4021_v57 }
 0x237   : > { %v7564_v11 = vmul.u32.u64.low %v3924_v18, %v3919_v4  ;;  %v7565_v61 = vmul.u32.u64.high %v3924_v18, %v3919_v4, %v7564_v11  ;;  %v4026_v55 = vsel %vm4012_vm2, %v4023_v16, %v4025_v24  ;;  %v3892_v50 = vshrl.u32 %v8030_v27, %v7482_v33 }
 0x238   : > { %v7571_v46 = vmul.u32.u64.low %v3924_v18, %v3923_v28  ;;  %v7572_v40 = vmul.u32.u64.high %v3924_v18, %v3923_v28, %v7571_v46  ;;  %v3913_v62 = vsel %vm3911_vm5, %v3901_v21, 2102212464  ;;  %v3995_v23 = vshrl.u32 %v8030_v27, %v7488_v22 }
 0x239   : > { %v7576_v12 = vmul.u32.u64.low %v4027_v44, %v4022_v26  ;;  %v7577_v15 = vmul.u32.u64.high %v4027_v44, %v4022_v26, %v7576_v12  ;;  %v7581_v42 = vmul.u32.u64.low %v4027_v44, %v4026_v55  ;;  %v7582_v34 = vmul.u32.u64.high %v4027_v44, %v4026_v55, %v7581_v42 }
 0x23a   : > { %v4016_v35 = vsel %vm4014_vm3, %v4004_v43, 2102212464  ;;  %v3912_v33 = vsel %vm3908_vm15, %v3892_v50, %v3895_v8  ;;  %v3914_v31 = vsel %vm3910_vm13, %v3898_v10, %v3913_v62  ;;  %v4015_v6 = vsel %vm4011_vm7, %v3995_v23, %v3998_v32 }
 0x23b   : > { %v4017_v9 = vsel %vm4013_vm0, %v4001_v2, %v4016_v35  ;;  %v3915_v22 = vsel %vm3909_vm14, %v3912_v33, %v3914_v31  ;;  %v3934_v27 = vadd.s32 1, %v7565_v61  ;;  %vm3933_vm6 = vc.u32 %v7572_v40, %v7564_v11 }
 0x23c   : > { %v4018_v63 = vsel %vm4012_vm2, %v4015_v6, %v4017_v9  ;;  %v4037_v39 = vadd.s32 1, %v7577_v15  ;;  %v3931_v51 = vmul.u32 %v3924_v18, %v3915_v22  ;;  %vm4036_vm8 = vc.u32 %v7582_v34, %v7576_v12 }
 0x23d   : > { %v3935_v53 = vsel %vm3933_vm6, %v3934_v27, %v7565_v61  ;;  %v4034_v13 = vmul.u32 %v4027_v44, %v4018_v63  ;;  %v3932_v45 = vadd.s32 %v7564_v11, %v7572_v40  ;;  %v4035_v14 = vadd.s32 %v7576_v12, %v7582_v34 }
 0x23e   : > { %v4038_v54 = vsel %vm4036_vm8, %v4037_v39, %v7577_v15  ;;  %v3936_v17 = vadd.s32 %v3935_v53, %v3931_v51  ;;  %vm3968_vm6 = vweird.f32 %v7474_v0 }
 0x23f   : > { %v4039_v60 = vadd.s32 %v4038_v54, %v4034_v13 }
 0x240   : > { %v3937_v19 = vadd.s32 536870912, %v3936_v17 }
 0x241   : > { %v4040_v1 = vadd.s32 536870912, %v4039_v60 }
 0x242   : > { %v3938_v20 = vshrl.u32 %v3937_v19, 30 }
 0x243   : > { %v4041_v47 = vshrl.u32 %v4040_v1, 30 }
 0x244   : > { %v3939_v8 = vshll.u32 %v3938_v20, 30  ;;  %v3962_v33 = vsub.s32 4, %v3938_v20 }
 0x245   : > { %v4042_v10 = vshll.u32 %v4041_v47, 30  ;;  %v4065_v6 = vsub.s32 4, %v4041_v47 }
 0x246   : > { %v3940_v30 = vsub.s32 %v3936_v17, %v3939_v8  ;;  %v3963_v22 = vsel %vm3878_vm4, %v3962_v33, %v3938_v20 }
 0x247   : > { %v4043_v56 = vsub.s32 %v4039_v60, %v4042_v10  ;;  %v4066_v27 = vsel %vm3981_vm10, %v4065_v6, %v4041_v47  ;;  %v3965_v63 = vsel %vm3877_vm11, 0, %v3963_v22 }
 0x248   : > { %v3942_v21 = vsub.s32 0, %v3940_v30  ;;  %v4068_v39 = vsel %vm3980_vm1, 0, %v4066_v27  ;;  %v4175_v38 = vadd.s32 3, %v3965_v63  ;;  %v3969_v8 = vand.u32 3, %v3965_v63 }
 0x249   : > { %v4045_v58 = vsub.s32 0, %v4043_v56  ;;  %v4279_v51 = vadd.s32 3, %v4068_v39 }
 0x24a   : > { %v4667_v7 = vmin.u32 %v3942_v21, %v3940_v30  ;;  %v4176_v3 = vand.u32 3, %v4175_v38  ;;  %vm3971_vm7 = vcmp.eq.s32.totalorder %v3969_v8, 0  ;;  %vm3974_vm0 = vcmp.eq.s32.totalorder %v3969_v8, 2 }
 0x24b   : > { %v4671_v41 = vmin.u32 %v4045_v58, %v4043_v56  ;;  %v4280_v60 = vand.u32 3, %v4279_v51 }
 0x24c   : > { %v3944_v29 = vclz %v4667_v7  ;;  %vm4178_vm5 = vcmp.eq.s32.totalorder %v4176_v3, 0  ;;  %vm4181_vm3 = vcmp.eq.s32.totalorder %v4176_v3, 2  ;;  %vm4177_vm14 = vcmp.lt.s32.totalorder %v4176_v3, 2 }
 0x24d   : > { %v4047_v36 = vclz %v4671_v41  ;;  %vm4282_vm15 = vcmp.eq.s32.totalorder %v4280_v60, 0  ;;  %vm4285_vm13 = vcmp.eq.s32.totalorder %v4280_v60, 2  ;;  %vm4281_vm2 = vcmp.lt.s32.totalorder %v4280_v60, 2 }
 0x24e   : > { %v4668_v32 = vadd.s32 4294967294, %v3944_v29 }
 0x24f   : > { %v4672_v2 = vadd.s32 4294967294, %v4047_v36 }
 0x250   : > { %vm4669_vm9 = vcmp.lt.s32.totalorder %v4668_v32, 0 }
 0x251   : > { %vm4673_vm12 = vcmp.lt.s32.totalorder %v4672_v2, 0  ;;  %v3947_v43 = vsel %vm4669_vm9, 0, %v4668_v32 }
 0x252   : > { %v4050_v49 = vsel %vm4673_vm12, 0, %v4672_v2  ;;  %v3952_v48 = vsub.s32 4294967266, %v3947_v43  ;;  %v3948_v37 = vsub.s32 32, %v3947_v43  ;;  %v3949_v57 = vshll.u32 %v3940_v30, %v3947_v43 }
 0x253   : > { %v4055_v59 = vsub.s32 4294967266, %v4050_v49  ;;  %v4051_v18 = vsub.s32 32, %v4050_v49  ;;  %v4052_v24 = vshll.u32 %v4043_v56, %v4050_v49  ;;  %v4072_v30 = vand.u32 3, %v4068_v39 }
 0x254   : > { %v3953_v5 = vadd.s32 127, %v3952_v48  ;;  %v3950_v4 = vshrl.u32 %v3932_v45, %v3948_v37  ;;  %vm3970_vm12 = vcmp.lt.s32.totalorder %v3969_v8, 2 }
 0x255   : > { %v4056_v52 = vadd.s32 127, %v4055_v59  ;;  %v4053_v28 = vshrl.u32 %v4035_v14, %v4051_v18  ;;  %vm4074_vm8 = vcmp.eq.s32.totalorder %v4072_v30, 0  ;;  %vm4077_vm9 = vcmp.eq.s32.totalorder %v4072_v30, 2 }
 0x256   : > { %v3954_v16 = vshll.u32 %v3953_v5, 23  ;;  %v3951_v26 = vor.u32 %v3950_v4, %v3949_v57 }
 0x257   : > { %v4057_v44 = vshll.u32 %v4056_v52, 23  ;;  %v4054_v55 = vor.u32 %v4053_v28, %v4052_v24 }
 0x258   : > { %v3955_v61 = vor.u32 4788187, %v3954_v16  ;;  %v3958_v62 = vcvt.s32.f32 %v3951_v26 }
 0x259   : > { %v4058_v50 = vor.u32 4788187, %v4057_v44  ;;  %v4061_v11 = vcvt.s32.f32 %v4054_v55 }
 0x25a   : > { %v3956_v46 = vand.u32 2147483647, %v3955_v61 }
 0x25b   : > { %v4059_v15 = vand.u32 2147483647, %v4058_v50 }
 0x25c   : > { %v3959_v40 = vmul.f32 %v3958_v62, %v3956_v46 }
 0x25d   : > { %v4062_v23 = vmul.f32 %v4061_v11, %v4059_v15 }
 0x25e   : > { %v3960_v42 = vxor.u32 2147483648, %v3959_v40 }
 0x25f   : > { %v4063_v12 = vxor.u32 2147483648, %v4062_v23 }
 0x260   : > { %v3961_v34 = vsel %vm3878_vm4, %v3960_v42, %v3959_v40  ;;  %vm4071_vm4 = vweird.f32 %v7478_v25 }
 0x261   : > { %v4064_v35 = vsel %vm3981_vm10, %v4063_v12, %v4062_v23  ;;  %v3964_v31 = vsel %vm3877_vm11, %v7474_v0, %v3961_v34  ;;  %vm4073_vm10 = vcmp.lt.s32.totalorder %v4072_v30, 2 }
 0x262   : > { %v4067_v9 = vsel %vm3980_vm1, %v7478_v25, %v4064_v35  ;;  %4897 = vcosq.f32 %v3964_v31 }
 0x263   : > { %4899 = vsinq.f32 %v3964_v31 }
 0x264   : > { %4901 = vcosq.f32 %v4067_v9 }
 0x265   : > { %4903 = vsinq.f32 %v4067_v9 }
 0x26c   : > { %v4898_v53 = vpop.eup %4897 }
 0x26d   : > { %v4900_v13 = vpop.eup %4899  ;;  %v3975_v1 = vxor.u32 2147483648, %v4898_v53 }
 0x26e   : > { %v4902_v54 = vpop.eup %4901  ;;  %v3972_v19 = vxor.u32 2147483648, %v4900_v13 }
 0x26f   : > { %v4904_v17 = vpop.eup %4903  ;;  %v4078_v10 = vxor.u32 2147483648, %v4902_v54  ;;  %v4183_v56 = vsel %vm4181_vm3, %v3975_v1, %v4900_v13  ;;  %v3976_v29 = vsel %vm3974_vm0, %v3975_v1, %v4900_v13 }
 0x270   : > { %v4075_v20 = vxor.u32 2147483648, %v4904_v17  ;;  %v4180_v47 = vsel %vm4178_vm5, %v4898_v53, %v3972_v19  ;;  %v3973_v41 = vsel %vm3971_vm7, %v4898_v53, %v3972_v19 }
 0x271   : > { %v4287_v58 = vsel %vm4285_vm13, %v4078_v10, %v4904_v17  ;;  %v4184_v7 = vsel %vm4177_vm14, %v4180_v47, %v4183_v56  ;;  %v4079_v2 = vsel %vm4077_vm9, %v4078_v10, %v4904_v17  ;;  %v3977_v49 = vsel %vm3970_vm12, %v3973_v41, %v3976_v29 }
 0x272   : > { %v4284_v21 = vsel %vm4282_vm15, %v4902_v54, %v4075_v20  ;;  %v4076_v32 = vsel %vm4074_vm8, %v4902_v54, %v4075_v20  ;;  %v4185_v43 = vsel %vm3968_vm6, nan, %v4184_v7  ;;  %v3978_v37 = vsel %vm3968_vm6, nan, %v3977_v49 }
 0x273   : > { %v4288_v36 = vsel %vm4281_vm2, %v4284_v21, %v4287_v58  ;;  %v4080_v59 = vsel %vm4073_vm10, %v4076_v32, %v4079_v2  ;;  %v4290_v45 = vsub.f32 0.0, %v4185_v43 }
 0x274   : > { %v4289_v48 = vsel %vm4071_vm4, nan, %v4288_v36  ;;  %v4081_v18 = vsel %vm4071_vm4, nan, %v4080_v59 }
 0x275   : > { %v4291_v5 = vsub.f32 0.0, %v4289_v48 }
 0x2fb   : > { %v3843_v14 = vpop.f32.mrb[0].mxu0 }
 0x2fc   : > { %v3845_v52 = vpop.f32.mrb[1].mxu0  ;;  %v4292_v57 = vmul.f32 %v3978_v37, %v3843_v14  ;;  %v4300_v25 = vmul.f32 %v4290_v45, %v3843_v14 }
 0x2fd   : > { %v3847_v4 = vpop.f32.mrb[2].mxu0  ;;  %v4294_v16 = vmul.f32 %v4290_v45, %v3845_v52  ;;  %v4298_v24 = vmul.f32 %v3978_v37, %v3845_v52 }
 0x2fe   : > { %v3849_v28 = vpop.f32.mrb[3].mxu0  ;;  %v4293_v44 = vmul.f32 %v4081_v18, %v3847_v4  ;;  %v4301_v26 = vmul.f32 %v4291_v5, %v3847_v4 }
 0x2ff   : > { %v4295_v61 = vmul.f32 %v4291_v5, %v3849_v28  ;;  %v4296_v55 = vsub.f32 %v4292_v57, %v4294_v16  ;;  %v4299_v50 = vmul.f32 %v4081_v18, %v3849_v28  ;;  %v4302_v46 = vadd.f32 %v4300_v25, %v4298_v24 }
 0x301   : > { %v4297_v0 = vsub.f32 %v4293_v44, %v4295_v61  ;;  %v4303_v62 = vadd.f32 %v4301_v26, %v4299_v50 }
 0x303   : > { %v4305_v15 = vadd.f32 %v4297_v0, %v4296_v55  ;;  %v4309_v11 = vadd.f32 %v4303_v62, %v4302_v46 }
 0x305   : > { %v4316_v40 = vrot.slane %v4305_v15, 4  ;;  %v4325_v23 = vrot.slane %v4309_v11, 4 }
 0x307   : > { %v4317_v42 = vadd.f32 %v4316_v40, %v4305_v15  ;;  %v4326_v12 = vadd.f32 %v4325_v23, %v4309_v11 }
 0x309   : > { %v4318_v34 = vrot.slane %v4317_v42, 2  ;;  %v4327_v35 = vrot.slane %v4326_v12, 2 }
 0x30b   : > { %v4319_v33 = vadd.f32 %v4318_v34, %v4317_v42  ;;  %v4328_v31 = vadd.f32 %v4327_v35, %v4326_v12 }
 0x30d   : > { %v4320_v6 = vrot.slane %v4319_v33, 1  ;;  %v4329_v9 = vrot.slane %v4328_v31, 1 }
 0x30f   : > { %v4321_v22 = vadd.f32 %v4320_v6, %v4319_v33  ;;  %v4330_v27 = vadd.f32 %v4329_v9, %v4328_v31 }
 0x311   : > { %v4322_v63 = vmul.f32 2.5e-05, %v4321_v22  ;;  %v4331_v39 = vmul.f32 2.5e-05, %v4330_v27 }
 0x313   : > { %4323 = vst [vmem:[%s301_s24] sm:$0x1] %v4322_v63  ;;  %4332 = vst [vmem:[%s307_s26] sm:$0x1] %v4331_v39 }
 0x314   : > { %4978 = shalt.err (!%p4975_p5)
}
 0x315   : > { %s4979_s22 = scalar_lea.hbm %s7626_s11, 16  ;;  %s4983_s8 = scalar_lea.hbm %s7706_s3, 64 }
 0x316   : > { %p4980_p10 = scmp.ne.s32.totalorder %s7626_s11, %s4979_s22  ;;  %p4984_p12 = scmp.lt.u32.totalorder %s7626_s11, %s7706_s3 }
 0x317   : > { %p4985_p8 = scmp.lt.u32.totalorder %s4983_s8, %s4979_s22  ;;  %p4987_p2 = scmp.lt.u32.totalorder %s4979_s22, %s7626_s11 }
 0x318   : > { %p4981_p1 = pnand %p4980_p10, %p8034_p11 }
 0x319   : > { %p4986_p13 = por %p4985_p8, %p4984_p12 }
 0x31a   : > { %p4982_p3 = pneg %p4981_p1 }
 0x31b   : > { %p4988_p4 = por %p4987_p2, %p4986_p13 }
 0x31d   : > { %p4989_p6 = pnand %p4988_p4, %p4982_p3 }
 0x31f   : > { %4992 = shalt.err (!%p4989_p6)
}
 0x320   : > { %4759 = dma.vmem_to_hbm [thread:$0]  (%p8034_p11), %s7628_s5, 16, %s7626_s11, %s4334_s25  }
 0x321   : > { %s4338_s13 = scalar_lea.sflag [#allocation12], %s5270_s12  ;;  %s4993_s27 = scalar_lea.vmem %s7635_s6, 16 }
 0x322   : > { %p4994_p7 = scmp.ne.s32.totalorder %s7635_s6, %s4993_s27  ;;  %s5097_s7 = smov [#allocation11]  }
 0x323   : > { %s4997_s9 = sshll.u32 %s5097_s7, 4  ;;  %s4998_s9 = int_to_ptr.vmem [resolvable:$false] %s4997_s9 }
 0x324   : > { %p4995_p0 = pnand %p4994_p7, %p8034_p11  ;;  %s4999_s10 = scalar_lea.vmem %s4998_s9, 32 }
 0x325   : > { %p5000_p5 = scmp.lt.s32.totalorder %s7635_s6, %s4998_s9  ;;  %p5001_p10 = scmp.lt.s32.totalorder %s4999_s10, %s4993_s27 }
 0x326   : > { %p4996_p9 = pneg %p4995_p0 }
 0x327   : > { %p5002_p1 = por %p5001_p10, %p5000_p5 }
 0x329   : > { %p5003_p3 = pnand %p5002_p1, %p4996_p9 }
 0x32b   : > { %5006 = shalt.err (!%p5003_p3)
}
 0x32c   : > { %s5007_s12 = scalar_lea.hbm %s7633_s18, 16  ;;  %s5011_s25 = scalar_lea.hbm %s7707_s4, 64 }
 0x32d   : > { %p5008_p12 = scmp.ne.s32.totalorder %s7633_s18, %s5007_s12  ;;  %p5012_p2 = scmp.lt.u32.totalorder %s7633_s18, %s7707_s4 }
 0x32e   : > { %p5013_p4 = scmp.lt.u32.totalorder %s5011_s25, %s5007_s12  ;;  %p5015_p7 = scmp.lt.u32.totalorder %s5007_s12, %s7633_s18 }
 0x32f   : > { %p5009_p8 = pnand %p5008_p12, %p8034_p11 }
 0x330   : > { %p5014_p6 = por %p5013_p4, %p5012_p2 }
 0x331   : > { %p5010_p13 = pneg %p5009_p8 }
 0x332   : > { %p5016_p0 = por %p5015_p7, %p5014_p6 }
 0x334   : > { %p5017_p9 = pnand %p5016_p0, %p5010_p13 }
 0x336   : > { %5020 = shalt.err (!%p5017_p9)
}
 0x337   : > { %4760 = dma.vmem_to_hbm [thread:$0]  (%p8034_p11), %s7635_s6, 16, %s7633_s18, %s4338_s13  }
 0x338 PF: > { %p4778_p5 = scmp.ge.s32.totalorder %s5083_s20, 2  ;;  %s4377_s26 = sand.u32 1, %s5063_s15  }
 0x339   : > { %p8035_p10 = scmp.ne.s32.totalorder %s7828_s30, 0  ;;  %s4378_s8 = scalar_lea.sflag [#allocation7], %s4377_s26 }
 0x33b   : > { %p4771_p1 = pnand %p4778_p5, %p8035_p10 }
 0x33d   : > { %5054 = dma.done.wait (!%p4771_p1), %s4378_s8, 16  }
 0x33e   : > { %5056 = vsyncadd (!%p4771_p1), %s4378_s8, 4294967280  ;;  %s4386_s14 = scalar_lea.sflag [#allocation12], %s4377_s26 }
 0x33f   : > { %5058 = dma.done.wait (!%p4771_p1), %s4386_s14, 16  }
 0x340   : > { %5060 = vsyncadd (!%p4771_p1), %s4386_s14, 4294967280  ;;  %s27_s20 = sadd.s32 1, %s5083_s20   ;;  %s8036_s15 = smov %s5067_s16 }
 0x341   : > { %p24_p3 = scmp.ge.s32.totalorder %s27_s20, 6   ;;  %s8037_s16 = smov %s5071_s17 }
 0x342   : > { %s8038_s17 = smov %s5179_s29  ;;  %s8039_s18 = smov %s5079_s19 }
 0x343   : > { %s8040_s19 = smov %s8042_s23  ;;  %26 = sbr.rel (!%p24_p3) target bundleno = 10 (0xa), region = 118 }
 0x34a   :  { %4390 = vsyncpa [#allocation6], 1 }
 0x34b   :  { %4392 = vsyncpa [#allocation6 + $0x1], 1 }
 0x34c   :  { %4393 = vsyncpa [#allocation9], 1 }
 0x34d   :  { %4395 = vsyncpa [#allocation9 + $0x1], 1 }
 0x34e   :  { %4396 = vsyncpa [#allocation7], 1 }
 0x34f   :  { %4398 = vsyncpa [#allocation7 + $0x1], 1 }
 0x350   :  { %4399 = vsyncpa [#allocation12], 1 }
 0x351   :  { %4401 = vsyncpa [#allocation12 + $0x1], 1 }

</bundles_post_ra>
